<compile_context>
chip_gen: v7x
topology: tpu7x:2x2x1
jax: 0.10.0
libtpu: 0.0.40
codegen_flags: <defaults>
</compile_context>

<pallas_src>
import functools
import math

import jax
import jax.numpy as jnp
from jax import lax
from jax.experimental import pallas as pl
from jax.experimental.pallas import tpu as pltpu


# ----------------------------------------------------------------------------
# helpers
# ----------------------------------------------------------------------------
def _round_up(n, m):
    return ((n + m - 1) // m) * m


def _pad_to(a, shape):
    pads = [(0, t - s) for s, t in zip(a.shape, shape)]
    if all(p == (0, 0) for p in pads):
        return a
    return jnp.pad(a, pads)


def _row_tile(M, target):
    """Token-row tile (multiple of 8) and padded row count."""
    Mp = _round_up(M, 8)
    tm = min(target, Mp)
    return tm, _round_up(Mp, tm)


def _col_tile(N, target):
    """Output-column tile: full if small, else a 128-multiple divisor."""
    if N <= target:
        return N
    for t in (target, 256, 128):
        if N % t == 0:
            return t
    return N                      # odd N: keep full (rare / small)


def _seq_tile(S, target):
    Sp = _round_up(S, 8)
    return Sp if Sp <= target else target   # target is a multiple of 128


# ----------------------------------------------------------------------------
# Fused (optional LayerNorm) + multi-output projection (+ optional residual)
#   grid = (row tiles, output-column tiles)    column axis streams the weights
# ----------------------------------------------------------------------------
def _make_proj_kernel(n_out, apply_ln, fuse_res, eps=1e-5):
    def kernel(*refs):
        it = iter(refs)
        x_ref = next(it)
        g_ref = next(it) if apply_ln else None
        b_ref = next(it) if apply_ln else None
        w_refs = [next(it) for _ in range(n_out)]
        bias_refs = [next(it) for _ in range(n_out)]
        r_refs = [next(it) for _ in range(n_out)] if fuse_res else []
        out_refs = [next(it) for _ in range(n_out)]
        xn_ref = next(it)                      # (tm, K) bf16 scratch

        # LN (or just bf16 cast) once per row tile, reused across column tiles.
        @pl.when(pl.program_id(1) == 0)
        def _():
            x = x_ref[...].astype(jnp.float32)
            if apply_ln:
                mean = jnp.mean(x, axis=-1, keepdims=True)
                xc = x - mean
                var = jnp.mean(xc * xc, axis=-1, keepdims=True)
                x = xc * lax.rsqrt(var + eps) * g_ref[...] + b_ref[...]
            xn_ref[...] = x.astype(jnp.bfloat16)

        xn = xn_ref[...]
        for o in range(n_out):
            y = jnp.dot(xn, w_refs[o][...], preferred_element_type=jnp.float32)
            y = y + bias_refs[o][...]
            if fuse_res:
                y = y + r_refs[o][...].astype(jnp.float32)
            out_refs[o][...] = y.astype(out_refs[o].dtype)

    return kernel


def fused_proj(x2d, weights, biases, *, gamma=None, beta=None, residuals=None,
               out_dtype=None, tm=128, tn=256):
    """x2d: (M, K).  weights[i]: (N, K) PyTorch layout.  Returns list of (M, N)."""
    M, K = x2d.shape
    n_out = len(weights)
    N = weights[0].shape[0]
    out_dtype = out_dtype if out_dtype is not None else x2d.dtype
    apply_ln = gamma is not None
    fuse_res = residuals is not None

    tm, Mp = _row_tile(M, tm)
    tn = _col_tile(N, tn)
    xp = _pad_to(x2d, (Mp, K))

    args = [xp]
    in_specs = [pl.BlockSpec((tm, K), lambda i, j: (i, 0))]
    if apply_ln:
        args += [gamma.reshape(1, K).astype(jnp.float32),
                 beta.reshape(1, K).astype(jnp.float32)]
        in_specs += [pl.BlockSpec((1, K), lambda i, j: (0, 0))] * 2
    args += [w.T.astype(jnp.bfloat16) for w in weights]           # (K, N) bf16
    in_specs += [pl.BlockSpec((K, tn), lambda i, j: (0, j))] * n_out
    args += [b.reshape(1, N).astype(jnp.float32) for b in biases]
    in_specs += [pl.BlockSpec((1, tn), lambda i, j: (0, j))] * n_out
    if fuse_res:
        args += [_pad_to(r, (Mp, N)) for r in residuals]
        in_specs += [pl.BlockSpec((tm, tn), lambda i, j: (i, j))] * n_out

    outs = pl.pallas_call(
        _make_proj_kernel(n_out, apply_ln, fuse_res),
        out_shape=[jax.ShapeDtypeStruct((Mp, N), out_dtype) for _ in range(n_out)],
        grid=(Mp // tm, N // tn),
        in_specs=in_specs,
        out_specs=[pl.BlockSpec((tm, tn), lambda i, j: (i, j))] * n_out,
        scratch_shapes=[pltpu.VMEM((tm, K), jnp.bfloat16)],
        compiler_params=pltpu.CompilerParams(
            dimension_semantics=("parallel", "arbitrary")),
    )(*args)
    return [o[:M] for o in outs]


# ----------------------------------------------------------------------------
# Multi-head attention core (flash-style over Sk, all heads per grid step,
# lane-dense (tq, H) output written directly in (B, Sq, H) layout).
# The 1/sqrt(d_k) scale is folded into the Q projection; masked positions -1e9.
# ----------------------------------------------------------------------------
def _mha_kernel(q_ref, k_ref, v_ref, m_ref, o_ref, m_sc, l_sc, acc_sc,
                *, heads, d_k):
    ki = pl.program_id(2)

    @pl.when(ki == 0)
    def _():
        m_sc[...] = jnp.full_like(m_sc, -jnp.inf)
        l_sc[...] = jnp.zeros_like(l_sc)
        acc_sc[...] = jnp.zeros_like(acc_sc)

    q = q_ref[0]                                        # (tq, H) bf16, scaled
    k = k_ref[0]                                        # (tk, H) bf16
    v = v_ref[0]                                        # (tk, H) bf16
    msk = m_ref[0]                                      # (tq, tk) f32

    for h in range(heads):
        sl = slice(h * d_k, (h + 1) * d_k)
        s = lax.dot_general(q[:, sl], k[:, sl], (((1,), (1,)), ((), ())),
                            preferred_element_type=jnp.float32)   # (tq, tk)
        s = jnp.where(msk == 0, -1e9, s)
        m_prev = m_sc[h]                                # (tq, 1)
        m_new = jnp.maximum(m_prev, jnp.max(s, axis=-1, keepdims=True))
        alpha = jnp.exp(m_prev - m_new)
        p = jnp.exp(s - m_new)
        l_sc[h] = alpha * l_sc[h] + jnp.sum(p, axis=-1, keepdims=True)
        pv = jnp.dot(p.astype(jnp.bfloat16), v[:, sl],
                     preferred_element_type=jnp.float32)          # (tq, d_k)
        acc_sc[h] = alpha * acc_sc[h] + pv
        m_sc[h] = m_new

    @pl.when(ki == pl.num_programs(2) - 1)
    def _():
        cols = []
        for h in range(heads):
            inv = pl.reciprocal(l_sc[h], approx=True)   # (tq, 1)  EUP
            cols.append(acc_sc[h] * inv)
        o_ref[0] = jnp.concatenate(cols, axis=-1).astype(o_ref.dtype)


def attention_core(q, k, v, mask, heads, *, tq=128, tk=128):
    """q: (B, Sq, H) bf16 (scale folded); k, v: (B, Sk, H) bf16; mask: (B, Sq, Sk)."""
    B, Sq, H = q.shape
    Sk = k.shape[1]
    d_k = H // heads

    tq = _seq_tile(Sq, tq)
    tk = _seq_tile(Sk, tk)
    Sqp = _round_up(Sq, tq)
    Skp = _round_up(Sk, tk)
    qp = _pad_to(q, (B, Sqp, H))
    kp = _pad_to(k, (B, Skp, H))
    vp = _pad_to(v, (B, Skp, H))
    mp = _pad_to(mask.astype(jnp.float32), (B, Sqp, Skp))  # pad cols -> masked

    out = pl.pallas_call(
        functools.partial(_mha_kernel, heads=heads, d_k=d_k),
        out_shape=jax.ShapeDtypeStruct((B, Sqp, H), jnp.bfloat16),
        grid=(B, Sqp // tq, Skp // tk),
        in_specs=[
            pl.BlockSpec((1, tq, H), lambda b, qi, ki: (b, qi, 0)),
            pl.BlockSpec((1, tk, H), lambda b, qi, ki: (b, ki, 0)),
            pl.BlockSpec((1, tk, H), lambda b, qi, ki: (b, ki, 0)),
            pl.BlockSpec((1, tq, tk), lambda b, qi, ki: (b, qi, ki)),
        ],
        out_specs=pl.BlockSpec((1, tq, H), lambda b, qi, ki: (b, qi, 0)),
        scratch_shapes=[
            pltpu.VMEM((heads, tq, 1), jnp.float32),     # running max
            pltpu.VMEM((heads, tq, 1), jnp.float32),     # running sum
            pltpu.VMEM((heads, tq, d_k), jnp.float32),   # output accumulator
        ],
        compiler_params=pltpu.CompilerParams(
            dimension_semantics=("parallel", "parallel", "arbitrary")),
    )(qp, kp, vp, mp)
    return out[:, :Sq]


# ----------------------------------------------------------------------------
# Fused LN3 + FeedForward:  LN(x) @ W1 -> +b1 -> ReLU -> @W2 (d_ff reduction)
#                           -> +b2 -> + x (pre-LN residual)
# ----------------------------------------------------------------------------
def _ln_ffn_kernel(x_ref, g_ref, b_ref, w1_ref, b1_ref, w2_ref, b2_ref, o_ref,
                   xn_ref, acc_ref, *, eps):
    f = pl.program_id(1)

    @pl.when(f == 0)
    def _():
        x = x_ref[...].astype(jnp.float32)
        mean = jnp.mean(x, axis=-1, keepdims=True)
        xc = x - mean
        var = jnp.mean(xc * xc, axis=-1, keepdims=True)
        xn = xc * lax.rsqrt(var + eps) * g_ref[...] + b_ref[...]
        xn_ref[...] = xn.astype(jnp.bfloat16)
        acc_ref[...] = jnp.zeros_like(acc_ref)

    h = jnp.dot(xn_ref[...], w1_ref[...], preferred_element_type=jnp.float32)
    h = jnp.maximum(h + b1_ref[...], 0.0)                # ReLU; dropout == identity
    acc_ref[...] += jnp.dot(h.astype(jnp.bfloat16), w2_ref[...],
                            preferred_element_type=jnp.float32)

    @pl.when(f == pl.num_programs(1) - 1)
    def _():
        y = acc_ref[...] + b2_ref[...] + x_ref[...].astype(jnp.float32)
        o_ref[...] = y.astype(o_ref.dtype)


def ln_feed_forward(x2d, gamma, beta, w1, b1, w2, b2, *, tm=128, tf=512):
    """x2d: (M, H). w1: (F, H), b1: (F,), w2: (H, F), b2: (H,) — PyTorch layout."""
    M, H = x2d.shape
    F = w1.shape[0]
    tm, Mp = _row_tile(M, tm)
    tf = _col_tile(F, tf)
    Fp = _round_up(F, tf)

    xp = _pad_to(x2d, (Mp, H))
    w1t = _pad_to(w1.T, (H, Fp)).astype(jnp.bfloat16)
    b1r = _pad_to(b1.reshape(1, F), (1, Fp)).astype(jnp.float32)
    w2t = _pad_to(w2.T, (Fp, H)).astype(jnp.bfloat16)
    b2r = b2.reshape(1, H).astype(jnp.float32)
    g = gamma.reshape(1, H).astype(jnp.float32)
    bt = beta.reshape(1, H).astype(jnp.float32)

    n_row = Mp // tm
    flops = 4 * Mp * H * Fp
    bytes_accessed = int(xp.size * xp.dtype.itemsize
                         + n_row * (w1t.size + w2t.size) * 2      # re-streamed per row tile
                         + n_row * (b1r.size + b2r.size + g.size + bt.size) * 4
                         + Mp * H * jnp.dtype(x2d.dtype).itemsize)

    out = pl.pallas_call(
        functools.partial(_ln_ffn_kernel, eps=1e-5),
        out_shape=jax.ShapeDtypeStruct((Mp, H), x2d.dtype),
        grid=(n_row, Fp // tf),
        in_specs=[
            pl.BlockSpec((tm, H), lambda i, f: (i, 0)),   # x (LN input + residual)
            pl.BlockSpec((1, H), lambda i, f: (0, 0)),    # gamma
            pl.BlockSpec((1, H), lambda i, f: (0, 0)),    # beta
            pl.BlockSpec((H, tf), lambda i, f: (0, f)),   # W1^T column tile
            pl.BlockSpec((1, tf), lambda i, f: (0, f)),   # b1 tile
            pl.BlockSpec((tf, H), lambda i, f: (f, 0)),   # W2^T row tile
            pl.BlockSpec((1, H), lambda i, f: (0, 0)),    # b2
        ],
        out_specs=pl.BlockSpec((tm, H), lambda i, f: (i, 0)),
        scratch_shapes=[pltpu.VMEM((tm, H), jnp.bfloat16),    # LN(x) bf16
                        pltpu.VMEM((tm, H), jnp.float32)],    # accumulator
        compiler_params=pltpu.CompilerParams(
            dimension_semantics=("parallel", "arbitrary")),
        cost_estimate=pl.CostEstimate(flops=flops, transcendentals=0,
                                      bytes_accessed=bytes_accessed),
    )(xp, g, bt, w1t, b1r, w2t, b2r)
    return out[:M]


# ----------------------------------------------------------------------------
# DecoderLayer forward
# ----------------------------------------------------------------------------
@functools.partial(jax.jit, static_argnames=("heads",))
def decoder_layer(x, enc_output, src_mask, tgt_mask, params, *, heads):
    B, S, H = x.shape
    assert H % heads == 0
    d_k = H // heads
    scale = 1.0 / math.sqrt(d_k)

    def attn_block(x, kv_src, mask, p, ln_g, ln_b, self_attn):
        Bq, Sq, Hh = x.shape
        x2d = x.reshape(Bq * Sq, Hh)
        wq_s = p["wq"] * scale                       # fold 1/sqrt(d_k) into Q proj
        bq_s = p["bq"] * scale
        if self_attn:
            q2d, k2d, v2d = fused_proj(
                x2d, [wq_s, p["wk"], p["wv"]], [bq_s, p["bk"], p["bv"]],
                gamma=ln_g, beta=ln_b, out_dtype=jnp.bfloat16)
            Sk = Sq
        else:
            Sk = kv_src.shape[1]
            kv2d = kv_src.reshape(Bq * Sk, Hh)
            (q2d,) = fused_proj(x2d, [wq_s], [bq_s], gamma=ln_g, beta=ln_b,
                                out_dtype=jnp.bfloat16)
            k2d, v2d = fused_proj(kv2d, [p["wk"], p["wv"]], [p["bk"], p["bv"]],
                                  out_dtype=jnp.bfloat16)       # enc: no LN
        q = q2d.reshape(Bq, Sq, Hh)
        k = k2d.reshape(Bq, Sk, Hh)
        v = v2d.reshape(Bq, Sk, Hh)
        ctx = attention_core(q, k, v, mask, heads)              # (B, Sq, H) bf16
        # out-projection with fused residual (dropout == identity)
        (out2d,) = fused_proj(ctx.reshape(Bq * Sq, Hh), [p["wo"]], [p["bo"]],
                              residuals=[x2d], out_dtype=x.dtype)
        return out2d.reshape(Bq, Sq, Hh)

    # 1) self-attention block (LN1 fused into QKV projection)
    x = attn_block(x, x, tgt_mask, params["attn1"],
                   params["ln1_g"], params["ln1_b"], self_attn=True)
    # 2) cross-attention block (LN2 fused into Q projection)
    x = attn_block(x, enc_output, src_mask, params["attn2"],
                   params["ln2_g"], params["ln2_b"], self_attn=False)
    # 3) feed-forward block (LN3 fused into FFN kernel)
    x2d = x.reshape(B * S, H)
    y = ln_feed_forward(x2d, params["ln3_g"], params["ln3_b"],
                        params["ff_w1"], params["ff_b1"],
                        params["ff_w2"], params["ff_b2"])
    return y.reshape(B, S, H)


# ----------------------------------------------------------------------------
# Pure-JAX reference (f32) and parameter init
# ----------------------------------------------------------------------------
def _ref_layer_norm(x, g, b, eps=1e-5):
    mean = x.mean(-1, keepdims=True)
    var = ((x - mean) ** 2).mean(-1, keepdims=True)
    return (x - mean) / jnp.sqrt(var + eps) * g + b


def _ref_mha(q, k, v, mask, p, heads):
    B, Sq, H = q.shape
    Sk = k.shape[1]
    dk = H // heads
    lin = lambda x, w, b: x @ w.T + b
    q = lin(q, p["wq"], p["bq"]).reshape(B, Sq, heads, dk).transpose(0, 2, 1, 3)
    k = lin(k, p["wk"], p["bk"]).reshape(B, Sk, heads, dk).transpose(0, 2, 1, 3)
    v = lin(v, p["wv"], p["bv"]).reshape(B, Sk, heads, dk).transpose(0, 2, 1, 3)
    s = (q @ k.transpose(0, 1, 3, 2)) / math.sqrt(dk)
    s = jnp.where(mask.reshape(B, 1, Sq, Sk) == 0, -1e9, s)
    a = jax.nn.softmax(s, axis=-1)
    o = (a @ v).transpose(0, 2, 1, 3).reshape(B, Sq, H)
    return o @ p["wo"].T + p["bo"]


def _ref_decoder(x, enc, src_mask, tgt_mask, params, heads):
    t = _ref_layer_norm(x, params["ln1_g"], params["ln1_b"])
    x = x + _ref_mha(t, t, t, tgt_mask, params["attn1"], heads)
    t = _ref_layer_norm(x, params["ln2_g"], params["ln2_b"])
    x = x + _ref_mha(t, enc, enc, src_mask, params["attn2"], heads)
    t = _ref_layer_norm(x, params["ln3_g"], params["ln3_b"])
    ff = jnp.maximum(t @ params["ff_w1"].T + params["ff_b1"], 0.0) \
        @ params["ff_w2"].T + params["ff_b2"]
    return x + ff


def _init_linear(key, out_features, in_features, dtype=jnp.float32):
    kw, kb = jax.random.split(key)
    bound = 1.0 / (in_features ** 0.5)
    w = jax.random.uniform(kw, (out_features, in_features), dtype,
                           minval=-bound, maxval=bound)
    b = jax.random.uniform(kb, (out_features,), dtype,
                           minval=-bound, maxval=bound)
    return w, b


def _init_mha(key, H):
    ks = jax.random.split(key, 4)
    wq, bq = _init_linear(ks[0], H, H)
    wk, bk = _init_linear(ks[1], H, H)
    wv, bv = _init_linear(ks[2], H, H)
    wo, bo = _init_linear(ks[3], H, H)
    return dict(wq=wq, bq=bq, wk=wk, bk=bk, wv=wv, bv=bv, wo=wo, bo=bo)


if __name__ == "__main__":
    B, S, S_enc, H, heads, d_ff = 2, 8, 8, 32, 4, 2048

    key = jax.random.PRNGKey(0)
    kx, ke, ka1, ka2, kf1, kf2 = jax.random.split(key, 6)

    x = jax.random.normal(kx, (B, S, H), jnp.float32)
    enc = jax.random.normal(ke, (B, S_enc, H), jnp.float32)

    # causal target mask; source mask with the last enc position of batch 1 masked
    tgt_mask = jnp.broadcast_to(jnp.tril(jnp.ones((S, S), jnp.float32)), (B, S, S))
    src_mask = jnp.ones((B, S, S_enc), jnp.float32).at[1, :, -1].set(0.0)

    ff_w1, ff_b1 = _init_linear(kf1, d_ff, H)   # linear_1: hidden -> d_ff
    ff_w2, ff_b2 = _init_linear(kf2, H, d_ff)   # linear_2: d_ff -> hidden
    params = dict(
        ln1_g=jnp.ones((H,), jnp.float32), ln1_b=jnp.zeros((H,), jnp.float32),
        ln2_g=jnp.ones((H,), jnp.float32), ln2_b=jnp.zeros((H,), jnp.float32),
        ln3_g=jnp.ones((H,), jnp.float32), ln3_b=jnp.zeros((H,), jnp.float32),
        attn1=_init_mha(ka1, H), attn2=_init_mha(ka2, H),
        ff_w1=ff_w1, ff_b1=ff_b1, ff_w2=ff_w2, ff_b2=ff_b2,
    )

    out = decoder_layer(x, enc, src_mask, tgt_mask, params, heads=heads)
    jax.block_until_ready(out)

    ref = _ref_decoder(x, enc, src_mask, tgt_mask, params, heads)
    assert out.shape == (B, S, H)
    assert jnp.allclose(out, ref, atol=2e-2, rtol=2e-2), \
        f"mismatch vs reference, max abs diff {jnp.max(jnp.abs(out - ref))}"

    print("KERNEL_OK")
</pallas_src>

<mosaic_0001>
module attributes {stable_mosaic.version = 11 : i64} {
  func.func @kernel(%arg0: i32, %arg1: i32, %arg2: memref<16x32xf32, #tpu.memory_space<vmem>>, %arg3: memref<1x32xf32, #tpu.memory_space<vmem>>, %arg4: memref<1x32xf32, #tpu.memory_space<vmem>>, %arg5: memref<32x32xbf16, #tpu.memory_space<vmem>>, %arg6: memref<32x32xbf16, #tpu.memory_space<vmem>>, %arg7: memref<32x32xbf16, #tpu.memory_space<vmem>>, %arg8: memref<1x32xf32, #tpu.memory_space<vmem>>, %arg9: memref<1x32xf32, #tpu.memory_space<vmem>>, %arg10: memref<1x32xf32, #tpu.memory_space<vmem>>, %arg11: memref<16x32xbf16, #tpu.memory_space<vmem>>, %arg12: memref<16x32xbf16, #tpu.memory_space<vmem>>, %arg13: memref<16x32xbf16, #tpu.memory_space<vmem>>, %arg14: memref<16x32xbf16, #tpu.memory_space<vmem>>) attributes {dimension_semantics = [#tpu.dimension_semantics<parallel>, #tpu.dimension_semantics<arbitrary>], iteration_bounds = array<i64: 1, 1>, scalar_prefetch = 0 : i64, scratch_operands = 1 : i64, tpu.core_type = #tpu.core_type<tc>, window_params = [{transform_indices = @transform_0, window_bounds = array<i64: 16, 32>}, {pipeline_mode = #tpu.pipeline_mode<synchronous>, transform_indices = @transform_1, window_bounds = array<i64: 1, 32>}, {pipeline_mode = #tpu.pipeline_mode<synchronous>, transform_indices = @transform_2, window_bounds = array<i64: 1, 32>}, {transform_indices = @transform_3, window_bounds = array<i64: 32, 32>}, {transform_indices = @transform_4, window_bounds = array<i64: 32, 32>}, {transform_indices = @transform_5, window_bounds = array<i64: 32, 32>}, {transform_indices = @transform_6, window_bounds = array<i64: 1, 32>}, {transform_indices = @transform_7, window_bounds = array<i64: 1, 32>}, {transform_indices = @transform_8, window_bounds = array<i64: 1, 32>}, {transform_indices = @transform_9, window_bounds = array<i64: 16, 32>}, {transform_indices = @transform_10, window_bounds = array<i64: 16, 32>}, {transform_indices = @transform_11, window_bounds = array<i64: 16, 32>}]} {
    %c0_i32 = arith.constant 0 : i32
    %0 = arith.cmpi eq, %arg1, %c0_i32 : i32
    %1 = arith.extui %0 : i1 to i32
    %c0_i32_0 = arith.constant 0 : i32
    %2 = arith.cmpi ne, %1, %c0_i32_0 : i32
    scf.if %2 {
      %c0_22 = arith.constant 0 : index
      %c0_23 = arith.constant 0 : index
      %25 = vector.load %arg2[%c0_22, %c0_23] : memref<16x32xf32, #tpu.memory_space<vmem>>, vector<16x32xf32>
      %cst_24 = arith.constant dense<0.000000e+00> : vector<16xf32>
      %26 = vector.multi_reduction <add>, %25, %cst_24 [1] : vector<16x32xf32> to vector<16xf32>
      %27 = vector.shape_cast %26 : vector<16xf32> to vector<16x1xf32>
      %cst_25 = arith.constant 3.200000e+01 : f32
      %28 = vector.broadcast %cst_25 : f32 to vector<16x1xf32>
      %29 = arith.divf %27, %28 : vector<16x1xf32>
      %30 = vector.broadcast %29 : vector<16x1xf32> to vector<16x32xf32>
      %31 = arith.subf %25, %30 : vector<16x32xf32>
      %32 = arith.mulf %31, %31 : vector<16x32xf32>
      %cst_26 = arith.constant dense<0.000000e+00> : vector<16xf32>
      %33 = vector.multi_reduction <add>, %32, %cst_26 [1] : vector<16x32xf32> to vector<16xf32>
      %34 = vector.shape_cast %33 : vector<16xf32> to vector<16x1xf32>
      %cst_27 = arith.constant 3.200000e+01 : f32
      %35 = vector.broadcast %cst_27 : f32 to vector<16x1xf32>
      %36 = arith.divf %34, %35 : vector<16x1xf32>
      %cst_28 = arith.constant 9.99999974E-6 : f32
      %37 = vector.broadcast %cst_28 : f32 to vector<16x1xf32>
      %38 = arith.addf %36, %37 : vector<16x1xf32>
      %39 = math.rsqrt %38 : vector<16x1xf32>
      %40 = vector.broadcast %39 : vector<16x1xf32> to vector<16x32xf32>
      %41 = arith.mulf %31, %40 : vector<16x32xf32>
      %c0_29 = arith.constant 0 : index
      %c0_30 = arith.constant 0 : index
      %42 = vector.load %arg3[%c0_29, %c0_30] : memref<1x32xf32, #tpu.memory_space<vmem>>, vector<1x32xf32>
      %43 = vector.broadcast %42 : vector<1x32xf32> to vector<16x32xf32>
      %44 = arith.mulf %41, %43 : vector<16x32xf32>
      %c0_31 = arith.constant 0 : index
      %c0_32 = arith.constant 0 : index
      %45 = vector.load %arg4[%c0_31, %c0_32] : memref<1x32xf32, #tpu.memory_space<vmem>>, vector<1x32xf32>
      %46 = vector.broadcast %45 : vector<1x32xf32> to vector<16x32xf32>
      %47 = arith.addf %44, %46 : vector<16x32xf32>
      %48 = arith.truncf %47 : vector<16x32xf32> to vector<16x32xbf16>
      %c0_33 = arith.constant 0 : index
      %c0_34 = arith.constant 0 : index
      %49 = vector.load %arg14[%c0_33, %c0_34] : memref<16x32xbf16, #tpu.memory_space<vmem>>, vector<16x32xbf16>
      tpu.vector_store %arg14[%c0_33, %c0_34], %48 {strides = array<i32>} : memref<16x32xbf16, #tpu.memory_space<vmem>>, vector<16x32xbf16>,
    } else {
    }
    %c0 = arith.constant 0 : index
    %c0_1 = arith.constant 0 : index
    %3 = vector.load %arg14[%c0, %c0_1] : memref<16x32xbf16, #tpu.memory_space<vmem>>, vector<16x32xbf16>
    %c0_2 = arith.constant 0 : index
    %c0_3 = arith.constant 0 : index
    %4 = vector.load %arg5[%c0_2, %c0_3] : memref<32x32xbf16, #tpu.memory_space<vmem>>, vector<32x32xbf16>
    %cst = arith.constant dense<0.000000e+00> : vector<16x32xf32>
    %5 = tpu.matmul %3, %4, %cst {dimension_numbers = #tpu.dot_dimension_numbers<[1], [0], [0], [1], [0, 0, 1, 1], [], []>} : vector<16x32xbf16>, vector<32x32xbf16>, vector<16x32xf32> -> vector<16x32xf32>
    %c0_4 = arith.constant 0 : index
    %c0_5 = arith.constant 0 : index
    %6 = vector.load %arg8[%c0_4, %c0_5] : memref<1x32xf32, #tpu.memory_space<vmem>>, vector<1x32xf32>
    %7 = vector.broadcast %6 : vector<1x32xf32> to vector<16x32xf32>
    %8 = arith.addf %5, %7 : vector<16x32xf32>
    %9 = arith.truncf %8 : vector<16x32xf32> to vector<16x32xbf16>
    %c0_6 = arith.constant 0 : index
    %c0_7 = arith.constant 0 : index
    %10 = vector.load %arg11[%c0_6, %c0_7] : memref<16x32xbf16, #tpu.memory_space<vmem>>, vector<16x32xbf16>
    tpu.vector_store %arg11[%c0_6, %c0_7], %9 {strides = array<i32>} : memref<16x32xbf16, #tpu.memory_space<vmem>>, vector<16x32xbf16>,
    %c0_8 = arith.constant 0 : index
    %c0_9 = arith.constant 0 : index
    %11 = vector.load %arg6[%c0_8, %c0_9] : memref<32x32xbf16, #tpu.memory_space<vmem>>, vector<32x32xbf16>
    %cst_10 = arith.constant dense<0.000000e+00> : vector<16x32xf32>
    %12 = tpu.matmul %3, %11, %cst_10 {dimension_numbers = #tpu.dot_dimension_numbers<[1], [0], [0], [1], [0, 0, 1, 1], [], []>} : vector<16x32xbf16>, vector<32x32xbf16>, vector<16x32xf32> -> vector<16x32xf32>
    %c0_11 = arith.constant 0 : index
    %c0_12 = arith.constant 0 : index
    %13 = vector.load %arg9[%c0_11, %c0_12] : memref<1x32xf32, #tpu.memory_space<vmem>>, vector<1x32xf32>
    %14 = vector.broadcast %13 : vector<1x32xf32> to vector<16x32xf32>
    %15 = arith.addf %12, %14 : vector<16x32xf32>
    %16 = arith.truncf %15 : vector<16x32xf32> to vector<16x32xbf16>
    %c0_13 = arith.constant 0 : index
    %c0_14 = arith.constant 0 : index
    %17 = vector.load %arg12[%c0_13, %c0_14] : memref<16x32xbf16, #tpu.memory_space<vmem>>, vector<16x32xbf16>
    tpu.vector_store %arg12[%c0_13, %c0_14], %16 {strides = array<i32>} : memref<16x32xbf16, #tpu.memory_space<vmem>>, vector<16x32xbf16>,
    %c0_15 = arith.constant 0 : index
    %c0_16 = arith.constant 0 : index
    %18 = vector.load %arg7[%c0_15, %c0_16] : memref<32x32xbf16, #tpu.memory_space<vmem>>, vector<32x32xbf16>
    %cst_17 = arith.constant dense<0.000000e+00> : vector<16x32xf32>
    %19 = tpu.matmul %3, %18, %cst_17 {dimension_numbers = #tpu.dot_dimension_numbers<[1], [0], [0], [1], [0, 0, 1, 1], [], []>} : vector<16x32xbf16>, vector<32x32xbf16>, vector<16x32xf32> -> vector<16x32xf32>
    %c0_18 = arith.constant 0 : index
    %c0_19 = arith.constant 0 : index
    %20 = vector.load %arg10[%c0_18, %c0_19] : memref<1x32xf32, #tpu.memory_space<vmem>>, vector<1x32xf32>
    %21 = vector.broadcast %20 : vector<1x32xf32> to vector<16x32xf32>
    %22 = arith.addf %19, %21 : vector<16x32xf32>
    %23 = arith.truncf %22 : vector<16x32xf32> to vector<16x32xbf16>
    %c0_20 = arith.constant 0 : index
    %c0_21 = arith.constant 0 : index
    %24 = vector.load %arg13[%c0_20, %c0_21] : memref<16x32xbf16, #tpu.memory_space<vmem>>, vector<16x32xbf16>
    tpu.vector_store %arg13[%c0_20, %c0_21], %23 {strides = array<i32>} : memref<16x32xbf16, #tpu.memory_space<vmem>>, vector<16x32xbf16>,
    return
  }
  func.func @transform_0(%arg0: i32, %arg1: i32) -> (i32, i32) {
    %c0_i32 = arith.constant 0 : i32
    %c0_i32_0 = arith.constant 0 : i32
    return %arg0, %c0_i32 : i32, i32
  }
  func.func @transform_1(%arg0: i32, %arg1: i32) -> (i32, i32) {
    %c0_i32 = arith.constant 0 : i32
    %c0_i32_0 = arith.constant 0 : i32
    %c0_i32_1 = arith.constant 0 : i32
    return %c0_i32, %c0_i32_0 : i32, i32
  }
  func.func @transform_2(%arg0: i32, %arg1: i32) -> (i32, i32) {
    %c0_i32 = arith.constant 0 : i32
    %c0_i32_0 = arith.constant 0 : i32
    %c0_i32_1 = arith.constant 0 : i32
    return %c0_i32, %c0_i32_0 : i32, i32
  }
  func.func @transform_3(%arg0: i32, %arg1: i32) -> (i32, i32) {
    %c0_i32 = arith.constant 0 : i32
    %c0_i32_0 = arith.constant 0 : i32
    return %c0_i32, %arg1 : i32, i32
  }
  func.func @transform_4(%arg0: i32, %arg1: i32) -> (i32, i32) {
    %c0_i32 = arith.constant 0 : i32
    %c0_i32_0 = arith.constant 0 : i32
    return %c0_i32, %arg1 : i32, i32
  }
  func.func @transform_5(%arg0: i32, %arg1: i32) -> (i32, i32) {
    %c0_i32 = arith.constant 0 : i32
    %c0_i32_0 = arith.constant 0 : i32
    return %c0_i32, %arg1 : i32, i32
  }
  func.func @transform_6(%arg0: i32, %arg1: i32) -> (i32, i32) {
    %c0_i32 = arith.constant 0 : i32
    %c0_i32_0 = arith.constant 0 : i32
    return %c0_i32, %arg1 : i32, i32
  }
  func.func @transform_7(%arg0: i32, %arg1: i32) -> (i32, i32) {
    %c0_i32 = arith.constant 0 : i32
    %c0_i32_0 = arith.constant 0 : i32
    return %c0_i32, %arg1 : i32, i32
  }
  func.func @transform_8(%arg0: i32, %arg1: i32) -> (i32, i32) {
    %c0_i32 = arith.constant 0 : i32
    %c0_i32_0 = arith.constant 0 : i32
    return %c0_i32, %arg1 : i32, i32
  }
  func.func @transform_9(%arg0: i32, %arg1: i32) -> (i32, i32) {
    %c0_i32 = arith.constant 0 : i32
    return %arg0, %arg1 : i32, i32
  }
  func.func @transform_10(%arg0: i32, %arg1: i32) -> (i32, i32) {
    %c0_i32 = arith.constant 0 : i32
    return %arg0, %arg1 : i32, i32
  }
  func.func @transform_11(%arg0: i32, %arg1: i32) -> (i32, i32) {
    %c0_i32 = arith.constant 0 : i32
    return %arg0, %arg1 : i32, i32
  }
}

module attributes {stable_mosaic.version = 11 : i64} {
  func.func @kernel(%arg0: i32, %arg1: i32, %arg2: memref<16x32xbf16, #tpu.memory_space<vmem>>, %arg3: memref<32x32xbf16, #tpu.memory_space<vmem>>, %arg4: memref<1x32xf32, #tpu.memory_space<vmem>>, %arg5: memref<16x32xf32, #tpu.memory_space<vmem>>, %arg6: memref<16x32xf32, #tpu.memory_space<vmem>>, %arg7: memref<16x32xbf16, #tpu.memory_space<vmem>>) attributes {dimension_semantics = [#tpu.dimension_semantics<parallel>, #tpu.dimension_semantics<arbitrary>], iteration_bounds = array<i64: 1, 1>, scalar_prefetch = 0 : i64, scratch_operands = 1 : i64, tpu.core_type = #tpu.core_type<tc>, window_params = [{transform_indices = @transform_0, window_bounds = array<i64: 16, 32>}, {transform_indices = @transform_1, window_bounds = array<i64: 32, 32>}, {transform_indices = @transform_2, window_bounds = array<i64: 1, 32>}, {transform_indices = @transform_3, window_bounds = array<i64: 16, 32>}, {transform_indices = @transform_4, window_bounds = array<i64: 16, 32>}]} {
    %c0_i32 = arith.constant 0 : i32
    %0 = arith.cmpi eq, %arg1, %c0_i32 : i32
    %1 = arith.extui %0 : i1 to i32
    %c0_i32_0 = arith.constant 0 : i32
    %2 = arith.cmpi ne, %1, %c0_i32_0 : i32
    scf.if %2 {
      %c0_10 = arith.constant 0 : index
      %c0_11 = arith.constant 0 : index
      %12 = vector.load %arg2[%c0_10, %c0_11] : memref<16x32xbf16, #tpu.memory_space<vmem>>, vector<16x32xbf16>
      %13 = arith.extf %12 : vector<16x32xbf16> to vector<16x32xf32>
      %14 = arith.truncf %13 : vector<16x32xf32> to vector<16x32xbf16>
      %c0_12 = arith.constant 0 : index
      %c0_13 = arith.constant 0 : index
      %15 = vector.load %arg7[%c0_12, %c0_13] : memref<16x32xbf16, #tpu.memory_space<vmem>>, vector<16x32xbf16>
      tpu.vector_store %arg7[%c0_12, %c0_13], %14 {strides = array<i32>} : memref<16x32xbf16, #tpu.memory_space<vmem>>, vector<16x32xbf16>,
    } else {
    }
    %c0 = arith.constant 0 : index
    %c0_1 = arith.constant 0 : index
    %3 = vector.load %arg7[%c0, %c0_1] : memref<16x32xbf16, #tpu.memory_space<vmem>>, vector<16x32xbf16>
    %c0_2 = arith.constant 0 : index
    %c0_3 = arith.constant 0 : index
    %4 = vector.load %arg3[%c0_2, %c0_3] : memref<32x32xbf16, #tpu.memory_space<vmem>>, vector<32x32xbf16>
    %cst = arith.constant dense<0.000000e+00> : vector<16x32xf32>
    %5 = tpu.matmul %3, %4, %cst {dimension_numbers = #tpu.dot_dimension_numbers<[1], [0], [0], [1], [0, 0, 1, 1], [], []>} : vector<16x32xbf16>, vector<32x32xbf16>, vector<16x32xf32> -> vector<16x32xf32>
    %c0_4 = arith.constant 0 : index
    %c0_5 = arith.constant 0 : index
    %6 = vector.load %arg4[%c0_4, %c0_5] : memref<1x32xf32, #tpu.memory_space<vmem>>, vector<1x32xf32>
    %7 = vector.broadcast %6 : vector<1x32xf32> to vector<16x32xf32>
    %8 = arith.addf %5, %7 : vector<16x32xf32>
    %c0_6 = arith.constant 0 : index
    %c0_7 = arith.constant 0 : index
    %9 = vector.load %arg5[%c0_6, %c0_7] : memref<16x32xf32, #tpu.memory_space<vmem>>, vector<16x32xf32>
    %10 = arith.addf %8, %9 : vector<16x32xf32>
    %c0_8 = arith.constant 0 : index
    %c0_9 = arith.constant 0 : index
    %11 = vector.load %arg6[%c0_8, %c0_9] : memref<16x32xf32, #tpu.memory_space<vmem>>, vector<16x32xf32>
    tpu.vector_store %arg6[%c0_8, %c0_9], %10 {strides = array<i32>} : memref<16x32xf32, #tpu.memory_space<vmem>>, vector<16x32xf32>,
    return
  }
  func.func @transform_0(%arg0: i32, %arg1: i32) -> (i32, i32) {
    %c0_i32 = arith.constant 0 : i32
    %c0_i32_0 = arith.constant 0 : i32
    return %arg0, %c0_i32 : i32, i32
  }
  func.func @transform_1(%arg0: i32, %arg1: i32) -> (i32, i32) {
    %c0_i32 = arith.constant 0 : i32
    %c0_i32_0 = arith.constant 0 : i32
    return %c0_i32, %arg1 : i32, i32
  }
  func.func @transform_2(%arg0: i32, %arg1: i32) -> (i32, i32) {
    %c0_i32 = arith.constant 0 : i32
    %c0_i32_0 = arith.constant 0 : i32
    return %c0_i32, %arg1 : i32, i32
  }
  func.func @transform_3(%arg0: i32, %arg1: i32) -> (i32, i32) {
    %c0_i32 = arith.constant 0 : i32
    return %arg0, %arg1 : i32, i32
  }
  func.func @transform_4(%arg0: i32, %arg1: i32) -> (i32, i32) {
    %c0_i32 = arith.constant 0 : i32
    return %arg0, %arg1 : i32, i32
  }
}

module attributes {stable_mosaic.version = 11 : i64} {
  func.func @_mha_kernel(%arg0: i32, %arg1: i32, %arg2: i32, %arg3: memref<1x8x32xbf16, #tpu.memory_space<vmem>>, %arg4: memref<1x8x32xbf16, #tpu.memory_space<vmem>>, %arg5: memref<1x8x32xbf16, #tpu.memory_space<vmem>>, %arg6: memref<1x8x8xf32, #tpu.memory_space<vmem>>, %arg7: memref<1x8x32xbf16, #tpu.memory_space<vmem>>, %arg8: memref<4x8x1xf32, #tpu.memory_space<vmem>>, %arg9: memref<4x8x1xf32, #tpu.memory_space<vmem>>, %arg10: memref<4x8x8xf32, #tpu.memory_space<vmem>>) attributes {dimension_semantics = [#tpu.dimension_semantics<parallel>, #tpu.dimension_semantics<parallel>, #tpu.dimension_semantics<arbitrary>], iteration_bounds = array<i64: 2, 1, 1>, scalar_prefetch = 0 : i64, scratch_operands = 3 : i64, tpu.core_type = #tpu.core_type<tc>, window_params = [{transform_indices = @transform_0, window_bounds = array<i64: 1, 8, 32>}, {transform_indices = @transform_1, window_bounds = array<i64: 1, 8, 32>}, {transform_indices = @transform_2, window_bounds = array<i64: 1, 8, 32>}, {transform_indices = @transform_3, window_bounds = array<i64: 1, 8, 8>}, {transform_indices = @transform_4, window_bounds = array<i64: 1, 8, 32>}]} {
    %c0_i32 = arith.constant 0 : i32
    %0 = arith.cmpi eq, %arg2, %c0_i32 : i32
    %1 = arith.extui %0 : i1 to i32
    %c0_i32_0 = arith.constant 0 : i32
    %2 = arith.cmpi ne, %1, %c0_i32_0 : i32
    scf.if %2 {
      %cst_106 = arith.constant 0xFF800000 : f32
      %174 = vector.broadcast %cst_106 : f32 to vector<4x8x1xf32>
      %c0_107 = arith.constant 0 : index
      %c0_108 = arith.constant 0 : index
      %c0_109 = arith.constant 0 : index
      %175 = vector.load %arg8[%c0_107, %c0_108, %c0_109] : memref<4x8x1xf32, #tpu.memory_space<vmem>>, vector<4x8x1xf32>
      tpu.vector_store %arg8[%c0_107, %c0_108, %c0_109], %174 {strides = array<i32>} : memref<4x8x1xf32, #tpu.memory_space<vmem>>, vector<4x8x1xf32>,
      %cst_110 = arith.constant 0.000000e+00 : f32
      %176 = vector.broadcast %cst_110 : f32 to vector<4x8x1xf32>
      %c0_111 = arith.constant 0 : index
      %c0_112 = arith.constant 0 : index
      %c0_113 = arith.constant 0 : index
      %177 = vector.load %arg9[%c0_111, %c0_112, %c0_113] : memref<4x8x1xf32, #tpu.memory_space<vmem>>, vector<4x8x1xf32>
      tpu.vector_store %arg9[%c0_111, %c0_112, %c0_113], %176 {strides = array<i32>} : memref<4x8x1xf32, #tpu.memory_space<vmem>>, vector<4x8x1xf32>,
      %cst_114 = arith.constant 0.000000e+00 : f32
      %178 = vector.broadcast %cst_114 : f32 to vector<4x8x8xf32>
      %c0_115 = arith.constant 0 : index
      %c0_116 = arith.constant 0 : index
      %c0_117 = arith.constant 0 : index
      %179 = vector.load %arg10[%c0_115, %c0_116, %c0_117] : memref<4x8x8xf32, #tpu.memory_space<vmem>>, vector<4x8x8xf32>
      tpu.vector_store %arg10[%c0_115, %c0_116, %c0_117], %178 {strides = array<i32>} : memref<4x8x8xf32, #tpu.memory_space<vmem>>, vector<4x8x8xf32>,
    } else {
    }
    %c0 = arith.constant 0 : index
    %c0_1 = arith.constant 0 : index
    %c0_2 = arith.constant 0 : index
    %3 = vector.load %arg3[%c0, %c0_1, %c0_2] : memref<1x8x32xbf16, #tpu.memory_space<vmem>>, vector<1x8x32xbf16>
    %4 = vector.shape_cast %3 : vector<1x8x32xbf16> to vector<8x32xbf16>
    %c0_3 = arith.constant 0 : index
    %c0_4 = arith.constant 0 : index
    %c0_5 = arith.constant 0 : index
    %5 = vector.load %arg4[%c0_3, %c0_4, %c0_5] : memref<1x8x32xbf16, #tpu.memory_space<vmem>>, vector<1x8x32xbf16>
    %6 = vector.shape_cast %5 : vector<1x8x32xbf16> to vector<8x32xbf16>
    %c0_6 = arith.constant 0 : index
    %c0_7 = arith.constant 0 : index
    %c0_8 = arith.constant 0 : index
    %7 = vector.load %arg5[%c0_6, %c0_7, %c0_8] : memref<1x8x32xbf16, #tpu.memory_space<vmem>>, vector<1x8x32xbf16>
    %8 = vector.shape_cast %7 : vector<1x8x32xbf16> to vector<8x32xbf16>
    %c0_9 = arith.constant 0 : index
    %c0_10 = arith.constant 0 : index
    %c0_11 = arith.constant 0 : index
    %9 = vector.load %arg6[%c0_9, %c0_10, %c0_11] : memref<1x8x8xf32, #tpu.memory_space<vmem>>, vector<1x8x8xf32>
    %10 = vector.shape_cast %9 : vector<1x8x8xf32> to vector<8x8xf32>
    %11 = vector.extract_strided_slice %4 {offsets = [0, 0], sizes = [8, 8], strides = [1, 1]} : vector<8x32xbf16> to vector<8x8xbf16>
    %12 = vector.extract_strided_slice %6 {offsets = [0, 0], sizes = [8, 8], strides = [1, 1]} : vector<8x32xbf16> to vector<8x8xbf16>
    %cst = arith.constant dense<0.000000e+00> : vector<8x8xf32>
    %13 = tpu.matmul %11, %12, %cst {dimension_numbers = #tpu.dot_dimension_numbers<[1], [1], [0], [0], [0, 0, 1, 0], [], []>} : vector<8x8xbf16>, vector<8x8xbf16>, vector<8x8xf32> -> vector<8x8xf32>
    %cst_12 = arith.constant 0.000000e+00 : f32
    %14 = vector.broadcast %cst_12 : f32 to vector<8x8xf32>
    %15 = arith.cmpf oeq, %10, %14 : vector<8x8xf32>
    %cst_13 = arith.constant -1.000000e+09 : f32
    %16 = vector.broadcast %cst_13 : f32 to vector<8x8xf32>
    %17 = arith.select %15, %16, %13 : vector<8x8xi1>, vector<8x8xf32>
    %c0_14 = arith.constant 0 : index
    %c0_15 = arith.constant 0 : index
    %c0_16 = arith.constant 0 : index
    %18 = vector.load %arg8[%c0_14, %c0_15, %c0_16] : memref<4x8x1xf32, #tpu.memory_space<vmem>>, vector<1x8x1xf32>
    %19 = vector.shape_cast %18 : vector<1x8x1xf32> to vector<8x1xf32>
    %cst_17 = arith.constant dense<0xFF800000> : vector<8xf32>
    %20 = vector.multi_reduction <maximumf>, %17, %cst_17 [1] : vector<8x8xf32> to vector<8xf32>
    %21 = vector.shape_cast %20 : vector<8xf32> to vector<8x1xf32>
    %22 = arith.maximumf %19, %21 : vector<8x1xf32>
    %23 = arith.subf %19, %22 : vector<8x1xf32>
    %24 = math.exp %23 : vector<8x1xf32>
    %25 = vector.broadcast %22 : vector<8x1xf32> to vector<8x8xf32>
    %26 = arith.subf %17, %25 : vector<8x8xf32>
    %27 = math.exp %26 : vector<8x8xf32>
    %c0_18 = arith.constant 0 : index
    %c0_19 = arith.constant 0 : index
    %c0_20 = arith.constant 0 : index
    %28 = vector.load %arg9[%c0_18, %c0_19, %c0_20] : memref<4x8x1xf32, #tpu.memory_space<vmem>>, vector<1x8x1xf32>
    %29 = vector.shape_cast %28 : vector<1x8x1xf32> to vector<8x1xf32>
    %30 = arith.mulf %24, %29 : vector<8x1xf32>
    %cst_21 = arith.constant dense<0.000000e+00> : vector<8xf32>
    %31 = vector.multi_reduction <add>, %27, %cst_21 [1] : vector<8x8xf32> to vector<8xf32>
    %32 = vector.shape_cast %31 : vector<8xf32> to vector<8x1xf32>
    %33 = arith.addf %30, %32 : vector<8x1xf32>
    %c0_22 = arith.constant 0 : index
    %c0_23 = arith.constant 0 : index
    %c0_24 = arith.constant 0 : index
    %34 = vector.load %arg9[%c0_22, %c0_23, %c0_24] : memref<4x8x1xf32, #tpu.memory_space<vmem>>, vector<1x8x1xf32>
    %35 = vector.shape_cast %34 : vector<1x8x1xf32> to vector<8x1xf32>
    %36 = vector.shape_cast %33 : vector<8x1xf32> to vector<1x8x1xf32>
    tpu.vector_store %arg9[%c0_22, %c0_23, %c0_24], %36 {strides = array<i32>} : memref<4x8x1xf32, #tpu.memory_space<vmem>>, vector<1x8x1xf32>,
    %37 = arith.truncf %27 : vector<8x8xf32> to vector<8x8xbf16>
    %38 = vector.extract_strided_slice %8 {offsets = [0, 0], sizes = [8, 8], strides = [1, 1]} : vector<8x32xbf16> to vector<8x8xbf16>
    %cst_25 = arith.constant dense<0.000000e+00> : vector<8x8xf32>
    %39 = tpu.matmul %37, %38, %cst_25 {dimension_numbers = #tpu.dot_dimension_numbers<[1], [0], [0], [1], [0, 0, 1, 1], [], []>} : vector<8x8xbf16>, vector<8x8xbf16>, vector<8x8xf32> -> vector<8x8xf32>
    %c0_26 = arith.constant 0 : index
    %c0_27 = arith.constant 0 : index
    %c0_28 = arith.constant 0 : index
    %40 = vector.load %arg10[%c0_26, %c0_27, %c0_28] : memref<4x8x8xf32, #tpu.memory_space<vmem>>, vector<1x8x8xf32>
    %41 = vector.shape_cast %40 : vector<1x8x8xf32> to vector<8x8xf32>
    %42 = vector.broadcast %24 : vector<8x1xf32> to vector<8x8xf32>
    %43 = arith.mulf %42, %41 : vector<8x8xf32>
    %44 = arith.addf %43, %39 : vector<8x8xf32>
    %c0_29 = arith.constant 0 : index
    %c0_30 = arith.constant 0 : index
    %c0_31 = arith.constant 0 : index
    %45 = vector.load %arg10[%c0_29, %c0_30, %c0_31] : memref<4x8x8xf32, #tpu.memory_space<vmem>>, vector<1x8x8xf32>
    %46 = vector.shape_cast %45 : vector<1x8x8xf32> to vector<8x8xf32>
    %47 = vector.shape_cast %44 : vector<8x8xf32> to vector<1x8x8xf32>
    tpu.vector_store %arg10[%c0_29, %c0_30, %c0_31], %47 {strides = array<i32>} : memref<4x8x8xf32, #tpu.memory_space<vmem>>, vector<1x8x8xf32>,
    %c0_32 = arith.constant 0 : index
    %c0_33 = arith.constant 0 : index
    %c0_34 = arith.constant 0 : index
    %48 = vector.load %arg8[%c0_32, %c0_33, %c0_34] : memref<4x8x1xf32, #tpu.memory_space<vmem>>, vector<1x8x1xf32>
    %49 = vector.shape_cast %48 : vector<1x8x1xf32> to vector<8x1xf32>
    %50 = vector.shape_cast %22 : vector<8x1xf32> to vector<1x8x1xf32>
    tpu.vector_store %arg8[%c0_32, %c0_33, %c0_34], %50 {strides = array<i32>} : memref<4x8x1xf32, #tpu.memory_space<vmem>>, vector<1x8x1xf32>,
    %51 = vector.extract_strided_slice %4 {offsets = [0, 8], sizes = [8, 8], strides = [1, 1]} : vector<8x32xbf16> to vector<8x8xbf16>
    %52 = vector.extract_strided_slice %6 {offsets = [0, 8], sizes = [8, 8], strides = [1, 1]} : vector<8x32xbf16> to vector<8x8xbf16>
    %cst_35 = arith.constant dense<0.000000e+00> : vector<8x8xf32>
    %53 = tpu.matmul %51, %52, %cst_35 {dimension_numbers = #tpu.dot_dimension_numbers<[1], [1], [0], [0], [0, 0, 1, 0], [], []>} : vector<8x8xbf16>, vector<8x8xbf16>, vector<8x8xf32> -> vector<8x8xf32>
    %cst_36 = arith.constant 0.000000e+00 : f32
    %54 = vector.broadcast %cst_36 : f32 to vector<8x8xf32>
    %55 = arith.cmpf oeq, %10, %54 : vector<8x8xf32>
    %cst_37 = arith.constant -1.000000e+09 : f32
    %56 = vector.broadcast %cst_37 : f32 to vector<8x8xf32>
    %57 = arith.select %55, %56, %53 : vector<8x8xi1>, vector<8x8xf32>
    %c1 = arith.constant 1 : index
    %c0_38 = arith.constant 0 : index
    %c0_39 = arith.constant 0 : index
    %58 = vector.load %arg8[%c1, %c0_38, %c0_39] : memref<4x8x1xf32, #tpu.memory_space<vmem>>, vector<1x8x1xf32>
    %59 = vector.shape_cast %58 : vector<1x8x1xf32> to vector<8x1xf32>
    %cst_40 = arith.constant dense<0xFF800000> : vector<8xf32>
    %60 = vector.multi_reduction <maximumf>, %57, %cst_40 [1] : vector<8x8xf32> to vector<8xf32>
    %61 = vector.shape_cast %60 : vector<8xf32> to vector<8x1xf32>
    %62 = arith.maximumf %59, %61 : vector<8x1xf32>
    %63 = arith.subf %59, %62 : vector<8x1xf32>
    %64 = math.exp %63 : vector<8x1xf32>
    %65 = vector.broadcast %62 : vector<8x1xf32> to vector<8x8xf32>
    %66 = arith.subf %57, %65 : vector<8x8xf32>
    %67 = math.exp %66 : vector<8x8xf32>
    %c1_41 = arith.constant 1 : index
    %c0_42 = arith.constant 0 : index
    %c0_43 = arith.constant 0 : index
    %68 = vector.load %arg9[%c1_41, %c0_42, %c0_43] : memref<4x8x1xf32, #tpu.memory_space<vmem>>, vector<1x8x1xf32>
    %69 = vector.shape_cast %68 : vector<1x8x1xf32> to vector<8x1xf32>
    %70 = arith.mulf %64, %69 : vector<8x1xf32>
    %cst_44 = arith.constant dense<0.000000e+00> : vector<8xf32>
    %71 = vector.multi_reduction <add>, %67, %cst_44 [1] : vector<8x8xf32> to vector<8xf32>
    %72 = vector.shape_cast %71 : vector<8xf32> to vector<8x1xf32>
    %73 = arith.addf %70, %72 : vector<8x1xf32>
    %c1_45 = arith.constant 1 : index
    %c0_46 = arith.constant 0 : index
    %c0_47 = arith.constant 0 : index
    %74 = vector.load %arg9[%c1_45, %c0_46, %c0_47] : memref<4x8x1xf32, #tpu.memory_space<vmem>>, vector<1x8x1xf32>
    %75 = vector.shape_cast %74 : vector<1x8x1xf32> to vector<8x1xf32>
    %76 = vector.shape_cast %73 : vector<8x1xf32> to vector<1x8x1xf32>
    tpu.vector_store %arg9[%c1_45, %c0_46, %c0_47], %76 {strides = array<i32>} : memref<4x8x1xf32, #tpu.memory_space<vmem>>, vector<1x8x1xf32>,
    %77 = arith.truncf %67 : vector<8x8xf32> to vector<8x8xbf16>
    %78 = vector.extract_strided_slice %8 {offsets = [0, 8], sizes = [8, 8], strides = [1, 1]} : vector<8x32xbf16> to vector<8x8xbf16>
    %cst_48 = arith.constant dense<0.000000e+00> : vector<8x8xf32>
    %79 = tpu.matmul %77, %78, %cst_48 {dimension_numbers = #tpu.dot_dimension_numbers<[1], [0], [0], [1], [0, 0, 1, 1], [], []>} : vector<8x8xbf16>, vector<8x8xbf16>, vector<8x8xf32> -> vector<8x8xf32>
    %c1_49 = arith.constant 1 : index
    %c0_50 = arith.constant 0 : index
    %c0_51 = arith.constant 0 : index
    %80 = vector.load %arg10[%c1_49, %c0_50, %c0_51] : memref<4x8x8xf32, #tpu.memory_space<vmem>>, vector<1x8x8xf32>
    %81 = vector.shape_cast %80 : vector<1x8x8xf32> to vector<8x8xf32>
    %82 = vector.broadcast %64 : vector<8x1xf32> to vector<8x8xf32>
    %83 = arith.mulf %82, %81 : vector<8x8xf32>
    %84 = arith.addf %83, %79 : vector<8x8xf32>
    %c1_52 = arith.constant 1 : index
    %c0_53 = arith.constant 0 : index
    %c0_54 = arith.constant 0 : index
    %85 = vector.load %arg10[%c1_52, %c0_53, %c0_54] : memref<4x8x8xf32, #tpu.memory_space<vmem>>, vector<1x8x8xf32>
    %86 = vector.shape_cast %85 : vector<1x8x8xf32> to vector<8x8xf32>
    %87 = vector.shape_cast %84 : vector<8x8xf32> to vector<1x8x8xf32>
    tpu.vector_store %arg10[%c1_52, %c0_53, %c0_54], %87 {strides = array<i32>} : memref<4x8x8xf32, #tpu.memory_space<vmem>>, vector<1x8x8xf32>,
    %c1_55 = arith.constant 1 : index
    %c0_56 = arith.constant 0 : index
    %c0_57 = arith.constant 0 : index
    %88 = vector.load %arg8[%c1_55, %c0_56, %c0_57] : memref<4x8x1xf32, #tpu.memory_space<vmem>>, vector<1x8x1xf32>
    %89 = vector.shape_cast %88 : vector<1x8x1xf32> to vector<8x1xf32>
    %90 = vector.shape_cast %62 : vector<8x1xf32> to vector<1x8x1xf32>
    tpu.vector_store %arg8[%c1_55, %c0_56, %c0_57], %90 {strides = array<i32>} : memref<4x8x1xf32, #tpu.memory_space<vmem>>, vector<1x8x1xf32>,
    %91 = vector.extract_strided_slice %4 {offsets = [0, 16], sizes = [8, 8], strides = [1, 1]} : vector<8x32xbf16> to vector<8x8xbf16>
    %92 = vector.extract_strided_slice %6 {offsets = [0, 16], sizes = [8, 8], strides = [1, 1]} : vector<8x32xbf16> to vector<8x8xbf16>
    %cst_58 = arith.constant dense<0.000000e+00> : vector<8x8xf32>
    %93 = tpu.matmul %91, %92, %cst_58 {dimension_numbers = #tpu.dot_dimension_numbers<[1], [1], [0], [0], [0, 0, 1, 0], [], []>} : vector<8x8xbf16>, vector<8x8xbf16>, vector<8x8xf32> -> vector<8x8xf32>
    %cst_59 = arith.constant 0.000000e+00 : f32
    %94 = vector.broadcast %cst_59 : f32 to vector<8x8xf32>
    %95 = arith.cmpf oeq, %10, %94 : vector<8x8xf32>
    %cst_60 = arith.constant -1.000000e+09 : f32
    %96 = vector.broadcast %cst_60 : f32 to vector<8x8xf32>
    %97 = arith.select %95, %96, %93 : vector<8x8xi1>, vector<8x8xf32>
    %c2 = arith.constant 2 : index
    %c0_61 = arith.constant 0 : index
    %c0_62 = arith.constant 0 : index
    %98 = vector.load %arg8[%c2, %c0_61, %c0_62] : memref<4x8x1xf32, #tpu.memory_space<vmem>>, vector<1x8x1xf32>
    %99 = vector.shape_cast %98 : vector<1x8x1xf32> to vector<8x1xf32>
    %cst_63 = arith.constant dense<0xFF800000> : vector<8xf32>
    %100 = vector.multi_reduction <maximumf>, %97, %cst_63 [1] : vector<8x8xf32> to vector<8xf32>
    %101 = vector.shape_cast %100 : vector<8xf32> to vector<8x1xf32>
    %102 = arith.maximumf %99, %101 : vector<8x1xf32>
    %103 = arith.subf %99, %102 : vector<8x1xf32>
    %104 = math.exp %103 : vector<8x1xf32>
    %105 = vector.broadcast %102 : vector<8x1xf32> to vector<8x8xf32>
    %106 = arith.subf %97, %105 : vector<8x8xf32>
    %107 = math.exp %106 : vector<8x8xf32>
    %c2_64 = arith.constant 2 : index
    %c0_65 = arith.constant 0 : index
    %c0_66 = arith.constant 0 : index
    %108 = vector.load %arg9[%c2_64, %c0_65, %c0_66] : memref<4x8x1xf32, #tpu.memory_space<vmem>>, vector<1x8x1xf32>
    %109 = vector.shape_cast %108 : vector<1x8x1xf32> to vector<8x1xf32>
    %110 = arith.mulf %104, %109 : vector<8x1xf32>
    %cst_67 = arith.constant dense<0.000000e+00> : vector<8xf32>
    %111 = vector.multi_reduction <add>, %107, %cst_67 [1] : vector<8x8xf32> to vector<8xf32>
    %112 = vector.shape_cast %111 : vector<8xf32> to vector<8x1xf32>
    %113 = arith.addf %110, %112 : vector<8x1xf32>
    %c2_68 = arith.constant 2 : index
    %c0_69 = arith.constant 0 : index
    %c0_70 = arith.constant 0 : index
    %114 = vector.load %arg9[%c2_68, %c0_69, %c0_70] : memref<4x8x1xf32, #tpu.memory_space<vmem>>, vector<1x8x1xf32>
    %115 = vector.shape_cast %114 : vector<1x8x1xf32> to vector<8x1xf32>
    %116 = vector.shape_cast %113 : vector<8x1xf32> to vector<1x8x1xf32>
    tpu.vector_store %arg9[%c2_68, %c0_69, %c0_70], %116 {strides = array<i32>} : memref<4x8x1xf32, #tpu.memory_space<vmem>>, vector<1x8x1xf32>,
    %117 = arith.truncf %107 : vector<8x8xf32> to vector<8x8xbf16>
    %118 = vector.extract_strided_slice %8 {offsets = [0, 16], sizes = [8, 8], strides = [1, 1]} : vector<8x32xbf16> to vector<8x8xbf16>
    %cst_71 = arith.constant dense<0.000000e+00> : vector<8x8xf32>
    %119 = tpu.matmul %117, %118, %cst_71 {dimension_numbers = #tpu.dot_dimension_numbers<[1], [0], [0], [1], [0, 0, 1, 1], [], []>} : vector<8x8xbf16>, vector<8x8xbf16>, vector<8x8xf32> -> vector<8x8xf32>
    %c2_72 = arith.constant 2 : index
    %c0_73 = arith.constant 0 : index
    %c0_74 = arith.constant 0 : index
    %120 = vector.load %arg10[%c2_72, %c0_73, %c0_74] : memref<4x8x8xf32, #tpu.memory_space<vmem>>, vector<1x8x8xf32>
    %121 = vector.shape_cast %120 : vector<1x8x8xf32> to vector<8x8xf32>
    %122 = vector.broadcast %104 : vector<8x1xf32> to vector<8x8xf32>
    %123 = arith.mulf %122, %121 : vector<8x8xf32>
    %124 = arith.addf %123, %119 : vector<8x8xf32>
    %c2_75 = arith.constant 2 : index
    %c0_76 = arith.constant 0 : index
    %c0_77 = arith.constant 0 : index
    %125 = vector.load %arg10[%c2_75, %c0_76, %c0_77] : memref<4x8x8xf32, #tpu.memory_space<vmem>>, vector<1x8x8xf32>
    %126 = vector.shape_cast %125 : vector<1x8x8xf32> to vector<8x8xf32>
    %127 = vector.shape_cast %124 : vector<8x8xf32> to vector<1x8x8xf32>
    tpu.vector_store %arg10[%c2_75, %c0_76, %c0_77], %127 {strides = array<i32>} : memref<4x8x8xf32, #tpu.memory_space<vmem>>, vector<1x8x8xf32>,
    %c2_78 = arith.constant 2 : index
    %c0_79 = arith.constant 0 : index
    %c0_80 = arith.constant 0 : index
    %128 = vector.load %arg8[%c2_78, %c0_79, %c0_80] : memref<4x8x1xf32, #tpu.memory_space<vmem>>, vector<1x8x1xf32>
    %129 = vector.shape_cast %128 : vector<1x8x1xf32> to vector<8x1xf32>
    %130 = vector.shape_cast %102 : vector<8x1xf32> to vector<1x8x1xf32>
    tpu.vector_store %arg8[%c2_78, %c0_79, %c0_80], %130 {strides = array<i32>} : memref<4x8x1xf32, #tpu.memory_space<vmem>>, vector<1x8x1xf32>,
    %131 = vector.extract_strided_slice %4 {offsets = [0, 24], sizes = [8, 8], strides = [1, 1]} : vector<8x32xbf16> to vector<8x8xbf16>
    %132 = vector.extract_strided_slice %6 {offsets = [0, 24], sizes = [8, 8], strides = [1, 1]} : vector<8x32xbf16> to vector<8x8xbf16>
    %cst_81 = arith.constant dense<0.000000e+00> : vector<8x8xf32>
    %133 = tpu.matmul %131, %132, %cst_81 {dimension_numbers = #tpu.dot_dimension_numbers<[1], [1], [0], [0], [0, 0, 1, 0], [], []>} : vector<8x8xbf16>, vector<8x8xbf16>, vector<8x8xf32> -> vector<8x8xf32>
    %cst_82 = arith.constant 0.000000e+00 : f32
    %134 = vector.broadcast %cst_82 : f32 to vector<8x8xf32>
    %135 = arith.cmpf oeq, %10, %134 : vector<8x8xf32>
    %cst_83 = arith.constant -1.000000e+09 : f32
    %136 = vector.broadcast %cst_83 : f32 to vector<8x8xf32>
    %137 = arith.select %135, %136, %133 : vector<8x8xi1>, vector<8x8xf32>
    %c3 = arith.constant 3 : index
    %c0_84 = arith.constant 0 : index
    %c0_85 = arith.constant 0 : index
    %138 = vector.load %arg8[%c3, %c0_84, %c0_85] : memref<4x8x1xf32, #tpu.memory_space<vmem>>, vector<1x8x1xf32>
    %139 = vector.shape_cast %138 : vector<1x8x1xf32> to vector<8x1xf32>
    %cst_86 = arith.constant dense<0xFF800000> : vector<8xf32>
    %140 = vector.multi_reduction <maximumf>, %137, %cst_86 [1] : vector<8x8xf32> to vector<8xf32>
    %141 = vector.shape_cast %140 : vector<8xf32> to vector<8x1xf32>
    %142 = arith.maximumf %139, %141 : vector<8x1xf32>
    %143 = arith.subf %139, %142 : vector<8x1xf32>
    %144 = math.exp %143 : vector<8x1xf32>
    %145 = vector.broadcast %142 : vector<8x1xf32> to vector<8x8xf32>
    %146 = arith.subf %137, %145 : vector<8x8xf32>
    %147 = math.exp %146 : vector<8x8xf32>
    %c3_87 = arith.constant 3 : index
    %c0_88 = arith.constant 0 : index
    %c0_89 = arith.constant 0 : index
    %148 = vector.load %arg9[%c3_87, %c0_88, %c0_89] : memref<4x8x1xf32, #tpu.memory_space<vmem>>, vector<1x8x1xf32>
    %149 = vector.shape_cast %148 : vector<1x8x1xf32> to vector<8x1xf32>
    %150 = arith.mulf %144, %149 : vector<8x1xf32>
    %cst_90 = arith.constant dense<0.000000e+00> : vector<8xf32>
    %151 = vector.multi_reduction <add>, %147, %cst_90 [1] : vector<8x8xf32> to vector<8xf32>
    %152 = vector.shape_cast %151 : vector<8xf32> to vector<8x1xf32>
    %153 = arith.addf %150, %152 : vector<8x1xf32>
    %c3_91 = arith.constant 3 : index
    %c0_92 = arith.constant 0 : index
    %c0_93 = arith.constant 0 : index
    %154 = vector.load %arg9[%c3_91, %c0_92, %c0_93] : memref<4x8x1xf32, #tpu.memory_space<vmem>>, vector<1x8x1xf32>
    %155 = vector.shape_cast %154 : vector<1x8x1xf32> to vector<8x1xf32>
    %156 = vector.shape_cast %153 : vector<8x1xf32> to vector<1x8x1xf32>
    tpu.vector_store %arg9[%c3_91, %c0_92, %c0_93], %156 {strides = array<i32>} : memref<4x8x1xf32, #tpu.memory_space<vmem>>, vector<1x8x1xf32>,
    %157 = arith.truncf %147 : vector<8x8xf32> to vector<8x8xbf16>
    %158 = vector.extract_strided_slice %8 {offsets = [0, 24], sizes = [8, 8], strides = [1, 1]} : vector<8x32xbf16> to vector<8x8xbf16>
    %cst_94 = arith.constant dense<0.000000e+00> : vector<8x8xf32>
    %159 = tpu.matmul %157, %158, %cst_94 {dimension_numbers = #tpu.dot_dimension_numbers<[1], [0], [0], [1], [0, 0, 1, 1], [], []>} : vector<8x8xbf16>, vector<8x8xbf16>, vector<8x8xf32> -> vector<8x8xf32>
    %c3_95 = arith.constant 3 : index
    %c0_96 = arith.constant 0 : index
    %c0_97 = arith.constant 0 : index
    %160 = vector.load %arg10[%c3_95, %c0_96, %c0_97] : memref<4x8x8xf32, #tpu.memory_space<vmem>>, vector<1x8x8xf32>
    %161 = vector.shape_cast %160 : vector<1x8x8xf32> to vector<8x8xf32>
    %162 = vector.broadcast %144 : vector<8x1xf32> to vector<8x8xf32>
    %163 = arith.mulf %162, %161 : vector<8x8xf32>
    %164 = arith.addf %163, %159 : vector<8x8xf32>
    %c3_98 = arith.constant 3 : index
    %c0_99 = arith.constant 0 : index
    %c0_100 = arith.constant 0 : index
    %165 = vector.load %arg10[%c3_98, %c0_99, %c0_100] : memref<4x8x8xf32, #tpu.memory_space<vmem>>, vector<1x8x8xf32>
    %166 = vector.shape_cast %165 : vector<1x8x8xf32> to vector<8x8xf32>
    %167 = vector.shape_cast %164 : vector<8x8xf32> to vector<1x8x8xf32>
    tpu.vector_store %arg10[%c3_98, %c0_99, %c0_100], %167 {strides = array<i32>} : memref<4x8x8xf32, #tpu.memory_space<vmem>>, vector<1x8x8xf32>,
    %c3_101 = arith.constant 3 : index
    %c0_102 = arith.constant 0 : index
    %c0_103 = arith.constant 0 : index
    %168 = vector.load %arg8[%c3_101, %c0_102, %c0_103] : memref<4x8x1xf32, #tpu.memory_space<vmem>>, vector<1x8x1xf32>
    %169 = vector.shape_cast %168 : vector<1x8x1xf32> to vector<8x1xf32>
    %170 = vector.shape_cast %142 : vector<8x1xf32> to vector<1x8x1xf32>
    tpu.vector_store %arg8[%c3_101, %c0_102, %c0_103], %170 {strides = array<i32>} : memref<4x8x1xf32, #tpu.memory_space<vmem>>, vector<1x8x1xf32>,
    %c0_i32_104 = arith.constant 0 : i32
    %171 = arith.cmpi eq, %arg2, %c0_i32_104 : i32
    %172 = arith.extui %171 : i1 to i32
    %c0_i32_105 = arith.constant 0 : i32
    %173 = arith.cmpi ne, %172, %c0_i32_105 : i32
    scf.if %173 {
      %c0_106 = arith.constant 0 : index
      %c0_107 = arith.constant 0 : index
      %c0_108 = arith.constant 0 : index
      %174 = vector.load %arg9[%c0_106, %c0_107, %c0_108] : memref<4x8x1xf32, #tpu.memory_space<vmem>>, vector<1x8x1xf32>
      %175 = vector.shape_cast %174 : vector<1x8x1xf32> to vector<8x1xf32>
      %176 = tpu.reciprocal %175 {approx = true} : vector<8x1xf32> -> vector<8x1xf32>
      %c0_109 = arith.constant 0 : index
      %c0_110 = arith.constant 0 : index
      %c0_111 = arith.constant 0 : index
      %177 = vector.load %arg10[%c0_109, %c0_110, %c0_111] : memref<4x8x8xf32, #tpu.memory_space<vmem>>, vector<1x8x8xf32>
      %178 = vector.shape_cast %177 : vector<1x8x8xf32> to vector<8x8xf32>
      %179 = vector.broadcast %176 : vector<8x1xf32> to vector<8x8xf32>
      %180 = arith.mulf %178, %179 : vector<8x8xf32>
      %c1_112 = arith.constant 1 : index
      %c0_113 = arith.constant 0 : index
      %c0_114 = arith.constant 0 : index
      %181 = vector.load %arg9[%c1_112, %c0_113, %c0_114] : memref<4x8x1xf32, #tpu.memory_space<vmem>>, vector<1x8x1xf32>
      %182 = vector.shape_cast %181 : vector<1x8x1xf32> to vector<8x1xf32>
      %183 = tpu.reciprocal %182 {approx = true} : vector<8x1xf32> -> vector<8x1xf32>
      %c1_115 = arith.constant 1 : index
      %c0_116 = arith.constant 0 : index
      %c0_117 = arith.constant 0 : index
      %184 = vector.load %arg10[%c1_115, %c0_116, %c0_117] : memref<4x8x8xf32, #tpu.memory_space<vmem>>, vector<1x8x8xf32>
      %185 = vector.shape_cast %184 : vector<1x8x8xf32> to vector<8x8xf32>
      %186 = vector.broadcast %183 : vector<8x1xf32> to vector<8x8xf32>
      %187 = arith.mulf %185, %186 : vector<8x8xf32>
      %c2_118 = arith.constant 2 : index
      %c0_119 = arith.constant 0 : index
      %c0_120 = arith.constant 0 : index
      %188 = vector.load %arg9[%c2_118, %c0_119, %c0_120] : memref<4x8x1xf32, #tpu.memory_space<vmem>>, vector<1x8x1xf32>
      %189 = vector.shape_cast %188 : vector<1x8x1xf32> to vector<8x1xf32>
      %190 = tpu.reciprocal %189 {approx = true} : vector<8x1xf32> -> vector<8x1xf32>
      %c2_121 = arith.constant 2 : index
      %c0_122 = arith.constant 0 : index
      %c0_123 = arith.constant 0 : index
      %191 = vector.load %arg10[%c2_121, %c0_122, %c0_123] : memref<4x8x8xf32, #tpu.memory_space<vmem>>, vector<1x8x8xf32>
      %192 = vector.shape_cast %191 : vector<1x8x8xf32> to vector<8x8xf32>
      %193 = vector.broadcast %190 : vector<8x1xf32> to vector<8x8xf32>
      %194 = arith.mulf %192, %193 : vector<8x8xf32>
      %c3_124 = arith.constant 3 : index
      %c0_125 = arith.constant 0 : index
      %c0_126 = arith.constant 0 : index
      %195 = vector.load %arg9[%c3_124, %c0_125, %c0_126] : memref<4x8x1xf32, #tpu.memory_space<vmem>>, vector<1x8x1xf32>
      %196 = vector.shape_cast %195 : vector<1x8x1xf32> to vector<8x1xf32>
      %197 = tpu.reciprocal %196 {approx = true} : vector<8x1xf32> -> vector<8x1xf32>
      %c3_127 = arith.constant 3 : index
      %c0_128 = arith.constant 0 : index
      %c0_129 = arith.constant 0 : index
      %198 = vector.load %arg10[%c3_127, %c0_128, %c0_129] : memref<4x8x8xf32, #tpu.memory_space<vmem>>, vector<1x8x8xf32>
      %199 = vector.shape_cast %198 : vector<1x8x8xf32> to vector<8x8xf32>
      %200 = vector.broadcast %197 : vector<8x1xf32> to vector<8x8xf32>
      %201 = arith.mulf %199, %200 : vector<8x8xf32>
      %202 = tpu.concatenate %180, %187, %194, %201 in 1 : vector<8x8xf32>, vector<8x8xf32>, vector<8x8xf32>, vector<8x8xf32> -> vector<8x32xf32>
      %203 = arith.truncf %202 : vector<8x32xf32> to vector<8x32xbf16>
      %c0_130 = arith.constant 0 : index
      %c0_131 = arith.constant 0 : index
      %c0_132 = arith.constant 0 : index
      %204 = vector.load %arg7[%c0_130, %c0_131, %c0_132] : memref<1x8x32xbf16, #tpu.memory_space<vmem>>, vector<1x8x32xbf16>
      %205 = vector.shape_cast %204 : vector<1x8x32xbf16> to vector<8x32xbf16>
      %206 = vector.shape_cast %203 : vector<8x32xbf16> to vector<1x8x32xbf16>
      tpu.vector_store %arg7[%c0_130, %c0_131, %c0_132], %206 {strides = array<i32>} : memref<1x8x32xbf16, #tpu.memory_space<vmem>>, vector<1x8x32xbf16>,
    } else {
    }
    return
  }
  func.func @transform_0(%arg0: i32, %arg1: i32, %arg2: i32) -> (i32, i32, i32) {
    %c0_i32 = arith.constant 0 : i32
    %c0_i32_0 = arith.constant 0 : i32
    return %arg0, %arg1, %c0_i32 : i32, i32, i32
  }
  func.func @transform_1(%arg0: i32, %arg1: i32, %arg2: i32) -> (i32, i32, i32) {
    %c0_i32 = arith.constant 0 : i32
    %c0_i32_0 = arith.constant 0 : i32
    return %arg0, %arg2, %c0_i32 : i32, i32, i32
  }
  func.func @transform_2(%arg0: i32, %arg1: i32, %arg2: i32) -> (i32, i32, i32) {
    %c0_i32 = arith.constant 0 : i32
    %c0_i32_0 = arith.constant 0 : i32
    return %arg0, %arg2, %c0_i32 : i32, i32, i32
  }
  func.func @transform_3(%arg0: i32, %arg1: i32, %arg2: i32) -> (i32, i32, i32) {
    %c0_i32 = arith.constant 0 : i32
    return %arg0, %arg1, %arg2 : i32, i32, i32
  }
  func.func @transform_4(%arg0: i32, %arg1: i32, %arg2: i32) -> (i32, i32, i32) {
    %c0_i32 = arith.constant 0 : i32
    %c0_i32_0 = arith.constant 0 : i32
    return %arg0, %arg1, %c0_i32 : i32, i32, i32
  }
}

module attributes {stable_mosaic.version = 11 : i64} {
  func.func @kernel(%arg0: i32, %arg1: i32, %arg2: memref<16x32xf32, #tpu.memory_space<vmem>>, %arg3: memref<1x32xf32, #tpu.memory_space<vmem>>, %arg4: memref<1x32xf32, #tpu.memory_space<vmem>>, %arg5: memref<32x32xbf16, #tpu.memory_space<vmem>>, %arg6: memref<1x32xf32, #tpu.memory_space<vmem>>, %arg7: memref<16x32xbf16, #tpu.memory_space<vmem>>, %arg8: memref<16x32xbf16, #tpu.memory_space<vmem>>) attributes {dimension_semantics = [#tpu.dimension_semantics<parallel>, #tpu.dimension_semantics<arbitrary>], iteration_bounds = array<i64: 1, 1>, scalar_prefetch = 0 : i64, scratch_operands = 1 : i64, tpu.core_type = #tpu.core_type<tc>, window_params = [{transform_indices = @transform_0, window_bounds = array<i64: 16, 32>}, {pipeline_mode = #tpu.pipeline_mode<synchronous>, transform_indices = @transform_1, window_bounds = array<i64: 1, 32>}, {pipeline_mode = #tpu.pipeline_mode<synchronous>, transform_indices = @transform_2, window_bounds = array<i64: 1, 32>}, {transform_indices = @transform_3, window_bounds = array<i64: 32, 32>}, {transform_indices = @transform_4, window_bounds = array<i64: 1, 32>}, {transform_indices = @transform_5, window_bounds = array<i64: 16, 32>}]} {
    %c0_i32 = arith.constant 0 : i32
    %0 = arith.cmpi eq, %arg1, %c0_i32 : i32
    %1 = arith.extui %0 : i1 to i32
    %c0_i32_0 = arith.constant 0 : i32
    %2 = arith.cmpi ne, %1, %c0_i32_0 : i32
    scf.if %2 {
      %c0_8 = arith.constant 0 : index
      %c0_9 = arith.constant 0 : index
      %11 = vector.load %arg2[%c0_8, %c0_9] : memref<16x32xf32, #tpu.memory_space<vmem>>, vector<16x32xf32>
      %cst_10 = arith.constant dense<0.000000e+00> : vector<16xf32>
      %12 = vector.multi_reduction <add>, %11, %cst_10 [1] : vector<16x32xf32> to vector<16xf32>
      %13 = vector.shape_cast %12 : vector<16xf32> to vector<16x1xf32>
      %cst_11 = arith.constant 3.200000e+01 : f32
      %14 = vector.broadcast %cst_11 : f32 to vector<16x1xf32>
      %15 = arith.divf %13, %14 : vector<16x1xf32>
      %16 = vector.broadcast %15 : vector<16x1xf32> to vector<16x32xf32>
      %17 = arith.subf %11, %16 : vector<16x32xf32>
      %18 = arith.mulf %17, %17 : vector<16x32xf32>
      %cst_12 = arith.constant dense<0.000000e+00> : vector<16xf32>
      %19 = vector.multi_reduction <add>, %18, %cst_12 [1] : vector<16x32xf32> to vector<16xf32>
      %20 = vector.shape_cast %19 : vector<16xf32> to vector<16x1xf32>
      %cst_13 = arith.constant 3.200000e+01 : f32
      %21 = vector.broadcast %cst_13 : f32 to vector<16x1xf32>
      %22 = arith.divf %20, %21 : vector<16x1xf32>
      %cst_14 = arith.constant 9.99999974E-6 : f32
      %23 = vector.broadcast %cst_14 : f32 to vector<16x1xf32>
      %24 = arith.addf %22, %23 : vector<16x1xf32>
      %25 = math.rsqrt %24 : vector<16x1xf32>
      %26 = vector.broadcast %25 : vector<16x1xf32> to vector<16x32xf32>
      %27 = arith.mulf %17, %26 : vector<16x32xf32>
      %c0_15 = arith.constant 0 : index
      %c0_16 = arith.constant 0 : index
      %28 = vector.load %arg3[%c0_15, %c0_16] : memref<1x32xf32, #tpu.memory_space<vmem>>, vector<1x32xf32>
      %29 = vector.broadcast %28 : vector<1x32xf32> to vector<16x32xf32>
      %30 = arith.mulf %27, %29 : vector<16x32xf32>
      %c0_17 = arith.constant 0 : index
      %c0_18 = arith.constant 0 : index
      %31 = vector.load %arg4[%c0_17, %c0_18] : memref<1x32xf32, #tpu.memory_space<vmem>>, vector<1x32xf32>
      %32 = vector.broadcast %31 : vector<1x32xf32> to vector<16x32xf32>
      %33 = arith.addf %30, %32 : vector<16x32xf32>
      %34 = arith.truncf %33 : vector<16x32xf32> to vector<16x32xbf16>
      %c0_19 = arith.constant 0 : index
      %c0_20 = arith.constant 0 : index
      %35 = vector.load %arg8[%c0_19, %c0_20] : memref<16x32xbf16, #tpu.memory_space<vmem>>, vector<16x32xbf16>
      tpu.vector_store %arg8[%c0_19, %c0_20], %34 {strides = array<i32>} : memref<16x32xbf16, #tpu.memory_space<vmem>>, vector<16x32xbf16>,
    } else {
    }
    %c0 = arith.constant 0 : index
    %c0_1 = arith.constant 0 : index
    %3 = vector.load %arg8[%c0, %c0_1] : memref<16x32xbf16, #tpu.memory_space<vmem>>, vector<16x32xbf16>
    %c0_2 = arith.constant 0 : index
    %c0_3 = arith.constant 0 : index
    %4 = vector.load %arg5[%c0_2, %c0_3] : memref<32x32xbf16, #tpu.memory_space<vmem>>, vector<32x32xbf16>
    %cst = arith.constant dense<0.000000e+00> : vector<16x32xf32>
    %5 = tpu.matmul %3, %4, %cst {dimension_numbers = #tpu.dot_dimension_numbers<[1], [0], [0], [1], [0, 0, 1, 1], [], []>} : vector<16x32xbf16>, vector<32x32xbf16>, vector<16x32xf32> -> vector<16x32xf32>
    %c0_4 = arith.constant 0 : index
    %c0_5 = arith.constant 0 : index
    %6 = vector.load %arg6[%c0_4, %c0_5] : memref<1x32xf32, #tpu.memory_space<vmem>>, vector<1x32xf32>
    %7 = vector.broadcast %6 : vector<1x32xf32> to vector<16x32xf32>
    %8 = arith.addf %5, %7 : vector<16x32xf32>
    %9 = arith.truncf %8 : vector<16x32xf32> to vector<16x32xbf16>
    %c0_6 = arith.constant 0 : index
    %c0_7 = arith.constant 0 : index
    %10 = vector.load %arg7[%c0_6, %c0_7] : memref<16x32xbf16, #tpu.memory_space<vmem>>, vector<16x32xbf16>
    tpu.vector_store %arg7[%c0_6, %c0_7], %9 {strides = array<i32>} : memref<16x32xbf16, #tpu.memory_space<vmem>>, vector<16x32xbf16>,
    return
  }
  func.func @transform_0(%arg0: i32, %arg1: i32) -> (i32, i32) {
    %c0_i32 = arith.constant 0 : i32
    %c0_i32_0 = arith.constant 0 : i32
    return %arg0, %c0_i32 : i32, i32
  }
  func.func @transform_1(%arg0: i32, %arg1: i32) -> (i32, i32) {
    %c0_i32 = arith.constant 0 : i32
    %c0_i32_0 = arith.constant 0 : i32
    %c0_i32_1 = arith.constant 0 : i32
    return %c0_i32, %c0_i32_0 : i32, i32
  }
  func.func @transform_2(%arg0: i32, %arg1: i32) -> (i32, i32) {
    %c0_i32 = arith.constant 0 : i32
    %c0_i32_0 = arith.constant 0 : i32
    %c0_i32_1 = arith.constant 0 : i32
    return %c0_i32, %c0_i32_0 : i32, i32
  }
  func.func @transform_3(%arg0: i32, %arg1: i32) -> (i32, i32) {
    %c0_i32 = arith.constant 0 : i32
    %c0_i32_0 = arith.constant 0 : i32
    return %c0_i32, %arg1 : i32, i32
  }
  func.func @transform_4(%arg0: i32, %arg1: i32) -> (i32, i32) {
    %c0_i32 = arith.constant 0 : i32
    %c0_i32_0 = arith.constant 0 : i32
    return %c0_i32, %arg1 : i32, i32
  }
  func.func @transform_5(%arg0: i32, %arg1: i32) -> (i32, i32) {
    %c0_i32 = arith.constant 0 : i32
    return %arg0, %arg1 : i32, i32
  }
}

module attributes {stable_mosaic.version = 11 : i64} {
  func.func @kernel(%arg0: i32, %arg1: i32, %arg2: memref<16x32xbf16, #tpu.memory_space<vmem>>, %arg3: memref<32x32xbf16, #tpu.memory_space<vmem>>, %arg4: memref<1x32xf32, #tpu.memory_space<vmem>>, %arg5: memref<16x32xf32, #tpu.memory_space<vmem>>, %arg6: memref<16x32xf32, #tpu.memory_space<vmem>>, %arg7: memref<16x32xbf16, #tpu.memory_space<vmem>>) attributes {dimension_semantics = [#tpu.dimension_semantics<parallel>, #tpu.dimension_semantics<arbitrary>], iteration_bounds = array<i64: 1, 1>, scalar_prefetch = 0 : i64, scratch_operands = 1 : i64, tpu.core_type = #tpu.core_type<tc>, window_params = [{transform_indices = @transform_0, window_bounds = array<i64: 16, 32>}, {transform_indices = @transform_1, window_bounds = array<i64: 32, 32>}, {transform_indices = @transform_2, window_bounds = array<i64: 1, 32>}, {transform_indices = @transform_3, window_bounds = array<i64: 16, 32>}, {transform_indices = @transform_4, window_bounds = array<i64: 16, 32>}]} {
    %c0_i32 = arith.constant 0 : i32
    %0 = arith.cmpi eq, %arg1, %c0_i32 : i32
    %1 = arith.extui %0 : i1 to i32
    %c0_i32_0 = arith.constant 0 : i32
    %2 = arith.cmpi ne, %1, %c0_i32_0 : i32
    scf.if %2 {
      %c0_10 = arith.constant 0 : index
      %c0_11 = arith.constant 0 : index
      %12 = vector.load %arg2[%c0_10, %c0_11] : memref<16x32xbf16, #tpu.memory_space<vmem>>, vector<16x32xbf16>
      %13 = arith.extf %12 : vector<16x32xbf16> to vector<16x32xf32>
      %14 = arith.truncf %13 : vector<16x32xf32> to vector<16x32xbf16>
      %c0_12 = arith.constant 0 : index
      %c0_13 = arith.constant 0 : index
      %15 = vector.load %arg7[%c0_12, %c0_13] : memref<16x32xbf16, #tpu.memory_space<vmem>>, vector<16x32xbf16>
      tpu.vector_store %arg7[%c0_12, %c0_13], %14 {strides = array<i32>} : memref<16x32xbf16, #tpu.memory_space<vmem>>, vector<16x32xbf16>,
    } else {
    }
    %c0 = arith.constant 0 : index
    %c0_1 = arith.constant 0 : index
    %3 = vector.load %arg7[%c0, %c0_1] : memref<16x32xbf16, #tpu.memory_space<vmem>>, vector<16x32xbf16>
    %c0_2 = arith.constant 0 : index
    %c0_3 = arith.constant 0 : index
    %4 = vector.load %arg3[%c0_2, %c0_3] : memref<32x32xbf16, #tpu.memory_space<vmem>>, vector<32x32xbf16>
    %cst = arith.constant dense<0.000000e+00> : vector<16x32xf32>
    %5 = tpu.matmul %3, %4, %cst {dimension_numbers = #tpu.dot_dimension_numbers<[1], [0], [0], [1], [0, 0, 1, 1], [], []>} : vector<16x32xbf16>, vector<32x32xbf16>, vector<16x32xf32> -> vector<16x32xf32>
    %c0_4 = arith.constant 0 : index
    %c0_5 = arith.constant 0 : index
    %6 = vector.load %arg4[%c0_4, %c0_5] : memref<1x32xf32, #tpu.memory_space<vmem>>, vector<1x32xf32>
    %7 = vector.broadcast %6 : vector<1x32xf32> to vector<16x32xf32>
    %8 = arith.addf %5, %7 : vector<16x32xf32>
    %c0_6 = arith.constant 0 : index
    %c0_7 = arith.constant 0 : index
    %9 = vector.load %arg5[%c0_6, %c0_7] : memref<16x32xf32, #tpu.memory_space<vmem>>, vector<16x32xf32>
    %10 = arith.addf %8, %9 : vector<16x32xf32>
    %c0_8 = arith.constant 0 : index
    %c0_9 = arith.constant 0 : index
    %11 = vector.load %arg6[%c0_8, %c0_9] : memref<16x32xf32, #tpu.memory_space<vmem>>, vector<16x32xf32>
    tpu.vector_store %arg6[%c0_8, %c0_9], %10 {strides = array<i32>} : memref<16x32xf32, #tpu.memory_space<vmem>>, vector<16x32xf32>,
    return
  }
  func.func @transform_0(%arg0: i32, %arg1: i32) -> (i32, i32) {
    %c0_i32 = arith.constant 0 : i32
    %c0_i32_0 = arith.constant 0 : i32
    return %arg0, %c0_i32 : i32, i32
  }
  func.func @transform_1(%arg0: i32, %arg1: i32) -> (i32, i32) {
    %c0_i32 = arith.constant 0 : i32
    %c0_i32_0 = arith.constant 0 : i32
    return %c0_i32, %arg1 : i32, i32
  }
  func.func @transform_2(%arg0: i32, %arg1: i32) -> (i32, i32) {
    %c0_i32 = arith.constant 0 : i32
    %c0_i32_0 = arith.constant 0 : i32
    return %c0_i32, %arg1 : i32, i32
  }
  func.func @transform_3(%arg0: i32, %arg1: i32) -> (i32, i32) {
    %c0_i32 = arith.constant 0 : i32
    return %arg0, %arg1 : i32, i32
  }
  func.func @transform_4(%arg0: i32, %arg1: i32) -> (i32, i32) {
    %c0_i32 = arith.constant 0 : i32
    return %arg0, %arg1 : i32, i32
  }
}

module attributes {stable_mosaic.version = 11 : i64} {
  func.func @kernel(%arg0: i32, %arg1: i32, %arg2: memref<16x32xf32, #tpu.memory_space<vmem>>, %arg3: memref<32x32xbf16, #tpu.memory_space<vmem>>, %arg4: memref<32x32xbf16, #tpu.memory_space<vmem>>, %arg5: memref<1x32xf32, #tpu.memory_space<vmem>>, %arg6: memref<1x32xf32, #tpu.memory_space<vmem>>, %arg7: memref<16x32xbf16, #tpu.memory_space<vmem>>, %arg8: memref<16x32xbf16, #tpu.memory_space<vmem>>, %arg9: memref<16x32xbf16, #tpu.memory_space<vmem>>) attributes {dimension_semantics = [#tpu.dimension_semantics<parallel>, #tpu.dimension_semantics<arbitrary>], iteration_bounds = array<i64: 1, 1>, scalar_prefetch = 0 : i64, scratch_operands = 1 : i64, tpu.core_type = #tpu.core_type<tc>, window_params = [{transform_indices = @transform_0, window_bounds = array<i64: 16, 32>}, {transform_indices = @transform_1, window_bounds = array<i64: 32, 32>}, {transform_indices = @transform_2, window_bounds = array<i64: 32, 32>}, {transform_indices = @transform_3, window_bounds = array<i64: 1, 32>}, {transform_indices = @transform_4, window_bounds = array<i64: 1, 32>}, {transform_indices = @transform_5, window_bounds = array<i64: 16, 32>}, {transform_indices = @transform_6, window_bounds = array<i64: 16, 32>}]} {
    %c0_i32 = arith.constant 0 : i32
    %0 = arith.cmpi eq, %arg1, %c0_i32 : i32
    %1 = arith.extui %0 : i1 to i32
    %c0_i32_0 = arith.constant 0 : i32
    %2 = arith.cmpi ne, %1, %c0_i32_0 : i32
    scf.if %2 {
      %c0_15 = arith.constant 0 : index
      %c0_16 = arith.constant 0 : index
      %18 = vector.load %arg2[%c0_15, %c0_16] : memref<16x32xf32, #tpu.memory_space<vmem>>, vector<16x32xf32>
      %19 = arith.truncf %18 : vector<16x32xf32> to vector<16x32xbf16>
      %c0_17 = arith.constant 0 : index
      %c0_18 = arith.constant 0 : index
      %20 = vector.load %arg9[%c0_17, %c0_18] : memref<16x32xbf16, #tpu.memory_space<vmem>>, vector<16x32xbf16>
      tpu.vector_store %arg9[%c0_17, %c0_18], %19 {strides = array<i32>} : memref<16x32xbf16, #tpu.memory_space<vmem>>, vector<16x32xbf16>,
    } else {
    }
    %c0 = arith.constant 0 : index
    %c0_1 = arith.constant 0 : index
    %3 = vector.load %arg9[%c0, %c0_1] : memref<16x32xbf16, #tpu.memory_space<vmem>>, vector<16x32xbf16>
    %c0_2 = arith.constant 0 : index
    %c0_3 = arith.constant 0 : index
    %4 = vector.load %arg3[%c0_2, %c0_3] : memref<32x32xbf16, #tpu.memory_space<vmem>>, vector<32x32xbf16>
    %cst = arith.constant dense<0.000000e+00> : vector<16x32xf32>
    %5 = tpu.matmul %3, %4, %cst {dimension_numbers = #tpu.dot_dimension_numbers<[1], [0], [0], [1], [0, 0, 1, 1], [], []>} : vector<16x32xbf16>, vector<32x32xbf16>, vector<16x32xf32> -> vector<16x32xf32>
    %c0_4 = arith.constant 0 : index
    %c0_5 = arith.constant 0 : index
    %6 = vector.load %arg5[%c0_4, %c0_5] : memref<1x32xf32, #tpu.memory_space<vmem>>, vector<1x32xf32>
    %7 = vector.broadcast %6 : vector<1x32xf32> to vector<16x32xf32>
    %8 = arith.addf %5, %7 : vector<16x32xf32>
    %9 = arith.truncf %8 : vector<16x32xf32> to vector<16x32xbf16>
    %c0_6 = arith.constant 0 : index
    %c0_7 = arith.constant 0 : index
    %10 = vector.load %arg7[%c0_6, %c0_7] : memref<16x32xbf16, #tpu.memory_space<vmem>>, vector<16x32xbf16>
    tpu.vector_store %arg7[%c0_6, %c0_7], %9 {strides = array<i32>} : memref<16x32xbf16, #tpu.memory_space<vmem>>, vector<16x32xbf16>,
    %c0_8 = arith.constant 0 : index
    %c0_9 = arith.constant 0 : index
    %11 = vector.load %arg4[%c0_8, %c0_9] : memref<32x32xbf16, #tpu.memory_space<vmem>>, vector<32x32xbf16>
    %cst_10 = arith.constant dense<0.000000e+00> : vector<16x32xf32>
    %12 = tpu.matmul %3, %11, %cst_10 {dimension_numbers = #tpu.dot_dimension_numbers<[1], [0], [0], [1], [0, 0, 1, 1], [], []>} : vector<16x32xbf16>, vector<32x32xbf16>, vector<16x32xf32> -> vector<16x32xf32>
    %c0_11 = arith.constant 0 : index
    %c0_12 = arith.constant 0 : index
    %13 = vector.load %arg6[%c0_11, %c0_12] : memref<1x32xf32, #tpu.memory_space<vmem>>, vector<1x32xf32>
    %14 = vector.broadcast %13 : vector<1x32xf32> to vector<16x32xf32>
    %15 = arith.addf %12, %14 : vector<16x32xf32>
    %16 = arith.truncf %15 : vector<16x32xf32> to vector<16x32xbf16>
    %c0_13 = arith.constant 0 : index
    %c0_14 = arith.constant 0 : index
    %17 = vector.load %arg8[%c0_13, %c0_14] : memref<16x32xbf16, #tpu.memory_space<vmem>>, vector<16x32xbf16>
    tpu.vector_store %arg8[%c0_13, %c0_14], %16 {strides = array<i32>} : memref<16x32xbf16, #tpu.memory_space<vmem>>, vector<16x32xbf16>,
    return
  }
  func.func @transform_0(%arg0: i32, %arg1: i32) -> (i32, i32) {
    %c0_i32 = arith.constant 0 : i32
    %c0_i32_0 = arith.constant 0 : i32
    return %arg0, %c0_i32 : i32, i32
  }
  func.func @transform_1(%arg0: i32, %arg1: i32) -> (i32, i32) {
    %c0_i32 = arith.constant 0 : i32
    %c0_i32_0 = arith.constant 0 : i32
    return %c0_i32, %arg1 : i32, i32
  }
  func.func @transform_2(%arg0: i32, %arg1: i32) -> (i32, i32) {
    %c0_i32 = arith.constant 0 : i32
    %c0_i32_0 = arith.constant 0 : i32
    return %c0_i32, %arg1 : i32, i32
  }
  func.func @transform_3(%arg0: i32, %arg1: i32) -> (i32, i32) {
    %c0_i32 = arith.constant 0 : i32
    %c0_i32_0 = arith.constant 0 : i32
    return %c0_i32, %arg1 : i32, i32
  }
  func.func @transform_4(%arg0: i32, %arg1: i32) -> (i32, i32) {
    %c0_i32 = arith.constant 0 : i32
    %c0_i32_0 = arith.constant 0 : i32
    return %c0_i32, %arg1 : i32, i32
  }
  func.func @transform_5(%arg0: i32, %arg1: i32) -> (i32, i32) {
    %c0_i32 = arith.constant 0 : i32
    return %arg0, %arg1 : i32, i32
  }
  func.func @transform_6(%arg0: i32, %arg1: i32) -> (i32, i32) {
    %c0_i32 = arith.constant 0 : i32
    return %arg0, %arg1 : i32, i32
  }
}

module attributes {stable_mosaic.version = 11 : i64} {
  func.func @_ln_ffn_kernel(%arg0: i32, %arg1: i32, %arg2: memref<16x32xf32, #tpu.memory_space<vmem>>, %arg3: memref<1x32xf32, #tpu.memory_space<vmem>>, %arg4: memref<1x32xf32, #tpu.memory_space<vmem>>, %arg5: memref<32x512xbf16, #tpu.memory_space<vmem>>, %arg6: memref<1x512xf32, #tpu.memory_space<vmem>>, %arg7: memref<512x32xbf16, #tpu.memory_space<vmem>>, %arg8: memref<1x32xf32, #tpu.memory_space<vmem>>, %arg9: memref<16x32xf32, #tpu.memory_space<vmem>>, %arg10: memref<16x32xbf16, #tpu.memory_space<vmem>>, %arg11: memref<16x32xf32, #tpu.memory_space<vmem>>) attributes {dimension_semantics = [#tpu.dimension_semantics<parallel>, #tpu.dimension_semantics<arbitrary>], iteration_bounds = array<i64: 1, 4>, scalar_prefetch = 0 : i64, scratch_operands = 2 : i64, tpu.core_type = #tpu.core_type<tc>, window_params = [{transform_indices = @transform_0, window_bounds = array<i64: 16, 32>}, {pipeline_mode = #tpu.pipeline_mode<synchronous>, transform_indices = @transform_1, window_bounds = array<i64: 1, 32>}, {pipeline_mode = #tpu.pipeline_mode<synchronous>, transform_indices = @transform_2, window_bounds = array<i64: 1, 32>}, {transform_indices = @transform_3, window_bounds = array<i64: 32, 512>}, {transform_indices = @transform_4, window_bounds = array<i64: 1, 512>}, {transform_indices = @transform_5, window_bounds = array<i64: 512, 32>}, {pipeline_mode = #tpu.pipeline_mode<synchronous>, transform_indices = @transform_6, window_bounds = array<i64: 1, 32>}, {transform_indices = @transform_7, window_bounds = array<i64: 16, 32>}]} {
    %c0_i32 = arith.constant 0 : i32
    %0 = arith.cmpi eq, %arg1, %c0_i32 : i32
    %1 = arith.extui %0 : i1 to i32
    %c0_i32_0 = arith.constant 0 : i32
    %2 = arith.cmpi ne, %1, %c0_i32_0 : i32
    scf.if %2 {
      %c0_15 = arith.constant 0 : index
      %c0_16 = arith.constant 0 : index
      %20 = vector.load %arg2[%c0_15, %c0_16] : memref<16x32xf32, #tpu.memory_space<vmem>>, vector<16x32xf32>
      %cst_17 = arith.constant dense<0.000000e+00> : vector<16xf32>
      %21 = vector.multi_reduction <add>, %20, %cst_17 [1] : vector<16x32xf32> to vector<16xf32>
      %22 = vector.shape_cast %21 : vector<16xf32> to vector<16x1xf32>
      %cst_18 = arith.constant 3.200000e+01 : f32
      %23 = vector.broadcast %cst_18 : f32 to vector<16x1xf32>
      %24 = arith.divf %22, %23 : vector<16x1xf32>
      %25 = vector.broadcast %24 : vector<16x1xf32> to vector<16x32xf32>
      %26 = arith.subf %20, %25 : vector<16x32xf32>
      %27 = arith.mulf %26, %26 : vector<16x32xf32>
      %cst_19 = arith.constant dense<0.000000e+00> : vector<16xf32>
      %28 = vector.multi_reduction <add>, %27, %cst_19 [1] : vector<16x32xf32> to vector<16xf32>
      %29 = vector.shape_cast %28 : vector<16xf32> to vector<16x1xf32>
      %cst_20 = arith.constant 3.200000e+01 : f32
      %30 = vector.broadcast %cst_20 : f32 to vector<16x1xf32>
      %31 = arith.divf %29, %30 : vector<16x1xf32>
      %cst_21 = arith.constant 9.99999974E-6 : f32
      %32 = vector.broadcast %cst_21 : f32 to vector<16x1xf32>
      %33 = arith.addf %31, %32 : vector<16x1xf32>
      %34 = math.rsqrt %33 : vector<16x1xf32>
      %35 = vector.broadcast %34 : vector<16x1xf32> to vector<16x32xf32>
      %36 = arith.mulf %26, %35 : vector<16x32xf32>
      %c0_22 = arith.constant 0 : index
      %c0_23 = arith.constant 0 : index
      %37 = vector.load %arg3[%c0_22, %c0_23] : memref<1x32xf32, #tpu.memory_space<vmem>>, vector<1x32xf32>
      %38 = vector.broadcast %37 : vector<1x32xf32> to vector<16x32xf32>
      %39 = arith.mulf %36, %38 : vector<16x32xf32>
      %c0_24 = arith.constant 0 : index
      %c0_25 = arith.constant 0 : index
      %40 = vector.load %arg4[%c0_24, %c0_25] : memref<1x32xf32, #tpu.memory_space<vmem>>, vector<1x32xf32>
      %41 = vector.broadcast %40 : vector<1x32xf32> to vector<16x32xf32>
      %42 = arith.addf %39, %41 : vector<16x32xf32>
      %43 = arith.truncf %42 : vector<16x32xf32> to vector<16x32xbf16>
      %c0_26 = arith.constant 0 : index
      %c0_27 = arith.constant 0 : index
      %44 = vector.load %arg10[%c0_26, %c0_27] : memref<16x32xbf16, #tpu.memory_space<vmem>>, vector<16x32xbf16>
      tpu.vector_store %arg10[%c0_26, %c0_27], %43 {strides = array<i32>} : memref<16x32xbf16, #tpu.memory_space<vmem>>, vector<16x32xbf16>,
      %cst_28 = arith.constant 0.000000e+00 : f32
      %45 = vector.broadcast %cst_28 : f32 to vector<16x32xf32>
      %c0_29 = arith.constant 0 : index
      %c0_30 = arith.constant 0 : index
      %46 = vector.load %arg11[%c0_29, %c0_30] : memref<16x32xf32, #tpu.memory_space<vmem>>, vector<16x32xf32>
      tpu.vector_store %arg11[%c0_29, %c0_30], %45 {strides = array<i32>} : memref<16x32xf32, #tpu.memory_space<vmem>>, vector<16x32xf32>,
    } else {
    }
    %c0 = arith.constant 0 : index
    %c0_1 = arith.constant 0 : index
    %3 = vector.load %arg10[%c0, %c0_1] : memref<16x32xbf16, #tpu.memory_space<vmem>>, vector<16x32xbf16>
    %c0_2 = arith.constant 0 : index
    %c0_3 = arith.constant 0 : index
    %4 = vector.load %arg5[%c0_2, %c0_3] : memref<32x512xbf16, #tpu.memory_space<vmem>>, vector<32x512xbf16>
    %cst = arith.constant dense<0.000000e+00> : vector<16x512xf32>
    %5 = tpu.matmul %3, %4, %cst {dimension_numbers = #tpu.dot_dimension_numbers<[1], [0], [0], [1], [0, 0, 1, 1], [], []>} : vector<16x32xbf16>, vector<32x512xbf16>, vector<16x512xf32> -> vector<16x512xf32>
    %c0_4 = arith.constant 0 : index
    %c0_5 = arith.constant 0 : index
    %6 = vector.load %arg6[%c0_4, %c0_5] : memref<1x512xf32, #tpu.memory_space<vmem>>, vector<1x512xf32>
    %7 = vector.broadcast %6 : vector<1x512xf32> to vector<16x512xf32>
    %8 = arith.addf %5, %7 : vector<16x512xf32>
    %cst_6 = arith.constant 0.000000e+00 : f32
    %9 = vector.broadcast %cst_6 : f32 to vector<16x512xf32>
    %10 = arith.maximumf %8, %9 : vector<16x512xf32>
    %c0_7 = arith.constant 0 : index
    %c0_8 = arith.constant 0 : index
    %11 = vector.load %arg11[%c0_7, %c0_8] : memref<16x32xf32, #tpu.memory_space<vmem>>, vector<16x32xf32>
    %12 = arith.truncf %10 : vector<16x512xf32> to vector<16x512xbf16>
    %c0_9 = arith.constant 0 : index
    %c0_10 = arith.constant 0 : index
    %13 = vector.load %arg7[%c0_9, %c0_10] : memref<512x32xbf16, #tpu.memory_space<vmem>>, vector<512x32xbf16>
    %cst_11 = arith.constant dense<0.000000e+00> : vector<16x32xf32>
    %14 = tpu.matmul %12, %13, %cst_11 {dimension_numbers = #tpu.dot_dimension_numbers<[1], [0], [0], [1], [0, 0, 1, 1], [], []>} : vector<16x512xbf16>, vector<512x32xbf16>, vector<16x32xf32> -> vector<16x32xf32>
    %15 = arith.addf %11, %14 : vector<16x32xf32>
    %c0_12 = arith.constant 0 : index
    %c0_13 = arith.constant 0 : index
    %16 = vector.load %arg11[%c0_12, %c0_13] : memref<16x32xf32, #tpu.memory_space<vmem>>, vector<16x32xf32>
    tpu.vector_store %arg11[%c0_12, %c0_13], %15 {strides = array<i32>} : memref<16x32xf32, #tpu.memory_space<vmem>>, vector<16x32xf32>,
    %c3_i32 = arith.constant 3 : i32
    %17 = arith.cmpi eq, %arg1, %c3_i32 : i32
    %18 = arith.extui %17 : i1 to i32
    %c0_i32_14 = arith.constant 0 : i32
    %19 = arith.cmpi ne, %18, %c0_i32_14 : i32
    scf.if %19 {
      %c0_15 = arith.constant 0 : index
      %c0_16 = arith.constant 0 : index
      %20 = vector.load %arg11[%c0_15, %c0_16] : memref<16x32xf32, #tpu.memory_space<vmem>>, vector<16x32xf32>
      %c0_17 = arith.constant 0 : index
      %c0_18 = arith.constant 0 : index
      %21 = vector.load %arg8[%c0_17, %c0_18] : memref<1x32xf32, #tpu.memory_space<vmem>>, vector<1x32xf32>
      %22 = vector.broadcast %21 : vector<1x32xf32> to vector<16x32xf32>
      %23 = arith.addf %20, %22 : vector<16x32xf32>
      %c0_19 = arith.constant 0 : index
      %c0_20 = arith.constant 0 : index
      %24 = vector.load %arg2[%c0_19, %c0_20] : memref<16x32xf32, #tpu.memory_space<vmem>>, vector<16x32xf32>
      %25 = arith.addf %23, %24 : vector<16x32xf32>
      %c0_21 = arith.constant 0 : index
      %c0_22 = arith.constant 0 : index
      %26 = vector.load %arg9[%c0_21, %c0_22] : memref<16x32xf32, #tpu.memory_space<vmem>>, vector<16x32xf32>
      tpu.vector_store %arg9[%c0_21, %c0_22], %25 {strides = array<i32>} : memref<16x32xf32, #tpu.memory_space<vmem>>, vector<16x32xf32>,
    } else {
    }
    return
  }
  func.func @transform_0(%arg0: i32, %arg1: i32) -> (i32, i32) {
    %c0_i32 = arith.constant 0 : i32
    %c0_i32_0 = arith.constant 0 : i32
    return %arg0, %c0_i32 : i32, i32
  }
  func.func @transform_1(%arg0: i32, %arg1: i32) -> (i32, i32) {
    %c0_i32 = arith.constant 0 : i32
    %c0_i32_0 = arith.constant 0 : i32
    %c0_i32_1 = arith.constant 0 : i32
    return %c0_i32, %c0_i32_0 : i32, i32
  }
  func.func @transform_2(%arg0: i32, %arg1: i32) -> (i32, i32) {
    %c0_i32 = arith.constant 0 : i32
    %c0_i32_0 = arith.constant 0 : i32
    %c0_i32_1 = arith.constant 0 : i32
    return %c0_i32, %c0_i32_0 : i32, i32
  }
  func.func @transform_3(%arg0: i32, %arg1: i32) -> (i32, i32) {
    %c0_i32 = arith.constant 0 : i32
    %c0_i32_0 = arith.constant 0 : i32
    return %c0_i32, %arg1 : i32, i32
  }
  func.func @transform_4(%arg0: i32, %arg1: i32) -> (i32, i32) {
    %c0_i32 = arith.constant 0 : i32
    %c0_i32_0 = arith.constant 0 : i32
    return %c0_i32, %arg1 : i32, i32
  }
  func.func @transform_5(%arg0: i32, %arg1: i32) -> (i32, i32) {
    %c0_i32 = arith.constant 0 : i32
    %c0_i32_0 = arith.constant 0 : i32
    return %arg1, %c0_i32 : i32, i32
  }
  func.func @transform_6(%arg0: i32, %arg1: i32) -> (i32, i32) {
    %c0_i32 = arith.constant 0 : i32
    %c0_i32_0 = arith.constant 0 : i32
    %c0_i32_1 = arith.constant 0 : i32
    return %c0_i32, %c0_i32_0 : i32, i32
  }
  func.func @transform_7(%arg0: i32, %arg1: i32) -> (i32, i32) {
    %c0_i32 = arith.constant 0 : i32
    %c0_i32_0 = arith.constant 0 : i32
    return %arg0, %c0_i32 : i32, i32
  }
}

</mosaic_0001>

<bundles_post_ra>
// kernel: decoder_layer.10
= control target key start
LH: loop header
LB: loop body
LE: loop exit
PB: predicated region body
PF: predicated region fallthrough
CT: control target
= control target key end

     0   :  { %9 = vsyncpa [#allocation4], 0  ;;  %s170_s15 = smov [#allocation3]   ;;  %s235_s0 = inlined_call_operand.vmem [shape: bf16[16,32], index: 0, kind: input, shape index: {}]   ;;  %s236_s1 = inlined_call_operand.vmem [shape: bf16[32,32], index: 1, kind: input, shape index: {}]   ;;  %s237_s2 = inlined_call_operand.hbm [shape: f32[1,32], index: 2, kind: input, shape index: {}]   ;;  %s238_s3 = inlined_call_operand.vmem [shape: f32[16,32], index: 3, kind: input, shape index: {}]   ;;  %s239_s4 = inlined_call_operand.vmem [shape: f32[16,32], index: 4, kind: output, shape index: {}]  }
   0x1   :  { %s20_s16 = sshll.u32 %s170_s15, 4  ;;  %s146_s19 = scalar_lea.hbm %s237_s2, 16  ;;  %s21_s16 = int_to_ptr.vmem [resolvable:$true] %s20_s16 }
   0x2   :  { %p147_p0 = scmp.ne.s32.totalorder %s237_s2, %s146_s19  ;;  %p150_p1 = scmp.lt.u32.totalorder %s146_s19, %s237_s2 }
   0x4   :  { %p152_p2 = pnand %p150_p1, %p147_p0 }
   0x6   :  { %155 = shalt.err (!%p152_p2)
}
   0x7   :  { %s156_s24 = scalar_lea.vmem %s21_s16, 16  ;;  %s160_s25 = scalar_lea.vmem %s21_s16, 32 }
   0x8   :  { %p157_p3 = scmp.ne.s32.totalorder %s21_s16, %s156_s24  ;;  %p161_p4 = scmp.lt.s32.totalorder %s21_s16, %s21_s16 }
   0x9   :  { %p162_p5 = scmp.lt.s32.totalorder %s160_s25, %s156_s24 }
   0xb   :  { %p163_p6 = por %p162_p5, %p161_p4 }
   0xd   :  { %p164_p7 = pnand %p163_p6, %p157_p3 }
   0xf   :  { %167 = shalt.err (!%p164_p7)
}
  0x10   :  { %23 = dma.hbm_to_vmem [thread:$0]  %s237_s2, 16, %s21_s16, [#allocation4]  }
  0x11   :  { %168 = dma.done.wait [#allocation4], 16  }
  0x12   :  { %169 = vsyncadd [#allocation4], 4294967280  ;;  %v171_v0 = vmov 0.0   ;;  %vm172_vm0 = vmmov 0   ;;  %v143_v1 = vld [vmem:[%s236_s1] sm:$0xff]   ;;  %v144_v2 = vld [vmem:[%s236_s1 + $0x8] sm:$0xff]  }
  0x13   :  { %132 = vmatprep.subr.bf16.mxu0 %v171_v0  ;;  %136 = vmatprep.mubr.msk.bf16.mxu0 %vm172_vm0, %v171_v0  ;;  %vm42_vm1 = vcmask 261120   ;;  %v145_v3 = vld [vmem:[%s235_s0] sm:$0xff]   ;;  %v125_v5 = vld [vmem:[#allocation3] ss:$0 sm:$0xff] }
  0x14   :  { %133 = vmatpush3.bf16.msra.mxu0 %v143_v1  ;;  %43 = vst.msk [vmem:[#allocation2] sm:$0xff] %vm42_vm1, %v145_v3  ;;  %v113_v7 = vld [vmem:[%s238_s3] sm:$0xff]  ;;  %v114_v11 = vld [vmem:[%s238_s3 + $0x8] sm:$0xff] }
  0x15   :  { %134 = vmatprep.subr.bf16.mxu0 %v171_v0 }
  0x18   :  { %135 = vmatpush3.bf16.msra.mxu0 %v144_v2 }
  0x1b   :  { %v44_v4 = vld [vmem:[#allocation2] sm:$0xff] }
  0x1c   :  { %137 = vmatmul.mubr.msk.bf16.vlgmr.msra.gmra.mrb[0].mxu0 %vm42_vm1, %v44_v4 }
  0xef   :  { %v106_v6 = vpop.f32.mrb[0].mxu0 }
  0xf0   :  { %v107_v8 = vadd.f32 %v125_v5, %v106_v6  ;;  %v138_v9 = vpop.f32.mrb[1].mxu0 }
  0xf1   :  { %v109_v10 = vpop.f32.mrb[2].mxu0 }
  0xf2   :  { %v115_v12 = vadd.f32 %v113_v7, %v107_v8  ;;  %v110_v13 = vadd.f32 %v125_v5, %v109_v10  ;;  %v139_v14 = vpop.f32.mrb[3].mxu0 }
  0xf4   :  { %117 = vst.msk [vmem:[%s239_s4] sm:$0xff] %vm42_vm1, %v115_v12  ;;  %v116_v15 = vadd.f32 %v114_v11, %v110_v13 }
  0xf6   :  { %118 = vst.msk [vmem:[%s239_s4 + $0x8] sm:$0xff] %vm42_vm1, %v116_v15 }
  0xf7   :  { %123 = vsyncpa [#allocation4], 1 }

// kernel: decoder_layer.8
= control target key start
LH: loop header
LB: loop body
LE: loop exit
PB: predicated region body
PF: predicated region fallthrough
CT: control target
= control target key end

     0   :  { %vm42_vm0 = vcmask 261120   ;;  %v401_v15 = vmov 0.0   ;;  %vm402_vm1 = vmmov 0   ;;  %vm167_vm2 = vcmask 257024   ;;  %s537_s0 = inlined_call_operand.vmem [shape: f32[16,32], index: 0, kind: input, shape index: {}]   ;;  %s538_s3 = inlined_call_operand.vmem [shape: bf16[32,32], index: 3, kind: input, shape index: {}]   ;;  %s539_s4 = inlined_call_operand.vmem [shape: bf16[32,32], index: 4, kind: input, shape index: {}]   ;;  %s540_s5 = inlined_call_operand.vmem [shape: bf16[32,32], index: 5, kind: input, shape index: {}]   ;;  %s541_s1 = inlined_call_operand.vmem [shape: f32[1,32], index: 1, kind: input, shape index: {}]   ;;  %s542_s2 = inlined_call_operand.vmem [shape: f32[1,32], index: 2, kind: input, shape index: {}]   ;;  %s543_s6 = inlined_call_operand.vmem [shape: f32[1,32], index: 6, kind: input, shape index: {}]   ;;  %s544_s7 = inlined_call_operand.vmem [shape: f32[1,32], index: 7, kind: input, shape index: {}]   ;;  %s545_s9 = inlined_call_operand.vmem [shape: bf16[16,32], index: 9, kind: output, shape index: {0}]   ;;  %s546_s10 = inlined_call_operand.vmem [shape: bf16[16,32], index: 10, kind: output, shape index: {1}]   ;;  %s547_s8 = inlined_call_operand.vmem [shape: f32[1,32], index: 8, kind: input, shape index: {}]   ;;  %s548_s11 = inlined_call_operand.vmem [shape: bf16[16,32], index: 11, kind: output, shape index: {2}]  }
   0x1   :  { %v40_v0 = vld [vmem:[%s537_s0] sm:$0xff]  ;;  %v41_v1 = vld [vmem:[%s537_s0 + $0x8] sm:$0xff]  ;;  %365 = vmatprep.subr.bf16.mxu0 %v401_v15  ;;  %373 = vmatprep.subr.bf16.mxu1 %v401_v15 }
   0x2   :  { %v43_v2 = vsel %vm42_vm0, %v40_v0, 0.0  ;;  %v46_v3 = vsel %vm42_vm0, %v41_v1, 0.0  ;;  %v391_v14 = vld [vmem:[%s538_s3] sm:$0xff]   ;;  %v393_v17 = vld [vmem:[%s538_s3 + $0x8] sm:$0xff]   ;;  %369 = vmatprep.mubr.msk.bf16.mxu0 %vm402_vm1, %v401_v15  ;;  %377 = vmatprep.mubr.msk.bf16.mxu1 %vm402_vm1, %v401_v15 }
   0x3   :  { %44 = vadd.xlane.f32.xlu0 %v43_v2  ;;  %v392_v16 = vld [vmem:[%s539_s4] sm:$0xff]   ;;  %366 = vmatpush3.bf16.msra.mxu0 %v391_v14  ;;  %v394_v18 = vld [vmem:[%s539_s4 + $0x8] sm:$0xff]  }
   0x4   :  { %374 = vmatpush3.bf16.msra.mxu1 %v392_v16  ;;  %367 = vmatprep.subr.bf16.mxu0 %v401_v15  ;;  %v330_v27 = vld [vmem:[%s541_s1] ss:$0 sm:$0xff]  ;;  %v396_v38 = vld [vmem:[%s540_s5 + $0x8] sm:$0xff]  }
   0x5   :  { %375 = vmatprep.subr.bf16.mxu1 %v401_v15  ;;  %v331_v31 = vld [vmem:[%s542_s2] ss:$0 sm:$0xff] }
   0x6   :  { %v395_v36 = vld [vmem:[%s540_s5] sm:$0xff]  }
   0x7   :  { %47 = vadd.xlane.f32.xlu0 %v46_v3  ;;  %368 = vmatpush3.bf16.msra.mxu0 %v393_v17  ;;  %v332_v39 = vld [vmem:[%s543_s6] ss:$0 sm:$0xff] }
   0x8   :  { %376 = vmatpush3.bf16.msra.mxu1 %v394_v18  ;;  %381 = vmatprep.subr.bf16.mxu0 %v401_v15  ;;  %v338_v40 = vld [vmem:[%s544_s7] ss:$0 sm:$0xff] }
   0x9   :  { %v344_v57 = vld [vmem:[%s547_s8] ss:$0 sm:$0xff] }
  0x90   :  { %v45_v4 = vpop.xlane.xlu0 %44 }
  0x91   :  { %v50_v5 = vmul.f32 0.03125, %v45_v4 }
  0x93   :  { %v52_v6 = vsub.f32 %v40_v0, %v50_v5 }
  0x94   :  { %v48_v7 = vpop.xlane.xlu0 %47 }
  0x95   :  { %v51_v8 = vmul.f32 0.03125, %v48_v7  ;;  %v54_v9 = vmul.f32 %v52_v6, %v52_v6 }
  0x97   :  { %v53_v10 = vsub.f32 %v41_v1, %v51_v8  ;;  %v56_v11 = vsel %vm42_vm0, %v54_v9, 0.0 }
  0x98   :  { %57 = vadd.xlane.f32.xlu1 %v56_v11 }
  0x99   :  { %v55_v12 = vmul.f32 %v53_v10, %v53_v10 }
  0x9b   :  { %v59_v13 = vsel %vm42_vm0, %v55_v12, 0.0 }
  0x9c   :  { %60 = vadd.xlane.f32.xlu1 %v59_v13 }
 0x125   :  { %v58_v19 = vpop.xlane.xlu1 %57 }
 0x126   :  { %v62_v20 = vmul.f32 0.03125, %v58_v19 }
 0x128   :  { %v64_v21 = vadd.f32 1e-05, %v62_v20 }
 0x129   :  { %v61_v22 = vpop.xlane.xlu1 %60 }
 0x12a   :  { %397 = vrsqrt.f32 %v64_v21  ;;  %v63_v23 = vmul.f32 0.03125, %v61_v22 }
 0x12c   :  { %v65_v24 = vadd.f32 1e-05, %v63_v23 }
 0x12e   :  { %399 = vrsqrt.f32 %v65_v24 }
 0x134   :  { %v398_v25 = vpop.eup %397 }
 0x135   :  { %v68_v26 = vmul.f32 %v398_v25, %v52_v6 }
 0x137   :  { %v77_v29 = vmul.f32 %v330_v27, %v68_v26 }
 0x138   :  { %v400_v28 = vpop.eup %399 }
 0x139   :  { %v69_v30 = vmul.f32 %v400_v28, %v53_v10  ;;  %v86_v33 = vadd.f32 %v331_v31, %v77_v29 }
 0x13b   :  { %v78_v32 = vmul.f32 %v330_v27, %v69_v30 }
 0x13d   :  { %v87_v34 = vadd.f32 %v331_v31, %v78_v32 }
 0x13f   :  { %v88_v35 = vpack.c.bf16 %v87_v34, %v86_v33 }
 0x141   :  { %89 = vst.msk [vmem:[#allocation2] sm:$0xff] %vm42_vm0, %v88_v35 }
 0x148   :  { %v90_v37 = vld [vmem:[#allocation2] sm:$0xff] }
 0x149   :  { %370 = vmatmul.mubr.msk.bf16.vlgmr.msra.gmra.mrb[0].mxu0 %vm42_vm0, %v90_v37  ;;  %378 = vmatmul.mubr.msk.bf16.vlgmr.msra.gmra.mrb[0].mxu1 %vm42_vm0, %v90_v37 }
 0x14a   :  { %382 = vmatpush3.bf16.msra.mxu0 %v395_v36  ;;  %385 = vmatprep.mubr.msk.bf16.mxu0 %vm402_vm1, %v401_v15 }
 0x14b   :  { %383 = vmatprep.subr.bf16.mxu0 %v401_v15 }
 0x14e   :  { %384 = vmatpush3.bf16.msra.mxu0 %v396_v38 }
 0x151   :  { %386 = vmatmul.mubr.msk.bf16.vlgmr.msra.gmra.mrb[4].mxu0 %vm42_vm0, %v90_v37 }
 0x21c   :  { %v152_v41 = vpop.f32.mrb[0].mxu0  ;;  %v227_v42 = vpop.f32.mrb[0].mxu1 }
 0x21d   :  { %v153_v43 = vadd.f32 %v332_v39, %v152_v41  ;;  %v228_v44 = vadd.f32 %v338_v40, %v227_v42  ;;  %v371_v45 = vpop.f32.mrb[1].mxu0  ;;  %v379_v46 = vpop.f32.mrb[1].mxu1 }
 0x21e   :  { %v155_v47 = vpop.f32.mrb[2].mxu0  ;;  %v230_v48 = vpop.f32.mrb[2].mxu1 }
 0x21f   :  { %v350_v49 = vpack.c.bf16 %v153_v43, %v153_v43  ;;  %v352_v50 = vpack.c.bf16 %v228_v44, %v228_v44  ;;  %v156_v51 = vadd.f32 %v332_v39, %v155_v47  ;;  %v231_v52 = vadd.f32 %v338_v40, %v230_v48  ;;  %v372_v53 = vpop.f32.mrb[3].mxu0  ;;  %v380_v54 = vpop.f32.mrb[3].mxu1 }
 0x221   :  { %168 = vst.msk [vmem:[%s545_s9] sm:$0xf] %vm167_vm2, %v350_v49  ;;  %242 = vst.msk [vmem:[%s546_s10] sm:$0xf] %vm167_vm2, %v352_v50  ;;  %v351_v55 = vpack.c.bf16 %v156_v51, %v156_v51  ;;  %v353_v56 = vpack.c.bf16 %v231_v52, %v231_v52 }
 0x223   :  { %169 = vst.msk [vmem:[%s545_s9 + $0x4] sm:$0xf] %vm167_vm2, %v351_v55  ;;  %243 = vst.msk [vmem:[%s546_s10 + $0x4] sm:$0xf] %vm167_vm2, %v353_v56 }
 0x224   :  { %v301_v58 = vpop.f32.mrb[4].mxu0 }
 0x225   :  { %v302_v59 = vadd.f32 %v344_v57, %v301_v58  ;;  %v387_v60 = vpop.f32.mrb[5].mxu0 }
 0x226   :  { %v304_v61 = vpop.f32.mrb[6].mxu0 }
 0x227   :  { %v354_v62 = vpack.c.bf16 %v302_v59, %v302_v59  ;;  %v305_v63 = vadd.f32 %v344_v57, %v304_v61  ;;  %v388_v0 = vpop.f32.mrb[7].mxu0 }
 0x229   :  { %316 = vst.msk [vmem:[%s548_s11] sm:$0xf] %vm167_vm2, %v354_v62  ;;  %v355_v1 = vpack.c.bf16 %v305_v63, %v305_v63 }
 0x22b   :  { %317 = vst.msk [vmem:[%s548_s11 + $0x4] sm:$0xf] %vm167_vm2, %v355_v1 }

// kernel: decoder_layer.11
= control target key start
LH: loop header
LB: loop body
LE: loop exit
PB: predicated region body
PF: predicated region fallthrough
CT: control target
= control target key end

     0   :  { %10 = vsyncpa [#allocation4], 0  ;;  %s349_s0 = inlined_call_operand.vmem [shape: f32[16,32], index: 0, kind: input, shape index: {}]   ;;  %s350_s1 = inlined_call_operand.hbm [shape: f32[1,32], index: 1, kind: input, shape index: {}]   ;;  %s351_s2 = inlined_call_operand.hbm [shape: f32[1,32], index: 2, kind: input, shape index: {}]   ;;  %s352_s3 = inlined_call_operand.vmem [shape: bf16[32,32], index: 3, kind: input, shape index: {}]   ;;  %s353_s4 = inlined_call_operand.vmem [shape: f32[1,32], index: 4, kind: input, shape index: {}]   ;;  %s354_s5 = inlined_call_operand.vmem [shape: bf16[16,32], index: 5, kind: output, shape index: {}]  }
   0x1   :  { %11 = vsyncpa [#allocation6], 0  ;;  %s264_s18 = smov [#allocation3]   ;;  %s265_s20 = smov [#allocation5]  }
   0x2   :  { %s20_s19 = sshll.u32 %s264_s18, 4  ;;  %s30_s21 = sshll.u32 %s265_s20, 4  ;;  %s21_s19 = int_to_ptr.vmem [resolvable:$true] %s20_s19  ;;  %s31_s21 = int_to_ptr.vmem [resolvable:$true] %s30_s21 }
   0x3   :  { %s216_s24 = scalar_lea.hbm %s350_s1, 16 }
   0x4   :  { %p217_p0 = scmp.ne.s32.totalorder %s350_s1, %s216_s24  ;;  %p220_p1 = scmp.lt.u32.totalorder %s216_s24, %s350_s1 }
   0x6   :  { %p222_p2 = pnand %p220_p1, %p217_p0 }
   0x8   :  { %225 = shalt.err (!%p222_p2)
}
   0x9   :  { %s226_s29 = scalar_lea.vmem %s21_s19, 16  ;;  %s230_s30 = scalar_lea.vmem %s21_s19, 32 }
   0xa   :  { %p227_p3 = scmp.ne.s32.totalorder %s21_s19, %s226_s29  ;;  %p231_p4 = scmp.lt.s32.totalorder %s21_s19, %s21_s19 }
   0xb   :  { %p232_p5 = scmp.lt.s32.totalorder %s230_s30, %s226_s29 }
   0xd   :  { %p233_p6 = por %p232_p5, %p231_p4 }
   0xf   :  { %p234_p7 = pnand %p233_p6, %p227_p3 }
  0x11   :  { %237 = shalt.err (!%p234_p7)
}
  0x12   :  { %23 = dma.hbm_to_vmem [thread:$0]  %s350_s1, 16, %s21_s19, [#allocation4]  }
  0x13   :  { %s238_s10 = scalar_lea.hbm %s351_s2, 16 }
  0x14   :  { %p239_p8 = scmp.ne.s32.totalorder %s351_s2, %s238_s10  ;;  %p242_p9 = scmp.lt.u32.totalorder %s238_s10, %s351_s2 }
  0x16   :  { %p244_p10 = pnand %p242_p9, %p239_p8 }
  0x18   :  { %247 = shalt.err (!%p244_p10)
}
  0x19   :  { %s248_s15 = scalar_lea.vmem %s31_s21, 16  ;;  %s252_s16 = scalar_lea.vmem %s31_s21, 32 }
  0x1a   :  { %p249_p11 = scmp.ne.s32.totalorder %s31_s21, %s248_s15  ;;  %p253_p12 = scmp.lt.s32.totalorder %s31_s21, %s31_s21 }
  0x1b   :  { %p254_p13 = scmp.lt.s32.totalorder %s252_s16, %s248_s15 }
  0x1d   :  { %p255_p0 = por %p254_p13, %p253_p12 }
  0x1f   :  { %p256_p1 = pnand %p255_p0, %p249_p11 }
  0x21   :  { %259 = shalt.err (!%p256_p1)
}
  0x22   :  { %33 = dma.hbm_to_vmem [thread:$0]  %s351_s2, 16, %s31_s21, [#allocation6]  }
  0x23   :  { %260 = dma.done.wait [#allocation4], 16  }
  0x24   :  { %261 = vsyncadd [#allocation4], 4294967280 }
  0x25   :  { %262 = dma.done.wait [#allocation6], 16  }
  0x26   :  { %263 = vsyncadd [#allocation6], 4294967280  ;;  %vm51_vm0 = vcmask 261120   ;;  %v49_v0 = vld [vmem:[%s349_s0] sm:$0xff]  ;;  %v50_v1 = vld [vmem:[%s349_s0 + $0x8] sm:$0xff]  ;;  %v266_v15 = vmov 0.0  }
  0x27   :  { %v52_v2 = vsel %vm51_vm0, %v49_v0, 0.0  ;;  %v55_v3 = vsel %vm51_vm0, %v50_v1, 0.0  ;;  %v210_v14 = vld [vmem:[%s352_s3] sm:$0xff]   ;;  %198 = vmatprep.subr.bf16.mxu0 %v266_v15  ;;  %v211_v16 = vld [vmem:[%s352_s3 + $0x8] sm:$0xff]   ;;  %vm267_vm1 = vmmov 0   ;;  %vm176_vm2 = vcmask 257024  }
  0x28   :  { %53 = vadd.xlane.f32.xlu0 %v52_v2  ;;  %199 = vmatpush3.bf16.msra.mxu0 %v210_v14  ;;  %v185_v25 = vld [vmem:[#allocation3] ss:$0 sm:$0xff]  ;;  %v186_v29 = vld [vmem:[#allocation5] ss:$0 sm:$0xff]  ;;  %v187_v35 = vld [vmem:[%s353_s4] ss:$0 sm:$0xff] }
  0x29   :  { %202 = vmatprep.mubr.msk.bf16.mxu0 %vm267_vm1, %v266_v15  ;;  %200 = vmatprep.subr.bf16.mxu0 %v266_v15 }
  0x2c   :  { %56 = vadd.xlane.f32.xlu0 %v55_v3  ;;  %201 = vmatpush3.bf16.msra.mxu0 %v211_v16 }
  0xb5   :  { %v54_v4 = vpop.xlane.xlu0 %53 }
  0xb6   :  { %v59_v5 = vmul.f32 0.03125, %v54_v4 }
  0xb8   :  { %v61_v6 = vsub.f32 %v49_v0, %v59_v5 }
  0xb9   :  { %v57_v7 = vpop.xlane.xlu0 %56 }
  0xba   :  { %v60_v8 = vmul.f32 0.03125, %v57_v7  ;;  %v63_v9 = vmul.f32 %v61_v6, %v61_v6 }
  0xbc   :  { %v62_v10 = vsub.f32 %v50_v1, %v60_v8  ;;  %v65_v11 = vsel %vm51_vm0, %v63_v9, 0.0 }
  0xbd   :  { %66 = vadd.xlane.f32.xlu1 %v65_v11 }
  0xbe   :  { %v64_v12 = vmul.f32 %v62_v10, %v62_v10 }
  0xc0   :  { %v68_v13 = vsel %vm51_vm0, %v64_v12, 0.0 }
  0xc1   :  { %69 = vadd.xlane.f32.xlu1 %v68_v13 }
 0x14a   :  { %v67_v17 = vpop.xlane.xlu1 %66 }
 0x14b   :  { %v71_v18 = vmul.f32 0.03125, %v67_v17 }
 0x14d   :  { %v73_v19 = vadd.f32 1e-05, %v71_v18 }
 0x14e   :  { %v70_v20 = vpop.xlane.xlu1 %69 }
 0x14f   :  { %212 = vrsqrt.f32 %v73_v19  ;;  %v72_v21 = vmul.f32 0.03125, %v70_v20 }
 0x151   :  { %v74_v22 = vadd.f32 1e-05, %v72_v21 }
 0x153   :  { %214 = vrsqrt.f32 %v74_v22 }
 0x159   :  { %v213_v23 = vpop.eup %212 }
 0x15a   :  { %v77_v24 = vmul.f32 %v213_v23, %v61_v6 }
 0x15c   :  { %v86_v27 = vmul.f32 %v185_v25, %v77_v24 }
 0x15d   :  { %v215_v26 = vpop.eup %214 }
 0x15e   :  { %v78_v28 = vmul.f32 %v215_v26, %v62_v10  ;;  %v95_v31 = vadd.f32 %v186_v29, %v86_v27 }
 0x160   :  { %v87_v30 = vmul.f32 %v185_v25, %v78_v28 }
 0x162   :  { %v96_v32 = vadd.f32 %v186_v29, %v87_v30 }
 0x164   :  { %v97_v33 = vpack.c.bf16 %v96_v32, %v95_v31 }
 0x166   :  { %98 = vst.msk [vmem:[#allocation2] sm:$0xff] %vm51_vm0, %v97_v33 }
 0x16d   :  { %v99_v34 = vld [vmem:[#allocation2] sm:$0xff] }
 0x16e   :  { %203 = vmatmul.mubr.msk.bf16.vlgmr.msra.gmra.mrb[0].mxu0 %vm51_vm0, %v99_v34 }
 0x241   :  { %v161_v36 = vpop.f32.mrb[0].mxu0 }
 0x242   :  { %v162_v37 = vadd.f32 %v187_v35, %v161_v36  ;;  %v204_v38 = vpop.f32.mrb[1].mxu0 }
 0x243   :  { %v164_v39 = vpop.f32.mrb[2].mxu0 }
 0x244   :  { %v193_v40 = vpack.c.bf16 %v162_v37, %v162_v37  ;;  %v165_v41 = vadd.f32 %v187_v35, %v164_v39  ;;  %v205_v42 = vpop.f32.mrb[3].mxu0 }
 0x246   :  { %177 = vst.msk [vmem:[%s354_s5] sm:$0xf] %vm176_vm2, %v193_v40  ;;  %v194_v43 = vpack.c.bf16 %v165_v41, %v165_v41 }
 0x248   :  { %178 = vst.msk [vmem:[%s354_s5 + $0x4] sm:$0xf] %vm176_vm2, %v194_v43 }
 0x249   :  { %183 = vsyncpa [#allocation4], 1 }
 0x24a   :  { %184 = vsyncpa [#allocation6], 1 }

// kernel: decoder_layer.14
= control target key start
LH: loop header
LB: loop body
LE: loop exit
PB: predicated region body
PF: predicated region fallthrough
CT: control target
= control target key end

     0   :  { %v132_v0 = vmov 0.0   ;;  %vm133_vm0 = vmmov 0   ;;  %vm30_vm1 = vcmask 261120   ;;  %s187_s1 = inlined_call_operand.vmem [shape: bf16[32,32], index: 1, kind: input, shape index: {}]   ;;  %s188_s0 = inlined_call_operand.vmem [shape: bf16[16,32], index: 0, kind: input, shape index: {}]   ;;  %s189_s2 = inlined_call_operand.vmem [shape: f32[1,32], index: 2, kind: input, shape index: {}]   ;;  %s190_s3 = inlined_call_operand.vmem [shape: f32[16,32], index: 3, kind: input, shape index: {}]   ;;  %s191_s4 = inlined_call_operand.vmem [shape: f32[16,32], index: 4, kind: output, shape index: {}]  }
   0x1   :  { %119 = vmatprep.subr.bf16.mxu0 %v132_v0  ;;  %v129_v1 = vld [vmem:[%s187_s1] sm:$0xff]   ;;  %123 = vmatprep.mubr.msk.bf16.mxu0 %vm133_vm0, %v132_v0  ;;  %v130_v2 = vld [vmem:[%s187_s1 + $0x8] sm:$0xff]  }
   0x2   :  { %120 = vmatpush3.bf16.msra.mxu0 %v129_v1  ;;  %v131_v3 = vld [vmem:[%s188_s0] sm:$0xff]   ;;  %v102_v11 = vld [vmem:[%s190_s3 + $0x8] sm:$0xff] }
   0x3   :  { %121 = vmatprep.subr.bf16.mxu0 %v132_v0  ;;  %31 = vst.msk [vmem:[#allocation2] sm:$0xff] %vm30_vm1, %v131_v3  ;;  %v112_v5 = vld [vmem:[%s189_s2] ss:$0 sm:$0xff] }
   0x4   :  { %v101_v7 = vld [vmem:[%s190_s3] sm:$0xff] }
   0x6   :  { %122 = vmatpush3.bf16.msra.mxu0 %v130_v2 }
   0xa   :  { %v32_v4 = vld [vmem:[#allocation2] sm:$0xff] }
   0xb   :  { %124 = vmatmul.mubr.msk.bf16.vlgmr.msra.gmra.mrb[0].mxu0 %vm30_vm1, %v32_v4 }
  0xde   :  { %v94_v6 = vpop.f32.mrb[0].mxu0 }
  0xdf   :  { %v95_v8 = vadd.f32 %v112_v5, %v94_v6  ;;  %v125_v9 = vpop.f32.mrb[1].mxu0 }
  0xe0   :  { %v97_v10 = vpop.f32.mrb[2].mxu0 }
  0xe1   :  { %v103_v12 = vadd.f32 %v101_v7, %v95_v8  ;;  %v98_v13 = vadd.f32 %v112_v5, %v97_v10  ;;  %v126_v14 = vpop.f32.mrb[3].mxu0 }
  0xe3   :  { %105 = vst.msk [vmem:[%s191_s4] sm:$0xff] %vm30_vm1, %v103_v12  ;;  %v104_v15 = vadd.f32 %v102_v11, %v98_v13 }
  0xe5   :  { %106 = vst.msk [vmem:[%s191_s4 + $0x8] sm:$0xff] %vm30_vm1, %v104_v15 }

// kernel: decoder_layer.9
= control target key start
LH: loop header
LB: loop body
LE: loop exit
PB: predicated region body
PF: predicated region fallthrough
CT: control target
= control target key end

     0   :  { %s1289_s15 = smov 0   ;;  %s1291_s16 = smov 0   ;;  %s1463_s0 = inlined_call_operand.vmem [shape: bf16[2,8,32], index: 0, kind: input, shape index: {}]   ;;  %s1464_s1 = inlined_call_operand.vmem [shape: bf16[2,8,32], index: 1, kind: input, shape index: {}]   ;;  %s1465_s2 = inlined_call_operand.vmem [shape: bf16[2,8,32], index: 2, kind: input, shape index: {}]   ;;  %s1466_s3 = inlined_call_operand.vmem [shape: f32[2,8,8], index: 3, kind: input, shape index: {}]   ;;  %s1467_s4 = inlined_call_operand.vmem [shape: bf16[2,8,32], index: 4, kind: output, shape index: {}]  }
   0x1   :  { %s1293_s17 = smov 0  }
   0x2 LB: > { %s33_s18 = sadd.s32 1, %s1248_s16  ;;  %p1085_p0 = scmp.ge.s32.totalorder %s1252_s17, 1  ;;  %s1252_s17 = sphi %s1293_s17, %s14_s17   ;;  %s1248_s16 = sphi %s1291_s16, %s1469_s16   ;;  %s1244_s15 = sphi %s1289_s15, %s1468_s15  }
   0x3   : > { %p35_p1 = scmp.ge.s32.totalorder %s33_s18, 2  ;;  %p234_p2 = scmp.lt.s32.totalorder %s1252_s17, 3 }
   0x5   : > { %s1471_s18 = smov (%p35_p1, %s33_s18), 0  ;;  %p235_p3 = pnand %p1085_p0, %p234_p2 }
   0x6   : > { %p288_p4 = scmp.lt.s32.totalorder (!%p235_p3), %s1244_s15, 1  ;;  %vm340_vm0 = vcmask (!%p235_p3), 64512   ;;  %v1254_v0 = vmov (!%p235_p3), 0.0   ;;  %vm1255_vm1 = vmmov (!%p235_p3), 0   ;;  %vm331_vm2 = vcmask (!%p235_p3), 7168   ;;  %s1258_s30 = smov (!%p235_p3), 120  }
   0x7   : > { %238 = sbr.rel (%p235_p3) target bundleno = 1467 (0x5bb), region = 36  ;;  %1120 = vmatprep.subr.bf16.mxu0 (!%p235_p3), %v1254_v0  ;;  %341 = vst.msk [vmem:[#allocation4] sm:$0xff] (!%p235_p3), %vm340_vm0, %v1254_v0  ;;  %342 = vst.msk [vmem:[#allocation4 + $0x8] sm:$0xff] (!%p235_p3), %vm340_vm0, %v1254_v0  ;;  %1122 = vmatprep.mubr.msk.bf16.mxu0 (!%p235_p3), %vm1255_vm1, %v1254_v0  ;;  %v1256_v4 = vmov (!%p235_p3), -inf   ;;  %v1257_v12 = vmov (!%p235_p3), 0   ;;  %s1259_s5 = smov (!%p235_p3), 112  }
   0x8   : > { %343 = vst.msk [vmem:[#allocation4 + $0x10] sm:$0xff] (!%p235_p3), %vm340_vm0, %v1254_v0  ;;  %344 = vst.msk [vmem:[#allocation4 + $0x18] sm:$0xff] (!%p235_p3), %vm340_vm0, %v1254_v0  ;;  %1126 = vmatprep.subr.bf16.mxu1 (!%p235_p3), %v1254_v0  ;;  %1128 = vmatprep.mubr.msk.bf16.mxu1 (!%p235_p3), %vm1255_vm1, %v1254_v0  ;;  %s1260_s6 = smov (!%p235_p3), 104   ;;  %vm426_vm4 = vcmask (!%p235_p3), 1043456   ;;  %s1261_s10 = smov (!%p235_p3), 8   ;;  %vm949_vm5 = vcmask (!%p235_p3), 130048  }
   0x9   : > { %332 = vst.msk [vmem:[#allocation2] sm:$0xff] (!%p235_p3), %vm331_vm2, %v1256_v4  ;;  %333 = vst.msk [vmem:[#allocation2 + $0x8] sm:$0xff] (!%p235_p3), %vm331_vm2, %v1256_v4  ;;  %1202 = vset.pattern.permute.xlu0 (!%p235_p3), %v1257_v12  ;;  %1203 = vset.pattern.permute.xlu1 (!%p235_p3), %v1257_v12  ;;  %s1262_s11 = smov (!%p235_p3), 16   ;;  %s1263_s12 = smov (!%p235_p3), 24   ;;  %vm951_vm6 = vcmask (!%p235_p3), 195584   ;;  %vm954_vm7 = vcmask (!%p235_p3), 257024  }
   0xa   : > { %334 = vst.msk [vmem:[#allocation2 + $0x10] sm:$0xff] (!%p235_p3), %vm331_vm2, %v1256_v4  ;;  %335 = vst.msk [vmem:[#allocation2 + $0x18] sm:$0xff] (!%p235_p3), %vm331_vm2, %v1256_v4 }
   0xb   : > { %336 = vst.msk [vmem:[#allocation3] sm:$0xff] (!%p235_p3), %vm331_vm2, %v1254_v0  ;;  %337 = vst.msk [vmem:[#allocation3 + $0x8] sm:$0xff] (!%p235_p3), %vm331_vm2, %v1254_v0 }
   0xc   : > { %338 = vst.msk [vmem:[#allocation3 + $0x10] sm:$0xff] (!%p235_p3), %vm331_vm2, %v1254_v0  ;;  %339 = vst.msk [vmem:[#allocation3 + $0x18] sm:$0xff] (!%p235_p3), %vm331_vm2, %v1254_v0 }
   0xe   : > { %s1473_s15 = smov (!%p288_p4, %s1244_s15), 1 }
   0xf   : > { %s1321_s19 = sshll.u32 %s1473_s15, 2  ;;  %s1089_s26 = sshll.u32 %s1473_s15, 3 }
  0x10   : > { %s301_s22 = scalar_lea.vmem %s1464_s1, %s1321_s19  ;;  %s294_s25 = scalar_lea.vmem %s1463_s0, %s1321_s19  ;;  %v1363_v15 = vld [vmem:[#allocation2] sm:$0xff]  ;;  %v538_v57 = vld [vmem:[#allocation2 + $0x8] sm:$0xff] }
  0x11   : > { %v346_v1 = vld [vmem:[%s301_s22] sm:$0xf]  ;;  %s318_s29 = scalar_lea.vmem %s1466_s3, %s1089_s26  ;;  %s308_s9 = scalar_lea.vmem %s1465_s2, %s1321_s19  ;;  %v677_v61 = vld [vmem:[#allocation2 + $0x10] sm:$0xff] }
  0x12   : > { %v354_v2 = vsel %vm340_vm0, %v346_v1, 0  ;;  %v345_v3 = vld [vmem:[%s294_s25] sm:$0xf]  ;;  %v1094_v13 = vcombine.low %v346_v1, %v346_v1  ;;  %s325_s15 = scalar_lea.vmem %s1467_s4, %s1321_s19 }
  0x13   : > { %1121 = vmatpush3.bf16.xpose.msra.mxu0 %v354_v2  ;;  %v1351_v5 = vld [vmem:[%s318_s29] sm:$0xff]  ;;  %v1093_v14 = vcombine.low %v345_v3, %v345_v3  ;;  %v813_v2 = vld [vmem:[#allocation2 + $0x18] sm:$0xff] }
  0x14   : > { %1138 = vmatprep.subr.bf16.mxu0 %v1254_v0  ;;  %vm396_vm3 = vcmp.eq.f32.partialorder %v1351_v5, 0.0  ;;  %488 = vrot.lane.b32.xlu1 %v1094_v13, %s1258_s30  ;;  %v1377_v19 = vld [vmem:[%s308_s9] sm:$0xf] }
  0x15   : > { %v428_v20 = vsel %vm426_vm4, %v1377_v19, 0  ;;  %v1096_v5 = vcombine.low %v1377_v19, %v1377_v19 }
  0x16   : > { %1127 = vmatpush3.bf16.msra.mxu1 %v428_v20 }
  0x17   : > { %1132 = vmatprep.subr.bf16.mxu1 %v1254_v0 }
  0x18   : > { %483 = vrot.lane.b32.xlu1 %v1093_v14, %s1258_s30 }
  0x1a   : > { %1123 = vmatmul.mubr.msk.bf16.vlgmr.msra.gmra.mrb[0].mxu0 %vm340_vm0, %v345_v3 }
  0x1b   : > { %1140 = vmatprep.mubr.msk.bf16.mxu0 %vm1255_vm1, %v1254_v0 }
  0x1c   : > { %627 = vrot.lane.b32.xlu1 %v1094_v13, %s1259_s5 }
  0x20   : > { %625 = vrot.lane.b32.xlu1 %v1093_v14, %s1259_s5 }
  0x24   : > { %763 = vrot.lane.b32.xlu1 %v1094_v13, %s1260_s6 }
  0x28   : > { %761 = vrot.lane.b32.xlu1 %v1093_v14, %s1260_s6 }
  0x86   : > { %v489_v24 = vpop.permute.xlu1 %488 }
  0x87   : > { %v494_v27 = vsel %vm340_vm0, %v489_v24, 0 }
  0x8a   : > { %v484_v25 = vpop.permute.xlu1 %483 }
  0x8e   : > { %v628_v29 = vpop.permute.xlu1 %627 }
  0x8f   : > { %v633_v31 = vsel %vm340_vm0, %v628_v29, 0 }
  0x92   : > { %v626_v30 = vpop.permute.xlu1 %625 }
  0x96   : > { %v764_v32 = vpop.permute.xlu1 %763 }
  0x97   : > { %v769_v33 = vsel %vm340_vm0, %v764_v32, 0 }
  0x9a   : > { %v762_v34 = vpop.permute.xlu1 %761 }
  0xed   : > { %v390_v6 = vpop.f32.mrb[0].mxu0 }
  0xee   : > { %v397_v7 = vsel %vm396_vm3, -1e+09, %v390_v6  ;;  %v1124_v8 = vpop.f32.mrb[1].mxu0 }
  0xef   : > { %v393_v9 = vpop.f32.mrb[2].mxu0  ;;  %v399_v10 = vsel %vm340_vm0, %v397_v7, -inf }
  0xf0   : > { %400 = vmax.xlane.f32.xlu0 %v399_v10  ;;  %v1125_v11 = vpop.f32.mrb[3].mxu0 }
 0x17d   : > { %v401_v16 = vpop.xlane.xlu0 %400 }
 0x17e   : > { %v1366_v17 = vmax.f32 %v1363_v15, %v401_v16 }
 0x180   : > { %v403_v18 = vsub.f32 %v1363_v15, %v1366_v17  ;;  %479 = vst.msk [vmem:[#allocation2] sm:$0xff] %vm331_vm2, %v1366_v17  ;;  %408 = vperm.xlu0 %1202, %v1366_v17  }
 0x1ff   : > { %v409_v21 = vpop.permute.xlu0 %408 }
 0x200   : > { %v411_v22 = vsub.f32 %v397_v7, %v409_v21 }
 0x202   : > { %v412_v23 = vmul.f32 1.442695, %v411_v22 }
 0x204   : > { %1206 = vpow2.f32 %v412_v23 }
 0x20e   : > { %v1382_v26 = vpop.eup %1206 }
 0x20f   : > { %v422_v28 = vpack.c.bf16 %v1382_v26, %v1382_v26  ;;  %v416_v22 = vsel %vm340_vm0, %v1382_v26, 0.0 }
 0x211   : > { %1129 = vmatmul.mubr.msk.bf16.vlgmr.msra.gmra.mrb[0].mxu1 %vm340_vm0, %v422_v28 }
 0x212   : > { %1133 = vmatpush3.bf16.xpose.msra.mxu1 %v494_v27  ;;  %1134 = vmatprep.mubr.msk.bf16.mxu1 %vm1255_vm1, %v1254_v0 }
 0x213   : > { %1144 = vmatprep.subr.bf16.mxu1 %v1254_v0 }
 0x219   : > { %1135 = vmatmul.mubr.msk.bf16.vlgmr.msra.gmra.mrb[4].mxu1 %vm340_vm0, %v484_v25 }
 0x21a   : > { %1145 = vmatpush3.bf16.xpose.msra.mxu1 %v633_v31  ;;  %1146 = vmatprep.mubr.msk.bf16.mxu1 %vm1255_vm1, %v1254_v0 }
 0x21b   : > { %1156 = vmatprep.subr.bf16.mxu1 %v1254_v0 }
 0x221   : > { %1147 = vmatmul.mubr.msk.bf16.vlgmr.msra.gmra.mrb[8].mxu1 %vm340_vm0, %v626_v30 }
 0x222   : > { %1157 = vmatpush3.bf16.xpose.msra.mxu1 %v769_v33  ;;  %1158 = vmatprep.mubr.msk.bf16.mxu1 %vm1255_vm1, %v1254_v0 }
 0x229   : > { %1159 = vmatmul.mubr.msk.bf16.vlgmr.msra.gmra.mrb[12].mxu1 %vm340_vm0, %v762_v34 }
 0x2e4   : > { %v1401_v35 = vpop.f32.mrb[0].mxu1 }
 0x2e5   : > { %v1130_v36 = vpop.f32.mrb[1].mxu1 }
 0x2e6   : > { %v467_v37 = vpop.f32.mrb[2].mxu1 }
 0x2e7   : > { %v1131_v38 = vpop.f32.mrb[3].mxu1 }
 0x2ec   : > { %v530_v39 = vpop.f32.mrb[4].mxu1 }
 0x2ed   : > { %v536_v40 = vsel %vm396_vm3, -1e+09, %v530_v39  ;;  %v1136_v41 = vpop.f32.mrb[5].mxu1  ;;  %v404_v39 = vmul.f32 1.442695, %v403_v18  ;;  %v694_v18 = vld [vmem:[#allocation3 + $0x10] sm:$0xff] }
 0x2ee   : > { %v533_v42 = vpop.f32.mrb[6].mxu1  ;;  %v539_v43 = vsel %vm340_vm0, %v536_v40, -inf }
 0x2ef   : > { %540 = vmax.xlane.f32.xlu1 %v539_v43  ;;  %v1137_v44 = vpop.f32.mrb[7].mxu1 }
 0x2f0   : > { %v555_v44 = vld [vmem:[#allocation3 + $0x8] sm:$0xff] }
 0x2f4   : > { %v669_v45 = vpop.f32.mrb[8].mxu1 }
 0x2f5   : > { %v675_v46 = vsel %vm396_vm3, -1e+09, %v669_v45  ;;  %v1148_v47 = vpop.f32.mrb[9].mxu1 }
 0x2f6   : > { %v672_v48 = vpop.f32.mrb[10].mxu1  ;;  %v678_v49 = vsel %vm340_vm0, %v675_v46, -inf }
 0x2f7   : > { %679 = vmax.xlane.f32.xlu0 %v678_v49  ;;  %v1149_v50 = vpop.f32.mrb[11].mxu1 }
 0x2fc   : > { %v805_v51 = vpop.f32.mrb[12].mxu1 }
 0x2fd   : > { %v811_v52 = vsel %vm396_vm3, -1e+09, %v805_v51  ;;  %v1160_v53 = vpop.f32.mrb[13].mxu1 }
 0x2fe   : > { %v808_v54 = vpop.f32.mrb[14].mxu1  ;;  %v814_v55 = vsel %vm340_vm0, %v811_v52, -inf  ;;  %v830_v53 = vld [vmem:[#allocation3 + $0x18] sm:$0xff] }
 0x2ff   : > { %815 = vmax.xlane.f32.xlu1 %v814_v55  ;;  %v1161_v56 = vpop.f32.mrb[15].mxu1 }
 0x37c   : > { %v541_v58 = vpop.xlane.xlu1 %540 }
 0x37d   : > { %v542_v59 = vmax.f32 %v538_v57, %v541_v58 }
 0x37f   : > { %v543_v60 = vsub.f32 %v538_v57, %v542_v59  ;;  %624 = vst.msk [vmem:[#allocation2 + $0x8] sm:$0xff] %vm331_vm2, %v542_v59  ;;  %548 = vperm.xlu1 %1203, %v542_v59  }
 0x381   : > { %v544_v25 = vmul.f32 1.442695, %v543_v60  ;;  %v470_v60 = vld [vmem:[#allocation4] sm:$0xff] }
 0x384   : > { %v680_v62 = vpop.xlane.xlu0 %679 }
 0x385   : > { %v681_v63 = vmax.f32 %v677_v61, %v680_v62 }
 0x387   : > { %v682_v1 = vsub.f32 %v677_v61, %v681_v63  ;;  %760 = vst.msk [vmem:[#allocation2 + $0x10] sm:$0xff] %vm331_vm2, %v681_v63  ;;  %687 = vperm.xlu0 %1202, %v681_v63  }
 0x389   : > { %v683_v26 = vmul.f32 1.442695, %v682_v1 }
 0x38c   : > { %v816_v3 = vpop.xlane.xlu1 %815 }
 0x38d   : > { %v817_v4 = vmax.f32 %v813_v2, %v816_v3 }
 0x38f   : > { %v818_v6 = vsub.f32 %v813_v2, %v817_v4  ;;  %896 = vst.msk [vmem:[#allocation2 + $0x18] sm:$0xff] %vm331_vm2, %v817_v4  ;;  %823 = vperm.xlu1 %1203, %v817_v4  }
 0x391   : > { %v819_v41 = vmul.f32 1.442695, %v818_v6 }
 0x393   : > { %566 = vrot.lane.b32.xlu1 %v1096_v5, %s1258_s30 }
 0x397   : > { %702 = vrot.lane.b32.xlu1 %v1096_v5, %s1259_s5 }
 0x39b   : > { %838 = vrot.lane.b32.xlu1 %v1096_v5, %s1260_s6  ;;  %v615_v5 = vld [vmem:[#allocation4 + $0x8] sm:$0xff] }
 0x3fe   : > { %v549_v7 = vpop.permute.xlu1 %548 }
 0x3ff   : > { %v551_v8 = vsub.f32 %v536_v40, %v549_v7 }
 0x401   : > { %v552_v9 = vmul.f32 1.442695, %v551_v8 }
 0x403   : > { %1208 = vpow2.f32 %v552_v9 }
 0x406   : > { %v688_v10 = vpop.permute.xlu0 %687 }
 0x407   : > { %v690_v11 = vsub.f32 %v675_v46, %v688_v10  ;;  %v414_v46 = vld [vmem:[#allocation3] sm:$0xff] }
 0x409   : > { %v691_v12 = vmul.f32 1.442695, %v690_v11 }
 0x40b   : > { %1210 = vpow2.f32 %v691_v12 }
 0x40d   : > { %v1209_v13 = vpop.eup %1208 }
 0x40e   : > { %v824_v14 = vpop.permute.xlu1 %823  ;;  %v557_v16 = vsel %vm340_vm0, %v1209_v13, 0.0  ;;  %v562_v27 = vpack.c.bf16 %v1209_v13, %v1209_v13  ;;  %v751_v13 = vld [vmem:[#allocation4 + $0x10] sm:$0xff] }
 0x40f   : > { %v826_v19 = vsub.f32 %v811_v52, %v824_v14  ;;  %558 = vadd.xlane.f32.xlu1 %v557_v16 }
 0x411   : > { %v827_v20 = vmul.f32 1.442695, %v826_v19 }
 0x412   : > { %v567_v21 = vpop.permute.xlu1 %566 }
 0x413   : > { %1212 = vpow2.f32 %v827_v20  ;;  %v572_v23 = vsel %vm426_vm4, %v567_v21, 0  ;;  %417 = vadd.xlane.f32.xlu1 %v416_v22 }
 0x414   : > { %1139 = vmatpush3.bf16.msra.mxu0 %v572_v23  ;;  %1214 = vpow2.f32 %v544_v25  ;;  %v887_v23 = vld [vmem:[#allocation4 + $0x18] sm:$0xff] }
 0x415   : > { %v1211_v24 = vpop.eup %1210  ;;  %1150 = vmatprep.subr.bf16.mxu0 %v1254_v0  ;;  %1216 = vpow2.f32 %v683_v26 }
 0x416   : > { %v696_v28 = vsel %vm340_vm0, %v1211_v24, 0.0  ;;  %v703_v29 = vpop.permute.xlu1 %702  ;;  %v701_v33 = vpack.c.bf16 %v1211_v24, %v1211_v24  ;;  %1218 = vpow2.f32 %v404_v39 }
 0x417   : > { %697 = vadd.xlane.f32.xlu0 %v696_v28  ;;  %1141 = vmatmul.mubr.msk.bf16.vlgmr.msra.gmra.mrb[4].mxu0 %vm340_vm0, %v562_v27  ;;  %v708_v30 = vsel %vm426_vm4, %v703_v29, 0  ;;  %1220 = vpow2.f32 %v819_v41 }
 0x418   : > { %1151 = vmatpush3.bf16.msra.mxu0 %v708_v30  ;;  %1152 = vmatprep.mubr.msk.bf16.mxu0 %vm1255_vm1, %v1254_v0 }
 0x419   : > { %1162 = vmatprep.subr.bf16.mxu0 %v1254_v0 }
 0x41a   : > { %v839_v31 = vpop.permute.xlu1 %838 }
 0x41b   : > { %v844_v34 = vsel %vm426_vm4, %v839_v31, 0 }
 0x41d   : > { %v1213_v32 = vpop.eup %1212 }
 0x41e   : > { %v832_v36 = vsel %vm340_vm0, %v1213_v32, 0.0  ;;  %v1215_v37 = vpop.eup %1214  ;;  %v837_v38 = vpack.c.bf16 %v1213_v32, %v1213_v32 }
 0x41f   : > { %833 = vadd.xlane.f32.xlu0 %v832_v36  ;;  %1153 = vmatmul.mubr.msk.bf16.vlgmr.msra.gmra.mrb[8].mxu0 %vm340_vm0, %v701_v33  ;;  %v1217_v40 = vpop.eup %1216 }
 0x420   : > { %1163 = vmatpush3.bf16.msra.mxu0 %v844_v34  ;;  %1164 = vmatprep.mubr.msk.bf16.mxu0 %vm1255_vm1, %v1254_v0  ;;  %v1219_v42 = vpop.eup %1218  ;;  %v556_v0 = vmul.f32 %v1215_v37, %v555_v44  ;;  %v695_v49 = vmul.f32 %v1217_v40, %v694_v18 }
 0x421   : > { %v1221_v43 = vpop.eup %1220  ;;  %v415_v15 = vmul.f32 %v1219_v42, %v414_v46 }
 0x422   : > { %v831_v55 = vmul.f32 %v1221_v43, %v830_v53 }
 0x424   : > { %618 = vperm.xlu1 %1203, %v1215_v37  }
 0x427   : > { %1165 = vmatmul.mubr.msk.bf16.vlgmr.msra.gmra.mrb[12].mxu0 %vm340_vm0, %v837_v38 }
 0x428   : > { %754 = vperm.xlu1 %1203, %v1217_v40  }
 0x435   : > { %473 = vperm.xlu0 %1202, %v1219_v42  }
 0x439   : > { %890 = vperm.xlu0 %1202, %v1221_v43  }
 0x49c   : > { %v559_v45 = vpop.xlane.xlu1 %558 }
 0x49d   : > { %v560_v47 = vadd.f32 %v559_v45, %v556_v0 }
 0x49f   : > { %561 = vst.msk [vmem:[#allocation3 + $0x8] sm:$0xff] %vm331_vm2, %v560_v47 }
 0x4a0   : > { %v418_v17 = vpop.xlane.xlu1 %417 }
 0x4a1   : > { %v419_v48 = vadd.f32 %v418_v17, %v415_v15 }
 0x4a3   : > { %421 = vst.msk [vmem:[#allocation3] sm:$0xff] %vm331_vm2, %v419_v48 }
 0x4a4   : > { %v698_v50 = vpop.xlane.xlu0 %697  ;;  %v619_v6 = vpop.permute.xlu1 %618 }
 0x4a5   : > { %v699_v51 = vadd.f32 %v698_v50, %v695_v49  ;;  %v621_v7 = vmul.f32 %v619_v6, %v615_v5 }
 0x4a6   : > { %v909_v52 = vld [vmem:[#allocation3 + $0x8] sm:$0xff] }
 0x4a7   : > { %700 = vst.msk [vmem:[#allocation3 + $0x10] sm:$0xff] %vm331_vm2, %v699_v51  ;;  %1222 = vrcp.f32 %v909_v52 }
 0x4a8   : > { %v755_v14 = vpop.permute.xlu1 %754 }
 0x4aa   : > { %v900_v54 = vld [vmem:[#allocation3] sm:$0xff] }
 0x4ab   : > { %1224 = vrcp.f32 %v900_v54 }
 0x4ac   : > { %v834_v56 = vpop.xlane.xlu0 %833 }
 0x4ad   : > { %v835_v57 = vadd.f32 %v834_v56, %v831_v55 }
 0x4ae   : > { %v918_v58 = vld [vmem:[#allocation3 + $0x10] sm:$0xff] }
 0x4af   : > { %836 = vst.msk [vmem:[#allocation3 + $0x18] sm:$0xff] %vm331_vm2, %v835_v57  ;;  %1226 = vrcp.f32 %v918_v58 }
 0x4b1   : > { %v1223_v59 = vpop.eup %1222 }
 0x4b2   : > { %914 = vperm.xlu0 %1202, %v1223_v59  }
 0x4b4   : > { %v474_v61 = vpop.permute.xlu0 %473 }
 0x4b5   : > { %v1225_v62 = vpop.eup %1224  ;;  %v476_v63 = vmul.f32 %v474_v61, %v470_v60 }
 0x4b6   : > { %905 = vperm.xlu1 %1203, %v1225_v62   ;;  %v927_v1 = vld [vmem:[#allocation3 + $0x18] sm:$0xff] }
 0x4b7   : > { %v477_v2 = vadd.f32 %v476_v63, %v1401_v35  ;;  %1228 = vrcp.f32 %v927_v1  ;;  %v757_v35 = vmul.f32 %v755_v14, %v751_v13 }
 0x4b8   : > { %v891_v24 = vpop.permute.xlu0 %890 }
 0x4b9   : > { %v1227_v3 = vpop.eup %1226  ;;  %478 = vst.msk [vmem:[#allocation4] sm:$0xff] %vm340_vm0, %v477_v2  ;;  %v893_v25 = vmul.f32 %v891_v24, %v887_v23 }
 0x4ba   : > { %923 = vperm.xlu1 %1203, %v1227_v3  }
 0x4c0   : > { %v902_v42 = vld [vmem:[#allocation4] sm:$0xff] }
 0x4c1   : > { %v1229_v4 = vpop.eup %1228 }
 0x4c2   : > { %932 = vperm.xlu0 %1202, %v1229_v4  }
 0x4ea   : > { %v608_v8 = vpop.f32.mrb[4].mxu0 }
 0x4eb   : > { %v622_v9 = vadd.f32 %v621_v7, %v608_v8  ;;  %v1142_v10 = vpop.f32.mrb[5].mxu0 }
 0x4ec   : > { %v611_v11 = vpop.f32.mrb[6].mxu0 }
 0x4ed   : > { %623 = vst.msk [vmem:[#allocation4 + $0x8] sm:$0xff] %vm340_vm0, %v622_v9  ;;  %v1143_v12 = vpop.f32.mrb[7].mxu0 }
 0x4f2   : > { %v744_v16 = vpop.f32.mrb[8].mxu0 }
 0x4f3   : > { %v758_v19 = vadd.f32 %v757_v35, %v744_v16  ;;  %v1154_v20 = vpop.f32.mrb[9].mxu0 }
 0x4f4   : > { %v747_v21 = vpop.f32.mrb[10].mxu0  ;;  %v911_v32 = vld [vmem:[#allocation4 + $0x8] sm:$0xff] }
 0x4f5   : > { %759 = vst.msk [vmem:[#allocation4 + $0x10] sm:$0xff] %vm340_vm0, %v758_v19  ;;  %v1155_v22 = vpop.f32.mrb[11].mxu0 }
 0x4fa   : > { %v880_v27 = vpop.f32.mrb[12].mxu0 }
 0x4fb   : > { %v894_v28 = vadd.f32 %v893_v25, %v880_v27  ;;  %v1166_v29 = vpop.f32.mrb[13].mxu0 }
 0x4fc   : > { %v883_v30 = vpop.f32.mrb[14].mxu0  ;;  %v920_v37 = vld [vmem:[#allocation4 + $0x10] sm:$0xff] }
 0x4fd   : > { %895 = vst.msk [vmem:[#allocation4 + $0x18] sm:$0xff] %vm340_vm0, %v894_v28  ;;  %v1167_v26 = vpop.f32.mrb[15].mxu0 }
 0x504   : > { %v929_v40 = vld [vmem:[#allocation4 + $0x18] sm:$0xff] }
 0x531   : > { %v915_v31 = vpop.permute.xlu0 %914 }
 0x532   : > { %v917_v33 = vmul.f32 %v915_v31, %v911_v32 }
 0x534   : > { %937 = vrot.lane.b32.xlu1 %v917_v33, %s1261_s10 }
 0x535   : > { %v906_v34 = vpop.permute.xlu1 %905 }
 0x536   : > { %v908_v44 = vmul.f32 %v906_v34, %v902_v42 }
 0x539   : > { %v924_v36 = vpop.permute.xlu1 %923 }
 0x53a   : > { %v926_v38 = vmul.f32 %v924_v36, %v920_v37 }
 0x53c   : > { %941 = vrot.lane.b32.xlu0 %v926_v38, %s1262_s11 }
 0x541   : > { %v933_v39 = vpop.permute.xlu0 %932 }
 0x542   : > { %v935_v41 = vmul.f32 %v933_v39, %v929_v40 }
 0x544   : > { %945 = vrot.lane.b32.xlu1 %v935_v41, %s1263_s12 }
 0x5a6   : > { %v938_v43 = vpop.permute.xlu1 %937 }
 0x5a7   : > { %v948_v45 = vsel %vm340_vm0, %v908_v44, %v938_v43 }
 0x5ae   : > { %v942_v0 = vpop.permute.xlu0 %941 }
 0x5af   : > { %v950_v46 = vsel %vm949_vm5, %v948_v45, %v942_v0 }
 0x5b6   : > { %v946_v47 = vpop.permute.xlu1 %945 }
 0x5b7   : > { %v952_v15 = vsel %vm951_vm6, %v950_v46, %v946_v47 }
 0x5b8   : > { %v953_v17 = vpack.c.bf16 %v952_v15, %v952_v15 }
 0x5ba   : > { %955 = vst.msk [vmem:[%s325_s15] sm:$0xf] %vm954_vm7, %v953_v17 }
 0x5bb PF: > { %s14_s17 = sadd.s32 1, %s1252_s17   ;;  %s1468_s15 = smov %s1248_s16 }
 0x5bc   : > { %p11_p5 = scmp.ge.s32.totalorder %s14_s17, 4   ;;  %s1469_s16 = smov %s1471_s18 }
 0x5be   :  { %13 = sbr.rel (!%p11_p5) target bundleno = 2 (0x2), region = 92 }

// kernel: decoder_layer.12
= control target key start
LH: loop header
LB: loop body
LE: loop exit
PB: predicated region body
PF: predicated region fallthrough
CT: control target
= control target key end

     0   :  { %v238_v0 = vmov 0.0   ;;  %vm239_vm0 = vmmov 0   ;;  %vm30_vm1 = vcmask 261120   ;;  %vm109_vm2 = vcmask 257024   ;;  %s311_s1 = inlined_call_operand.vmem [shape: bf16[32,32], index: 1, kind: input, shape index: {}]   ;;  %s312_s2 = inlined_call_operand.vmem [shape: bf16[32,32], index: 2, kind: input, shape index: {}]   ;;  %s313_s0 = inlined_call_operand.vmem [shape: f32[16,32], index: 0, kind: input, shape index: {}]   ;;  %s314_s3 = inlined_call_operand.vmem [shape: f32[1,32], index: 3, kind: input, shape index: {}]   ;;  %s315_s4 = inlined_call_operand.vmem [shape: f32[1,32], index: 4, kind: input, shape index: {}]   ;;  %s316_s5 = inlined_call_operand.vmem [shape: bf16[16,32], index: 5, kind: output, shape index: {0}]   ;;  %s317_s6 = inlined_call_operand.vmem [shape: bf16[16,32], index: 6, kind: output, shape index: {1}]  }
   0x1   :  { %216 = vmatprep.subr.bf16.mxu0 %v238_v0  ;;  %224 = vmatprep.subr.bf16.mxu1 %v238_v0  ;;  %v234_v1 = vld [vmem:[%s311_s1] sm:$0xff]   ;;  %v236_v3 = vld [vmem:[%s311_s1 + $0x8] sm:$0xff]  }
   0x2   :  { %v235_v2 = vld [vmem:[%s312_s2] sm:$0xff]   ;;  %220 = vmatprep.mubr.msk.bf16.mxu0 %vm239_vm0, %v238_v0  ;;  %228 = vmatprep.mubr.msk.bf16.mxu1 %vm239_vm0, %v238_v0  ;;  %v237_v4 = vld [vmem:[%s312_s2 + $0x8] sm:$0xff]  }
   0x3   :  { %217 = vmatpush3.bf16.msra.mxu0 %v234_v1  ;;  %225 = vmatpush3.bf16.msra.mxu1 %v235_v2  ;;  %v27_v5 = vld [vmem:[%s313_s0] sm:$0xff]  ;;  %v28_v6 = vld [vmem:[%s313_s0 + $0x8] sm:$0xff] }
   0x4   :  { %218 = vmatprep.subr.bf16.mxu0 %v238_v0  ;;  %226 = vmatprep.subr.bf16.mxu1 %v238_v0  ;;  %v29_v7 = vpack.c.bf16 %v28_v6, %v27_v5  ;;  %v194_v9 = vld [vmem:[%s314_s3] ss:$0 sm:$0xff] }
   0x5   :  { %v200_v10 = vld [vmem:[%s315_s4] ss:$0 sm:$0xff] }
   0x6   :  { %31 = vst.msk [vmem:[#allocation2] sm:$0xff] %vm30_vm1, %v29_v7 }
   0x7   :  { %219 = vmatpush3.bf16.msra.mxu0 %v236_v3  ;;  %227 = vmatpush3.bf16.msra.mxu1 %v237_v4 }
   0xd   :  { %v32_v8 = vld [vmem:[#allocation2] sm:$0xff] }
   0xe   :  { %221 = vmatmul.mubr.msk.bf16.vlgmr.msra.gmra.mrb[0].mxu0 %vm30_vm1, %v32_v8  ;;  %229 = vmatmul.mubr.msk.bf16.vlgmr.msra.gmra.mrb[0].mxu1 %vm30_vm1, %v32_v8 }
  0xe1   :  { %v94_v11 = vpop.f32.mrb[0].mxu0  ;;  %v169_v12 = vpop.f32.mrb[0].mxu1 }
  0xe2   :  { %v95_v13 = vadd.f32 %v194_v9, %v94_v11  ;;  %v170_v14 = vadd.f32 %v200_v10, %v169_v12  ;;  %v222_v15 = vpop.f32.mrb[1].mxu0  ;;  %v230_v16 = vpop.f32.mrb[1].mxu1 }
  0xe3   :  { %v97_v17 = vpop.f32.mrb[2].mxu0  ;;  %v172_v18 = vpop.f32.mrb[2].mxu1 }
  0xe4   :  { %v206_v19 = vpack.c.bf16 %v95_v13, %v95_v13  ;;  %v208_v20 = vpack.c.bf16 %v170_v14, %v170_v14  ;;  %v98_v21 = vadd.f32 %v194_v9, %v97_v17  ;;  %v173_v22 = vadd.f32 %v200_v10, %v172_v18  ;;  %v223_v23 = vpop.f32.mrb[3].mxu0  ;;  %v231_v24 = vpop.f32.mrb[3].mxu1 }
  0xe6   :  { %110 = vst.msk [vmem:[%s316_s5] sm:$0xf] %vm109_vm2, %v206_v19  ;;  %184 = vst.msk [vmem:[%s317_s6] sm:$0xf] %vm109_vm2, %v208_v20  ;;  %v207_v25 = vpack.c.bf16 %v98_v21, %v98_v21  ;;  %v209_v26 = vpack.c.bf16 %v173_v22, %v173_v22 }
  0xe8   :  { %111 = vst.msk [vmem:[%s316_s5 + $0x4] sm:$0xf] %vm109_vm2, %v207_v25  ;;  %185 = vst.msk [vmem:[%s317_s6 + $0x4] sm:$0xf] %vm109_vm2, %v209_v26 }

// kernel: decoder_layer.15
= control target key start
LH: loop header
LB: loop body
LE: loop exit
PB: predicated region body
PF: predicated region fallthrough
CT: control target
= control target key end

     0   :  { %12 = vsyncpa [#allocation6], 0  ;;  %s1402_s24 = smov 0   ;;  %s1404_s25 = smov 0   ;;  %s1588_s0 = inlined_call_operand.vmem [shape: f32[16,32], index: 0, kind: input, shape index: {}]   ;;  %s1589_s1 = inlined_call_operand.vmem [shape: f32[1,32], index: 1, kind: input, shape index: {}]   ;;  %s1590_s2 = inlined_call_operand.vmem [shape: f32[1,32], index: 2, kind: input, shape index: {}]   ;;  %s1591_s3 = inlined_call_operand.vmem [shape: bf16[32,2048], index: 3, kind: input, shape index: {}]   ;;  %s1592_s4 = inlined_call_operand.vmem [shape: f32[1,2048], index: 4, kind: input, shape index: {}]   ;;  %s1593_s5 = inlined_call_operand.vmem [shape: bf16[2048,32], index: 5, kind: input, shape index: {}]   ;;  %s1594_s6 = inlined_call_operand.vmem [shape: f32[1,32], index: 6, kind: input, shape index: {}]   ;;  %s1595_s7 = inlined_call_operand.hbm [shape: f32[16,32], index: 7, kind: output, shape index: {}]  }
   0x1   :  { %s1406_s26 = smov 0   ;;  %s1408_s27 = smov 0  }
   0x2   :  { %s1410_s28 = smov 0  }
   0x3 LB: > { %s1080_s29 = sadd.s32 4294967295, %s1355_s28   ;;  %s27_s30 = sadd.s32 1, %s1351_s27  ;;  %s1355_s28 = sphi %s1410_s28, %s18_s28   ;;  %s1351_s27 = sphi %s1408_s27, %s1600_s27   ;;  %s1347_s26 = sphi %s1406_s26, %s1599_s26   ;;  %s1343_s25 = sphi %s1404_s25, %s1598_s25   ;;  %s1339_s24 = sphi %s1402_s24, %s1597_s24  }
   0x4   : > { %p28_p0 = scmp.ge.s32.totalorder %s27_s30, 4  ;;  %p112_p1 = scmp.ne.s32.totalorder %s1343_s25, %s1339_s24 }
   0x5   : > { %p113_p2 = scmp.eq.s32.totalorder %s1355_s28, 0  ;;  %s105_s9 = sadd.s32 1, %s1343_s25 }
   0x6   : > { %s1602_s30 = smov (%p28_p0, %s27_s30), 0  ;;  %p1083_p5 = scmp.ge.s32.totalorder %s1355_s28, 4 }
   0x7   : > { %p114_p3 = por %p113_p2, %p112_p1  ;;  %s102_s8 = ssub.s32 %s1351_s27, %s1602_s30 }
   0x8   : > { %p103_p4 = scmp.eq.s32.totalorder %s102_s8, 0  ;;  %255 = sbr.rel (%p1083_p5) target bundleno = 23 (0x17), region = 32 }
   0xa   : > { %s1438_s10 = scalar_select %p103_p4, %s1343_s25, %s105_s9  }
   0xf   : > { %258 = sbr.rel (!%p114_p3) target bundleno = 23 (0x17), region = 36  ;;  %s260_s11 = sand.u32 (%p114_p3), 1, %s1343_s25  }
  0x10   : > { %s1143_s12 = sshll.u32 (%p114_p3), %s1351_s27, 4  ;;  %s1084_s13 = sshll.u32 (%p114_p3), %s260_s11, 6 }
  0x11   : > { %s265_s16 = scalar_lea.vmem (%p114_p3), %s1591_s3, %s1143_s12  ;;  %s262_s17 = scalar_lea.vmem (%p114_p3), [#allocation4], %s1084_s13 }
  0x12   : > { %v278_v0 = vld [vmem:[%s265_s16] sm:$0xff] (%p114_p3)  ;;  %v280_v1 = vld [vmem:[%s265_s16 + $0x8] sm:$0xff] (%p114_p3) }
  0x13   : > { %v282_v2 = vld [vmem:[%s265_s16 + $0x40] sm:$0xff] (%p114_p3)  ;;  %279 = vst [vmem:[%s262_s17] sm:$0xff] (%p114_p3), %v278_v0  ;;  %281 = vst [vmem:[%s262_s17 + $0x8] sm:$0xff] (%p114_p3), %v280_v1  ;;  %v284_v3 = vld [vmem:[%s265_s16 + $0x48] sm:$0xff] (%p114_p3) }
  0x14   : > { %283 = vst [vmem:[%s262_s17 + $0x10] sm:$0xff] (%p114_p3), %v282_v2  ;;  %v286_v4 = vld [vmem:[%s265_s16 + $0x80] sm:$0xff] (%p114_p3)  ;;  %v288_v5 = vld [vmem:[%s265_s16 + $0x88] sm:$0xff] (%p114_p3)  ;;  %285 = vst [vmem:[%s262_s17 + $0x18] sm:$0xff] (%p114_p3), %v284_v3 }
  0x15   : > { %287 = vst [vmem:[%s262_s17 + $0x20] sm:$0xff] (%p114_p3), %v286_v4  ;;  %289 = vst [vmem:[%s262_s17 + $0x28] sm:$0xff] (%p114_p3), %v288_v5  ;;  %v290_v6 = vld [vmem:[%s265_s16 + $0xc0] sm:$0xff] (%p114_p3)  ;;  %v292_v7 = vld [vmem:[%s265_s16 + $0xc8] sm:$0xff] (%p114_p3) }
  0x16   : > { %291 = vst [vmem:[%s262_s17 + $0x30] sm:$0xff] %v290_v6  ;;  %293 = vst [vmem:[%s262_s17 + $0x38] sm:$0xff] %v292_v7 }
  0x17 PF: > { %p1087_p6 = scmp.ge.s32.totalorder %s1355_s28, 1  ;;  %p315_p7 = scmp.lt.s32.totalorder %s1355_s28, 5 }
  0x19   : > { %p316_p8 = pnand %p1087_p6, %p315_p7 }
  0x1a   : > { %s322_s18 = sand.u32 (!%p316_p8), 1, %s1339_s24   ;;  %s1089_s19 = sshll.u32 (!%p316_p8), %s1347_s26, 2 }
  0x1b   : > { %319 = sbr.rel (%p316_p8) target bundleno = 848 (0x350), region = 67  ;;  %s1088_s20 = sshll.u32 (!%p316_p8), %s322_s18, 6 }
  0x1c   : > { %p370_p9 = scmp.lt.s32.totalorder (!%p316_p8), %s1089_s19, 15  ;;  %s1090_s21 = sshll.u32 (!%p316_p8), %s1347_s26, 6 }
  0x1d   : > { %p375_p10 = scmp.lt.s32.totalorder (!%p316_p8), %s1090_s21, 255  ;;  %s1462_s24 = scalar_lea.vmem (!%p316_p8), [#allocation4], %s1088_s20 }
  0x1e   : > { %p1092_p11 = scmp.ne.s32.totalorder (!%p316_p8), %s1347_s26, 0 }
  0x22   : > { %s1604_s19 = smov (!%p370_p9, %s1089_s19), 15  ;;  %s1606_s21 = smov (!%p375_p10, %s1090_s21), 255 }
  0x23   : > { %s372_s8 = scalar_lea.vmem %s1592_s4, %s1604_s19  ;;  %s1091_s9 = sshll.u32 %s1606_s21, 2  ;;  %v386_v8 = vld [vmem:[%s1588_s0] sm:$0xff] (!%p1092_p11)  ;;  %vm388_vm0 = vcmask (!%p1092_p11), 261120   ;;  %v387_v9 = vld [vmem:[%s1588_s0 + $0x8] sm:$0xff] (!%p1092_p11)  ;;  %v1357_v11 = vmov (!%p1092_p11), 0.0  }
  0x24   : > { %s1460_s13 = scalar_lea.vmem %s1593_s5, %s1091_s9  ;;  %385 = sbr.rel (%p1092_p11) target bundleno = 356 (0x164), region = 75  ;;  %v389_v10 = vsel (!%p1092_p11), %vm388_vm0, %v386_v8, 0.0  ;;  %436 = vst.msk [vmem:[#allocation3] sm:$0xff] (!%p1092_p11), %vm388_vm0, %v1357_v11  ;;  %437 = vst.msk [vmem:[#allocation3 + $0x8] sm:$0xff] (!%p1092_p11), %vm388_vm0, %v1357_v11  ;;  %v392_v12 = vsel (!%p1092_p11), %vm388_vm0, %v387_v9, 0.0 }
  0x25   : > { %390 = vadd.xlane.f32.xlu0 (!%p1092_p11), %v389_v10  ;;  %v1093_v31 = vld [vmem:[%s1589_s1] ss:$0 sm:$0xff] (!%p1092_p11) }
  0x26   : > { %v1094_v35 = vld [vmem:[%s1590_s2] ss:$0 sm:$0xff] (!%p1092_p11) }
  0x29   : > { %393 = vadd.xlane.f32.xlu0 (!%p1092_p11), %v392_v12 }
  0xb2   : > { %v391_v13 = vpop.xlane.xlu0 %390 }
  0xb3   : > { %v396_v14 = vmul.f32 0.03125, %v391_v13 }
  0xb5   : > { %v398_v15 = vsub.f32 %v386_v8, %v396_v14 }
  0xb6   : > { %v394_v16 = vpop.xlane.xlu0 %393 }
  0xb7   : > { %v397_v17 = vmul.f32 0.03125, %v394_v16  ;;  %v400_v18 = vmul.f32 %v398_v15, %v398_v15 }
  0xb9   : > { %v399_v19 = vsub.f32 %v387_v9, %v397_v17  ;;  %v402_v20 = vsel %vm388_vm0, %v400_v18, 0.0 }
  0xba   : > { %403 = vadd.xlane.f32.xlu1 %v402_v20 }
  0xbb   : > { %v401_v21 = vmul.f32 %v399_v19, %v399_v19 }
  0xbd   : > { %v405_v22 = vsel %vm388_vm0, %v401_v21, 0.0 }
  0xbe   : > { %406 = vadd.xlane.f32.xlu1 %v405_v22 }
 0x147   : > { %v404_v23 = vpop.xlane.xlu1 %403 }
 0x148   : > { %v408_v24 = vmul.f32 0.03125, %v404_v23 }
 0x14a   : > { %v410_v25 = vadd.f32 1e-05, %v408_v24 }
 0x14b   : > { %v407_v26 = vpop.xlane.xlu1 %406 }
 0x14c   : > { %1239 = vrsqrt.f32 %v410_v25  ;;  %v409_v27 = vmul.f32 0.03125, %v407_v26 }
 0x14e   : > { %v411_v28 = vadd.f32 1e-05, %v409_v27 }
 0x150   : > { %1241 = vrsqrt.f32 %v411_v28 }
 0x156   : > { %v1240_v29 = vpop.eup %1239 }
 0x157   : > { %v414_v30 = vmul.f32 %v1240_v29, %v398_v15 }
 0x159   : > { %v423_v33 = vmul.f32 %v1093_v31, %v414_v30 }
 0x15a   : > { %v1242_v32 = vpop.eup %1241 }
 0x15b   : > { %v415_v34 = vmul.f32 %v1242_v32, %v399_v19  ;;  %v432_v37 = vadd.f32 %v1094_v35, %v423_v33 }
 0x15d   : > { %v424_v36 = vmul.f32 %v1093_v31, %v415_v34 }
 0x15f   : > { %v433_v38 = vadd.f32 %v1094_v35, %v424_v36 }
 0x161   : > { %v434_v39 = vpack.c.bf16 %v433_v38, %v432_v37 }
 0x163   : > { %435 = vst.msk [vmem:[#allocation2] sm:$0xff] %vm388_vm0, %v434_v39 }
 0x164 PF: > { %v1243_v40 = vld [vmem:[%s1462_s24 + $0x4] ss:$16 sps:$4 sm:$0xff]   ;;  %v1245_v41 = vld [vmem:[%s1462_s24 + $0xc] ss:$16 sps:$4 sm:$0xff]   ;;  %v1358_v42 = vmov 0   ;;  %vm509_vm1 = vcmask 261120   ;;  %v449_v18 = vlaneseq }
 0x165   : > { %545 = vmatprep.mubr.bf16.mxu0 %v1358_v42  ;;  %588 = vmatprep.mubr.bf16.mxu1 %v1358_v42  ;;  %v1247_v43 = vld [vmem:[%s1462_s24] ss:$16 sps:$4 sm:$0xff]   ;;  %v1248_v44 = vld [vmem:[%s1462_s24 + $0x8] ss:$16 sps:$4 sm:$0xff]   ;;  %v1249_v45 = vld [vmem:[%s1462_s24 + $0x24] ss:$16 sps:$4 sm:$0xff]  }
 0x166   : > { %513 = vmatprep.subr.bf16.mxu0 %v1243_v40  ;;  %556 = vmatprep.subr.bf16.mxu1 %v1245_v41  ;;  %v1251_v46 = vld [vmem:[%s1462_s24 + $0x2c] ss:$16 sps:$4 sm:$0xff]   ;;  %v1253_v47 = vld [vmem:[%s1462_s24 + $0x20] ss:$16 sps:$4 sm:$0xff]   ;;  %v1254_v48 = vld [vmem:[%s1462_s24 + $0x28] ss:$16 sps:$4 sm:$0xff]  }
 0x167   : > { %514 = vmatpush1.bf16.msra.mxu0 %v1247_v43  ;;  %557 = vmatpush1.bf16.msra.mxu1 %v1248_v44  ;;  %v1255_v50 = vld [vmem:[%s1460_s13 + $0x40] sm:$0xff]   ;;  %v1259_v54 = vld [vmem:[%s1460_s13 + $0x48] sm:$0xff]   ;;  %v1263_v58 = vld [vmem:[%s1460_s13 + $0x50] sm:$0xff]   ;;  %v450_v19 = vshrl.u32 %v449_v18, 7  ;;  %p1137_p12 = scmp.ne.s32.totalorder %s1347_s26, 3 }
 0x168   : > { %515 = vmatprep.subr.bf16.mxu0 %v1249_v45  ;;  %558 = vmatprep.subr.bf16.mxu1 %v1251_v46  ;;  %v1256_v51 = vld [vmem:[%s1460_s13 + $0xc0] sm:$0xff]   ;;  %v1260_v55 = vld [vmem:[%s1460_s13 + $0xc8] sm:$0xff]   ;;  %v1264_v59 = vld [vmem:[%s1460_s13 + $0xd0] sm:$0xff]  }
 0x169   : > { %v1257_v52 = vld [vmem:[%s1460_s13] sm:$0xff]   ;;  %v1261_v56 = vld [vmem:[%s1460_s13 + $0x8] sm:$0xff]   ;;  %v1265_v60 = vld [vmem:[%s1460_s13 + $0x10] sm:$0xff]   ;;  %v451_v20 = vsub.s32 0, %v450_v19  ;;  %v459_v21 = vsub.s32 2, %v450_v19  ;;  %v455_v23 = vsub.s32 1, %v450_v19 }
 0x16a   : > { %v438_v49 = vld [vmem:[#allocation2] sm:$0xff]  ;;  %v1262_v57 = vld [vmem:[%s1460_s13 + $0x88] sm:$0xff]   ;;  %v1266_v61 = vld [vmem:[%s1460_s13 + $0x90] sm:$0xff]   ;;  %v463_v24 = vsub.s32 3, %v450_v19 }
 0x16b   : > { %516 = vmatpush1.bf16.msra.mxu0 %v1253_v47  ;;  %559 = vmatpush1.bf16.msra.mxu1 %v1254_v48  ;;  %v1258_v53 = vld [vmem:[%s1460_s13 + $0x80] sm:$0xff]   ;;  %v1267_v62 = vld [vmem:[%s1460_s13 + $0x58] sm:$0xff]   ;;  %v1275_v6 = vld [vmem:[%s1460_s13 + $0x68] sm:$0xff]  }
 0x16c   : > { %1144 = vmatprep.subr.bf16.mxu0 %v1255_v50  ;;  %1166 = vmatprep.subr.bf16.mxu1 %v1256_v51  ;;  %v1268_v63 = vld [vmem:[%s1460_s13 + $0xd8] sm:$0xff]   ;;  %v1271_v2 = vld [vmem:[%s1460_s13 + $0x60] sm:$0xff]   ;;  %v1276_v7 = vld [vmem:[%s1460_s13 + $0xe8] sm:$0xff]  }
 0x16d   : > { %v1269_v0 = vld [vmem:[%s1460_s13 + $0x18] sm:$0xff]   ;;  %v1272_v3 = vld [vmem:[%s1460_s13 + $0xe0] sm:$0xff]   ;;  %v1277_v8 = vld [vmem:[%s1460_s13 + $0x28] sm:$0xff]  }
 0x16e   : > { %1103 = vmatmul.mubr.msk.bf16.vlgmr.msra.gmra.mrb[0].mxu0 %vm509_vm1, %v438_v49  ;;  %1104 = vmatmul.mubr.msk.bf16.vlgmr.msra.gmra.mrb[0].mxu1 %vm509_vm1, %v438_v49  ;;  %v1270_v1 = vld [vmem:[%s1460_s13 + $0x98] sm:$0xff]   ;;  %v1273_v4 = vld [vmem:[%s1460_s13 + $0x20] sm:$0xff]   ;;  %v1278_v9 = vld [vmem:[%s1460_s13 + $0xa8] sm:$0xff]  }
 0x16f   : > { %1145 = vmatpush3.bf16.msra.mxu0 %v1257_v52  ;;  %1167 = vmatpush3.bf16.msra.mxu1 %v1258_v53  ;;  %v1274_v5 = vld [vmem:[%s1460_s13 + $0xa0] sm:$0xff]   ;;  %v1279_v10 = vld [vmem:[%s1460_s13 + $0x70] sm:$0xff]   ;;  %v1283_v14 = vld [vmem:[%s1460_s13 + $0x78] sm:$0xff]  }
 0x170   : > { %1146 = vmatprep.subr.bf16.mxu0 %v1259_v54  ;;  %1168 = vmatprep.subr.bf16.mxu1 %v1260_v55  ;;  %v1280_v11 = vld [vmem:[%s1460_s13 + $0xf0] sm:$0xff]   ;;  %v1284_v15 = vld [vmem:[%s1460_s13 + $0xf8] sm:$0xff]   ;;  %v447_v22 = vld [vmem:[%s372_s8] sm:$0xf] }
 0x171   : > { %v1281_v12 = vld [vmem:[%s1460_s13 + $0x30] sm:$0xff]   ;;  %v1285_v16 = vld [vmem:[%s1460_s13 + $0x38] sm:$0xff]   ;;  %v452_v25 = vrot.slane %v447_v22, %v451_v20  ;;  %v460_v26 = vrot.slane %v447_v22, %v459_v21  ;;  %v456_v27 = vrot.slane %v447_v22, %v455_v23  ;;  %v464_v28 = vrot.slane %v447_v22, %v463_v24 }
 0x172   : > { %v1282_v13 = vld [vmem:[%s1460_s13 + $0xb0] sm:$0xff]   ;;  %v1286_v17 = vld [vmem:[%s1460_s13 + $0xb8] sm:$0xff]  }
 0x173   : > { %1147 = vmatpush3.bf16.msra.mxu0 %v1261_v56  ;;  %1169 = vmatpush3.bf16.msra.mxu1 %v1262_v57 }
 0x174   : > { %1148 = vmatprep.subr.bf16.mxu0 %v1263_v58  ;;  %1170 = vmatprep.subr.bf16.mxu1 %v1264_v59 }
 0x177   : > { %1149 = vmatpush3.bf16.msra.mxu0 %v1265_v60  ;;  %1171 = vmatpush3.bf16.msra.mxu1 %v1266_v61 }
 0x178   : > { %1150 = vmatprep.subr.bf16.mxu0 %v1267_v62  ;;  %1172 = vmatprep.subr.bf16.mxu1 %v1268_v63 }
 0x17b   : > { %1151 = vmatpush3.bf16.msra.mxu0 %v1269_v0  ;;  %1173 = vmatpush3.bf16.msra.mxu1 %v1270_v1  ;;  %v607_v1 = vld [vmem:[#allocation3] sm:$0xff] }
 0x17c   : > { %1152 = vmatprep.subr.bf16.mxu0 %v1271_v2  ;;  %1174 = vmatprep.subr.bf16.mxu1 %v1272_v3 }
 0x17f   : > { %1153 = vmatpush3.bf16.msra.mxu0 %v1273_v4  ;;  %1175 = vmatpush3.bf16.msra.mxu1 %v1274_v5 }
 0x180   : > { %1154 = vmatprep.subr.bf16.mxu0 %v1275_v6  ;;  %1176 = vmatprep.subr.bf16.mxu1 %v1276_v7  ;;  %v608_v7 = vld [vmem:[#allocation3 + $0x8] sm:$0xff] }
 0x183   : > { %1155 = vmatpush3.bf16.msra.mxu0 %v1277_v8  ;;  %1177 = vmatpush3.bf16.msra.mxu1 %v1278_v9 }
 0x184   : > { %1156 = vmatprep.subr.bf16.mxu0 %v1279_v10  ;;  %1178 = vmatprep.subr.bf16.mxu1 %v1280_v11 }
 0x187   : > { %1157 = vmatpush3.bf16.msra.mxu0 %v1281_v12  ;;  %1179 = vmatpush3.bf16.msra.mxu1 %v1282_v13  ;;  %v1138_v12 = vld [vmem:[%s1594_s6] ss:$0 sm:$0xff] (!%p1137_p12) }
 0x188   : > { %1158 = vmatprep.subr.bf16.mxu0 %v1283_v14  ;;  %1180 = vmatprep.subr.bf16.mxu1 %v1284_v15  ;;  %v970_v13 = vld [vmem:[%s1588_s0] sm:$0xff] (!%p1137_p12) }
 0x18b   : > { %1159 = vmatpush3.bf16.msra.mxu0 %v1285_v16  ;;  %1181 = vmatpush3.bf16.msra.mxu1 %v1286_v17  ;;  %v971_v16 = vld [vmem:[%s1588_s0 + $0x8] sm:$0xff] (!%p1137_p12) }
 0x241   : > { %v547_v29 = vpop.f32.mrb[0].mxu0  ;;  %v590_v30 = vpop.f32.mrb[0].mxu1 }
 0x242   : > { %v548_v31 = vadd.f32 %v547_v29, %v452_v25  ;;  %v591_v32 = vadd.f32 %v590_v30, %v460_v26  ;;  %v549_v33 = vpop.f32.mrb[1].mxu0  ;;  %v592_v34 = vpop.f32.mrb[1].mxu1 }
 0x243   : > { %v550_v35 = vadd.f32 %v549_v33, %v456_v27  ;;  %v593_v36 = vadd.f32 %v592_v34, %v464_v28  ;;  %v551_v37 = vpop.f32.mrb[2].mxu0  ;;  %v594_v38 = vpop.f32.mrb[2].mxu1 }
 0x244   : > { %v552_v39 = vadd.f32 %v551_v37, %v452_v25  ;;  %v595_v40 = vadd.f32 %v594_v38, %v460_v26  ;;  %v553_v41 = vpop.f32.mrb[3].mxu0  ;;  %v596_v42 = vpop.f32.mrb[3].mxu1  ;;  %v599_v45 = vmax.f32 %v548_v31, 0.0  ;;  %v601_v46 = vmax.f32 %v591_v32, 0.0 }
 0x245   : > { %v554_v43 = vadd.f32 %v553_v41, %v456_v27  ;;  %v597_v44 = vadd.f32 %v596_v42, %v464_v28  ;;  %v600_v49 = vmax.f32 %v550_v35, 0.0  ;;  %v602_v50 = vmax.f32 %v593_v36, 0.0 }
 0x246   : > { %v603_v47 = vmax.f32 %v552_v39, 0.0  ;;  %v605_v48 = vmax.f32 %v595_v40, 0.0 }
 0x247   : > { %v604_v51 = vmax.f32 %v554_v43, 0.0  ;;  %v606_v52 = vmax.f32 %v597_v44, 0.0 }
 0x248   : > { %v609_v53 = vpack.c.bf16 %v603_v47, %v599_v45  ;;  %v611_v54 = vpack.c.bf16 %v605_v48, %v601_v46 }
 0x249   : > { %v610_v55 = vpack.c.bf16 %v604_v51, %v600_v49  ;;  %v612_v56 = vpack.c.bf16 %v606_v52, %v602_v50 }
 0x24b   : > { %901 = vmatprep.mubr.bf16.mxu0 %v610_v55  ;;  %942 = vmatprep.mubr.bf16.mxu1 %v612_v56 }
 0x24c   : > { %902 = vmatmul.mubr.bf16.vlgmr.msra.gmra.mrb[4].mxu0 %v609_v53  ;;  %943 = vmatmul.mubr.bf16.vlgmr.msra.gmra.mrb[4].mxu1 %v611_v54 }
 0x31f   : > { %v1160_v57 = vpop.f32.mrb[4].mxu0  ;;  %v1182_v58 = vpop.f32.mrb[4].mxu1 }
 0x320   : > { %v1161_v59 = vpop.f32.mrb[5].mxu0  ;;  %v1183_v60 = vpop.f32.mrb[5].mxu1 }
 0x321   : > { %v1162_v61 = vadd.f32 %v1161_v59, %v1160_v57  ;;  %v1184_v62 = vadd.f32 %v1183_v60, %v1182_v58  ;;  %v1163_v63 = vpop.f32.mrb[6].mxu0  ;;  %v1185_v0 = vpop.f32.mrb[6].mxu1 }
 0x322   : > { %v1164_v2 = vpop.f32.mrb[7].mxu0  ;;  %v1186_v3 = vpop.f32.mrb[7].mxu1 }
 0x323   : > { %v945_v4 = vadd.f32 %v1184_v62, %v1162_v61  ;;  %v1165_v5 = vadd.f32 %v1164_v2, %v1163_v63  ;;  %v1187_v6 = vadd.f32 %v1186_v3, %v1185_v0  ;;  %958 = sbr.rel (%p1137_p12) target bundleno = 822 (0x336), region = 79 }
 0x325   : > { %v951_v8 = vadd.f32 %v945_v4, %v607_v1  ;;  %v948_v9 = vadd.f32 %v1187_v6, %v1165_v5 }
 0x327   : > { %953 = vst.msk [vmem:[#allocation3] sm:$0xff] %vm509_vm1, %v951_v8  ;;  %v952_v10 = vadd.f32 %v948_v9, %v608_v7 }
 0x329   : > { %954 = vst.msk [vmem:[#allocation3 + $0x8] sm:$0xff] %vm509_vm1, %v952_v10 }
 0x32e   : > { %v959_v11 = vld [vmem:[#allocation3] sm:$0xff] }
 0x32f   : > { %v968_v14 = vadd.f32 %v1138_v12, %v959_v11 }
 0x330   : > { %v960_v15 = vld [vmem:[#allocation3 + $0x8] sm:$0xff] }
 0x331   : > { %v969_v17 = vadd.f32 %v1138_v12, %v960_v15  ;;  %v972_v18 = vadd.f32 %v970_v13, %v968_v14 }
 0x333   : > { %v973_v19 = vadd.f32 %v971_v16, %v969_v17  ;;  %974 = vst.msk [vmem:[#allocation5] sm:$0xff] %vm509_vm1, %v972_v18 }
 0x335   : > { %975 = vst.msk [vmem:[#allocation5 + $0x8] sm:$0xff] %vm509_vm1, %v973_v19 }
 0x336 PF: > { %p1547_p13 = scmp.eq.s32.totalorder %s1080_s29, 3  ;;  %s1359_s14 = smov [#allocation5]  }
 0x337   : > { %s985_s15 = sshll.u32 %s1359_s14, 4  ;;  %s986_s15 = int_to_ptr.vmem [resolvable:$true] %s985_s15 }
 0x338   : > { %s1287_s16 = scalar_lea.vmem %s986_s15, 256  ;;  %p1294_p3 = scmp.lt.s32.totalorder %s986_s15, %s986_s15 }
 0x339   : > { %p1288_p0 = scmp.ne.s32.totalorder %s986_s15, %s1287_s16  ;;  %p1295_p4 = scmp.lt.s32.totalorder %s1287_s16, %s1287_s16 }
 0x33b   : > { %p1289_p1 = pnand %p1288_p0, %p1547_p13  ;;  %p1296_p5 = por %p1295_p4, %p1294_p3 }
 0x33d   : > { %p1290_p2 = pneg %p1289_p1 }
 0x33f   : > { %p1297_p6 = pnand %p1296_p5, %p1290_p2 }
 0x341   : > { %1300 = shalt.err (!%p1297_p6)
}
 0x342   : > { %s1301_s29 = scalar_lea.hbm %s1595_s7, 256 }
 0x343   : > { %p1302_p7 = scmp.ne.s32.totalorder %s1595_s7, %s1301_s29  ;;  %p1307_p10 = scmp.lt.u32.totalorder %s1301_s29, %s1595_s7 }
 0x345   : > { %p1303_p8 = pnand %p1302_p7, %p1547_p13 }
 0x347   : > { %p1304_p9 = pneg %p1303_p8 }
 0x349   : > { %p1309_p11 = pnand %p1307_p10, %p1304_p9 }
 0x34b   : > { %1312 = shalt.err (!%p1309_p11)
}
 0x34c   : > { %s1360_s9 = smov 128   ;;  %s1361_s19 = smov 8  }
 0x34d   : > { %1189 = dma.vmem_to_hbm [thread:$0]  (%p1547_p13), %s986_s15, 256, %s1595_s7, [#allocation6], %s1360_s9, %s1360_s9, %s1361_s19  }
 0x34e   : > { %1334 = dma.done.wait (%p1547_p13), [#allocation6], 256  }
 0x34f   : > { %1336 = vsyncadd (%p1547_p13), [#allocation6], 4294967040 }
 0x350 PF: > { %s18_s28 = sadd.s32 1, %s1355_s28   ;;  %s1597_s24 = smov %s1343_s25 }
 0x351   : > { %p15_p12 = scmp.ge.s32.totalorder %s18_s28, 6   ;;  %s1598_s25 = smov %s1438_s10 }
 0x352   : > { %s1599_s26 = smov %s1351_s27  ;;  %s1600_s27 = smov %s1602_s30 }
 0x353   :  { %17 = sbr.rel (!%p15_p12) target bundleno = 3 (0x3), region = 121 }
 0x35a   :  { %1001 = vsyncpa [#allocation6], 1 }
 0x35b   :  { %1003 = vsyncpa [#allocation6 + $0x1], 1 }

</bundles_post_ra>
